<compile_context>
chip_gen: v7x
topology: tpu7x:2x2x1
jax: 0.10.0
libtpu: 0.0.40
codegen_flags: <defaults>
</compile_context>

<pallas_src>
import jax
import jax.numpy as jnp
import numpy as np
from jax.experimental import pallas as pl
from jax.experimental.pallas import tpu as pltpu

M_GAME = 5
M_GAMES = 500
N_MOVES = 2 * M_GAME * M_GAMES        # 5000 input symbols
F_IN = 6 * M_GAME * M_GAMES           # 15000 one-hot features
H1 = 1000
H2 = 700
N_OUT = 3

# ---- padded / tiled sizes (all padding is zeros => exact result) -----------
F_PAD = 15360                 # 120 * 128 : divides cleanly into 4 K tiles
TK = 3840                     # 30 * 128  : 4 K steps per half -> real pipeline
N_K = F_PAD // TK             # 4
H1_PAD = 1024                 # 8 * 128
H1_BLK = H1_PAD // 2          # 512 columns per parallel program
N_J = H1_PAD // H1_BLK        # 2 (parallel axis -> both TCs on v7x)
H2_PAD = 768                  # 6 * 128 : lane-dense partial store


def srp_fused_kernel(x_ref, w1_ref, b1_ref, w2_ref, o_ref, acc_ref):
    """One column-half j: accumulate h1_j = x @ W1[:, j-half] over K tiles in a
    resident f32 scratch; on the last K step apply bias+ReLU (f32) and emit the
    partial layer-2 pre-activation  p_j = relu(h1_j) @ W2[j-half rows]."""
    k = pl.program_id(1)

    @pl.when(k == 0)
    def _():
        acc_ref[...] = jnp.zeros_like(acc_ref)

    acc_ref[...] += jnp.dot(x_ref[...], w1_ref[...],
                            preferred_element_type=jnp.float32)

    @pl.when(k == pl.num_programs(1) - 1)
    def _():
        h1_half = jnp.maximum(acc_ref[...] + b1_ref[...], 0.0)     # f32, no bf16 downcast
        o_ref[...] = jnp.dot(h1_half, w2_ref[...].astype(jnp.float32),
                             preferred_element_type=jnp.float32)


def _fused_l12(new_x, w1p, b1p, w2p):
    grid_spec = pltpu.PrefetchScalarGridSpec(
        num_scalar_prefetch=0,
        grid=(N_J, N_K),                                   # j parallel, k arbitrary (last)
        in_specs=[
            pl.BlockSpec((1, TK), lambda j, k: (0, k)),            # one-hot x K-tile (bf16)
            pl.BlockSpec((None, TK, H1_BLK), lambda j, k: (j, k, 0)),  # contiguous W1 tile
            pl.BlockSpec((1, H1_BLK), lambda j, k: (0, j)),        # b1 half (f32)
            pl.BlockSpec((H1_BLK, H2_PAD), lambda j, k: (j, 0)),   # W2 row-half (bf16, resident over k)
        ],
        out_specs=pl.BlockSpec((None, 1, H2_PAD), lambda j, k: (j, 0, 0)),
        scratch_shapes=[pltpu.VMEM((1, H1_BLK), jnp.float32)],     # h1 half accumulator
    )
    return pl.pallas_call(
        srp_fused_kernel,
        out_shape=jax.ShapeDtypeStruct((N_J, 1, H2_PAD), jnp.float32),
        grid_spec=grid_spec,
        compiler_params=pltpu.CompilerParams(
            dimension_semantics=("parallel", "arbitrary"),
            # footprint / core: 2x ~3.9 MB W1 tiles + ~0.8 MB W2 half + small
            # -> well under v7x 64 MiB physical and v5e 128 MiB physical.
            vmem_limit_bytes=32 << 20),
    )(new_x, w1p, b1p, w2p)


def prepare_params(params):
    """ONE-TIME offline prep (hoisted out of the forward path): pad K to F_PAD,
    pad H1 to H1_PAD and H2 to H2_PAD, cast W1/W2 to bf16, and re-layout W1 so
    each 512-wide column half is a contiguous (F_PAD, H1_BLK) slab."""
    w1, b1, w2, b2, w3, b3 = params
    w1p = jnp.zeros((F_PAD, H1_PAD), jnp.float32).at[:F_IN, :H1].set(w1)
    w1p = w1p.astype(jnp.bfloat16)
    w1p = w1p.reshape(F_PAD, N_J, H1_BLK).transpose(1, 0, 2)  # (N_J, F_PAD, H1_BLK), contiguous tiles
    b1p = jnp.zeros((1, H1_PAD), jnp.float32).at[:, :H1].set(b1)
    w2p = jnp.zeros((H1_PAD, H2_PAD), jnp.float32).at[:H1, :H2].set(w2)
    w2p = w2p.astype(jnp.bfloat16)
    # TODO(synk): optional W1 weight-only quantization (int8 on v5e/v6e, fp8 on
    # v7x) and cross-call VMEM residency of W1 are left out to keep one exact,
    # generation-portable code path.
    return (w1p, b1p, w2p, b2, w3, b3)


@jax.jit
def srp_forward(x, prep):
    w1p, b1p, w2p, b2, w3, b3 = prep
    # One-hot preprocessing, mirroring the python loop in the torch forward:
    #   0 -> (0,0,0), 1 -> (1,0,0), 2 -> (0,1,0), 3 -> (0,0,1)
    onehot = (x[:, None] == jnp.arange(1, 4, dtype=x.dtype)[None, :])
    new_x = onehot.reshape(1, F_IN).astype(jnp.bfloat16)
    new_x = jnp.pad(new_x, ((0, 0), (0, F_PAD - F_IN)))        # tiny (~30 KB) pad
    partials = _fused_l12(new_x, w1p, b1p, w2p)                # (N_J, 1, H2_PAD) f32
    p = partials[0, 0, :H2] + partials[1, 0, :H2]              # layer-2 pre-activation
    h2 = jnp.maximum(p + b2, 0.0)
    return h2 @ w3 + b3                                        # (3,)


def init_params(key):
    # Deterministic init matching torch.nn.Linear default: U(-1/sqrt(fan_in), .)
    ks = jax.random.split(key, 6)

    def lin(kw, kb, fan_in, fan_out):
        bound = 1.0 / np.sqrt(fan_in)
        w = jax.random.uniform(kw, (fan_in, fan_out), jnp.float32, -bound, bound)
        b = jax.random.uniform(kb, (fan_out,), jnp.float32, -bound, bound)
        return w, b

    w1, b1 = lin(ks[0], ks[1], F_IN, H1)
    w2, b2 = lin(ks[2], ks[3], H1, H2)
    w3, b3 = lin(ks[4], ks[5], H2, N_OUT)
    return (w1, b1, w2, b2, w3, b3)


def reference_forward(x, params):
    w1, b1, w2, b2, w3, b3 = params
    onehot = (x[:, None] == jnp.arange(1, 4, dtype=x.dtype)[None, :])
    new_x = onehot.astype(jnp.float32).reshape(F_IN)
    h1 = jnp.maximum(new_x @ w1 + b1, 0.0)
    h2 = jnp.maximum(h1 @ w2 + b2, 0.0)
    return h2 @ w3 + b3


if __name__ == "__main__":
    key = jax.random.PRNGKey(0)
    k_param, k_x = jax.random.split(key)
    params = init_params(k_param)
    prep = prepare_params(params)          # offline: pad + bf16 cast + relayout, once
    # x is a length-5000 vector of symbols in {0,1,2,3}, as the forward implies
    x = jax.random.randint(k_x, (N_MOVES,), 0, 4, dtype=jnp.int32)

    out = jax.block_until_ready(srp_forward(x, prep))
    ref = jax.block_until_ready(reference_forward(x, params))

    assert out.shape == (N_OUT,)
    np.testing.assert_allclose(np.asarray(out), np.asarray(ref),
                               rtol=2e-2, atol=2e-2)
    print("KERNEL_OK")
</pallas_src>

<mosaic_0001>
module attributes {stable_mosaic.version = 11 : i64} {
  func.func @srp_fused_kernel(%arg0: i32, %arg1: i32, %arg2: memref<1x3840xbf16, #tpu.memory_space<vmem>>, %arg3: memref<1x3840x512xbf16, #tpu.memory_space<vmem>>, %arg4: memref<1x512xf32, #tpu.memory_space<vmem>>, %arg5: memref<512x768xbf16, #tpu.memory_space<vmem>>, %arg6: memref<1x1x768xf32, #tpu.memory_space<vmem>>, %arg7: memref<1x512xf32, #tpu.memory_space<vmem>>) attributes {dimension_semantics = [#tpu.dimension_semantics<parallel>, #tpu.dimension_semantics<arbitrary>], iteration_bounds = array<i64: 2, 4>, scalar_prefetch = 0 : i64, scratch_operands = 1 : i64, tpu.core_type = #tpu.core_type<tc>, window_params = [{transform_indices = @transform_0, window_bounds = array<i64: 1, 3840>}, {transform_indices = @transform_1, window_bounds = array<i64: 1, 3840, 512>}, {transform_indices = @transform_2, window_bounds = array<i64: 1, 512>}, {transform_indices = @transform_3, window_bounds = array<i64: 512, 768>}, {transform_indices = @transform_4, window_bounds = array<i64: 1, 1, 768>}]} {
    %c0_i32 = arith.constant 0 : i32
    %0 = arith.cmpi eq, %arg1, %c0_i32 : i32
    %1 = arith.extui %0 : i1 to i32
    %c0_i32_0 = arith.constant 0 : i32
    %2 = arith.cmpi ne, %1, %c0_i32_0 : i32
    scf.if %2 {
      %cst_10 = arith.constant 0.000000e+00 : f32
      %13 = vector.broadcast %cst_10 : f32 to vector<1x512xf32>
      %c0_11 = arith.constant 0 : index
      %c0_12 = arith.constant 0 : index
      %14 = vector.load %arg7[%c0_11, %c0_12] : memref<1x512xf32, #tpu.memory_space<vmem>>, vector<1x512xf32>
      tpu.vector_store %arg7[%c0_11, %c0_12], %13 {strides = array<i32>} : memref<1x512xf32, #tpu.memory_space<vmem>>, vector<1x512xf32>,
    } else {
    }
    %c0 = arith.constant 0 : index
    %c0_1 = arith.constant 0 : index
    %3 = vector.load %arg7[%c0, %c0_1] : memref<1x512xf32, #tpu.memory_space<vmem>>, vector<1x512xf32>
    %c0_2 = arith.constant 0 : index
    %c0_3 = arith.constant 0 : index
    %4 = vector.load %arg2[%c0_2, %c0_3] : memref<1x3840xbf16, #tpu.memory_space<vmem>>, vector<1x3840xbf16>
    %c0_4 = arith.constant 0 : index
    %c0_5 = arith.constant 0 : index
    %c0_6 = arith.constant 0 : index
    %5 = vector.load %arg3[%c0_4, %c0_5, %c0_6] : memref<1x3840x512xbf16, #tpu.memory_space<vmem>>, vector<1x3840x512xbf16>
    %6 = vector.shape_cast %5 : vector<1x3840x512xbf16> to vector<3840x512xbf16>
    %cst = arith.constant dense<0.000000e+00> : vector<1x512xf32>
    %7 = tpu.matmul %4, %6, %cst {dimension_numbers = #tpu.dot_dimension_numbers<[1], [0], [0], [1], [0, 0, 1, 1], [], []>} : vector<1x3840xbf16>, vector<3840x512xbf16>, vector<1x512xf32> -> vector<1x512xf32>
    %8 = arith.addf %3, %7 : vector<1x512xf32>
    %c0_7 = arith.constant 0 : index
    %c0_8 = arith.constant 0 : index
    %9 = vector.load %arg7[%c0_7, %c0_8] : memref<1x512xf32, #tpu.memory_space<vmem>>, vector<1x512xf32>
    tpu.vector_store %arg7[%c0_7, %c0_8], %8 {strides = array<i32>} : memref<1x512xf32, #tpu.memory_space<vmem>>, vector<1x512xf32>,
    %c3_i32 = arith.constant 3 : i32
    %10 = arith.cmpi eq, %arg1, %c3_i32 : i32
    %11 = arith.extui %10 : i1 to i32
    %c0_i32_9 = arith.constant 0 : i32
    %12 = arith.cmpi ne, %11, %c0_i32_9 : i32
    scf.if %12 {
      %c0_10 = arith.constant 0 : index
      %c0_11 = arith.constant 0 : index
      %13 = vector.load %arg7[%c0_10, %c0_11] : memref<1x512xf32, #tpu.memory_space<vmem>>, vector<1x512xf32>
      %c0_12 = arith.constant 0 : index
      %c0_13 = arith.constant 0 : index
      %14 = vector.load %arg4[%c0_12, %c0_13] : memref<1x512xf32, #tpu.memory_space<vmem>>, vector<1x512xf32>
      %15 = arith.addf %13, %14 : vector<1x512xf32>
      %cst_14 = arith.constant 0.000000e+00 : f32
      %16 = vector.broadcast %cst_14 : f32 to vector<1x512xf32>
      %17 = arith.maximumf %15, %16 : vector<1x512xf32>
      %c0_15 = arith.constant 0 : index
      %c0_16 = arith.constant 0 : index
      %18 = vector.load %arg5[%c0_15, %c0_16] : memref<512x768xbf16, #tpu.memory_space<vmem>>, vector<512x768xbf16>
      %19 = arith.extf %18 : vector<512x768xbf16> to vector<512x768xf32>
      %cst_17 = arith.constant dense<0.000000e+00> : vector<1x768xf32>
      %20 = tpu.matmul %17, %19, %cst_17 {dimension_numbers = #tpu.dot_dimension_numbers<[1], [0], [0], [1], [0, 0, 1, 1], [], []>} : vector<1x512xf32>, vector<512x768xf32>, vector<1x768xf32> -> vector<1x768xf32>
      %c0_18 = arith.constant 0 : index
      %c0_19 = arith.constant 0 : index
      %c0_20 = arith.constant 0 : index
      %21 = vector.load %arg6[%c0_18, %c0_19, %c0_20] : memref<1x1x768xf32, #tpu.memory_space<vmem>>, vector<1x1x768xf32>
      %22 = vector.shape_cast %21 : vector<1x1x768xf32> to vector<1x768xf32>
      %23 = vector.shape_cast %20 : vector<1x768xf32> to vector<1x1x768xf32>
      tpu.vector_store %arg6[%c0_18, %c0_19, %c0_20], %23 {strides = array<i32>} : memref<1x1x768xf32, #tpu.memory_space<vmem>>, vector<1x1x768xf32>,
    } else {
    }
    return
  }
  func.func @transform_0(%arg0: i32, %arg1: i32) -> (i32, i32) {
    %c0_i32 = arith.constant 0 : i32
    %c0_i32_0 = arith.constant 0 : i32
    return %c0_i32, %arg1 : i32, i32
  }
  func.func @transform_1(%arg0: i32, %arg1: i32) -> (i32, i32, i32) {
    %c0_i32 = arith.constant 0 : i32
    %c0_i32_0 = arith.constant 0 : i32
    return %arg0, %arg1, %c0_i32 : i32, i32, i32
  }
  func.func @transform_2(%arg0: i32, %arg1: i32) -> (i32, i32) {
    %c0_i32 = arith.constant 0 : i32
    %c0_i32_0 = arith.constant 0 : i32
    return %c0_i32, %arg0 : i32, i32
  }
  func.func @transform_3(%arg0: i32, %arg1: i32) -> (i32, i32) {
    %c0_i32 = arith.constant 0 : i32
    %c0_i32_0 = arith.constant 0 : i32
    return %arg0, %c0_i32 : i32, i32
  }
  func.func @transform_4(%arg0: i32, %arg1: i32) -> (i32, i32, i32) {
    %c0_i32 = arith.constant 0 : i32
    %c0_i32_0 = arith.constant 0 : i32
    %c0_i32_1 = arith.constant 0 : i32
    return %arg0, %c0_i32, %c0_i32_0 : i32, i32, i32
  }
}

</mosaic_0001>

<bundles_post_ra>
// kernel: srp_forward.1
= control target key start
LH: loop header
LB: loop body
LE: loop exit
PB: predicated region body
PF: predicated region fallthrough
CT: control target
= control target key end

     0   :  { %s14218_s0 = inlined_call_operand.vmem [shape: bf16[1,15360], index: 0, kind: input, shape index: {}]   ;;  %s14219_s1 = inlined_call_operand.hbm [shape: bf16[2,15360,512], index: 1, kind: input, shape index: {}]   ;;  %s14220_s2 = inlined_call_operand.hbm [shape: f32[1,1024], index: 2, kind: input, shape index: {}]   ;;  %s14221_s3 = inlined_call_operand.hbm [shape: bf16[1024,768], index: 3, kind: input, shape index: {}]   ;;  %s14222_s4 = inlined_call_operand.vmem [shape: f32[2,1,768], index: 4, kind: output, shape index: {}]  }
   0x1   :  { %14231 = sst [smem:[#allocation16_spill]] %s14220_s2 }
   0x2   :  { %14232 = sst [smem:[#allocation17_spill]] %s14222_s4 }
   0x3   :  { %9 = vsyncpa [#allocation4], 0 }
   0x4   :  { %11 = vsyncpa [#allocation4 + $0x1], 0 }
   0x5   :  { %12 = vsyncpa [#allocation6], 0 }
   0x6   :  { %14 = vsyncpa [#allocation6 + $0x1], 0  ;;  %s12556_s15 = smov 0   ;;  %s12558_s16 = smov 0  }
   0x7   :  { %s12560_s17 = smov 0   ;;  %s12562_s18 = smov 0  }
   0x8   :  { %s12564_s19 = smov 0   ;;  %s12566_s20 = smov 0  }
   0x9   :  { %s12568_s21 = smov 0   ;;  %s12570_s22 = smov 0  }
   0xa   :  { %s12572_s23 = smov 0   ;;  %s12574_s24 = smov 0  }
   0xb   :  { %s12576_s25 = smov 0  }
   0xc LB: > { %14233 = sst [smem:[#allocation10_spill]] %s12488_s17  ;;  %s14223_s26 = sadd.s32 4294967295, %s12520_s25   ;;  %s12520_s25 = sphi %s12576_s25, %s20_s25   ;;  %s12516_s24 = sphi %s12574_s24, %s14270_s24   ;;  %s12512_s23 = sphi %s12572_s23, %s14261_s23   ;;  %s12508_s22 = sphi %s12570_s22, %s14269_s22   ;;  %s12504_s21 = sphi %s12568_s21, %s14268_s21   ;;  %s12500_s20 = sphi %s12566_s20, %s14267_s20   ;;  %s12496_s19 = sphi %s12564_s19, %s14266_s19   ;;  %s12492_s18 = sphi %s12562_s18, %s14265_s18   ;;  %s12488_s17 = sphi %s12560_s17, %s14258_s17   ;;  %s12484_s16 = sphi %s12558_s16, %s14264_s16   ;;  %s12480_s15 = sphi %s12556_s15, %s14263_s15  }
   0xd   : > { %14234 = sst [smem:[#allocation11_spill]] %s12512_s23  ;;  %s29_s27 = sadd.s32 1, %s12512_s23 }
   0xe   : > { %p30_p0 = scmp.ge.s32.totalorder %s29_s27, 4  ;;  %s32_s28 = sadd.s32 1, %s12516_s24 }
   0xf   : > { %s67_s29 = sadd.s32 1, %s12500_s20  ;;  %p74_p1 = scmp.ne.s32.totalorder %s12500_s20, %s12496_s19 }
  0x10   : > { %s14272_s27 = smov (%p30_p0, %s29_s27), 0  ;;  %s14274_s28 = smov (!%p30_p0, %s32_s28), %s12516_s24 }
  0x11   : > { %14235 = sst [smem:[#allocation12_spill]] %s14272_s27  ;;  %s63_s30 = ssub.s32 %s12512_s23, %s14272_s27 }
  0x12   : > { %p75_p2 = scmp.eq.s32.totalorder %s12520_s25, 0  ;;  %p34_p3 = scmp.ge.s32.totalorder %s14274_s28, 2 }
  0x13   : > { %p80_p4 = scmp.ne.s32.totalorder %s12496_s19, %s12492_s18  ;;  %p12630_p6 = scmp.eq.s32.totalorder %s14223_s26, 0 }
  0x14   : > { %p12624_p5 = por %p75_p2, %p74_p1  ;;  %s14276_s28 = smov (%p34_p3, %s14274_s28), 0 }
  0x15   : > { %14238 = sst [smem:[#allocation13_spill]] %s14276_s28  ;;  %p12638_p7 = por %p12630_p6, %p80_p4 }
  0x16   : > { %s93_s8 = sadd.s32 1, %s12488_s17  ;;  %s62_s9 = ssub.s32 %s12516_s24, %s14276_s28 }
  0x17   : > { %s14239_s7 = scalar_select %p12638_p7, 1, 0 }
  0x18   : > { %p100_p8 = scmp.ne.s32.totalorder %s12488_s17, %s12484_s16  ;;  %s64_s10 = sor.u32 %s63_s30, %s62_s9 }
  0x19   : > { %p91_p9 = scmp.eq.s32.totalorder %s62_s9, 0  ;;  %p65_p10 = scmp.eq.s32.totalorder %s64_s10, 0 }
  0x1a   : > { %p12649_p11 = por %p100_p8, %p75_p2  ;;  %p106_p12 = scmp.ne.s32.totalorder %s12484_s16, %s12480_s15 }
  0x1b   : > { %s12654_s12 = scalar_select %p91_p9, %s12488_s17, %s93_s8  }
  0x1c   : > { %s12657_s13 = scalar_select %p65_p10, %s12500_s20, %s67_s29  }
  0x1d   : > { %14241 = sst [smem:[#allocation14_spill]] %s12654_s12  ;;  %p10507_p13 = scmp.lt.s32.totalorder %s12520_s25, 8 }
  0x1e   : > { %14242 = sst [smem:[#allocation15_spill]] %s12657_s13  ;;  %s214_s14 = sand.u32 1, %s12520_s25  }
  0x1f   : > { %p12665_p0 = por %p106_p12, %p12630_p6  ;;  %p12671_p1 = pnand %p10507_p13, %p12624_p5 }
  0x20   : > { %s216_s9 = sand.u32 1, %s12488_s17   ;;  %s9789_s10 = sshll.u32 %s12516_s24, 6 }
  0x21   : > { %s14243_s18 = scalar_select %p12665_p0, 1, 0 }
  0x22   : > { %s8816_s8 = sshll.u32 %s216_s9, 2  ;;  %s14245_s2 = sld [smem:[#allocation16_spill]] }
  0x23   : > { %s218_s15 = scalar_lea.vmem [#allocation5], %s8816_s8  ;;  %p12686_p2 = pnand %p10507_p13, %p12649_p11 }
  0x24   : > { %s226_s6 = sshll.u32 %s218_s15, 4  ;;  %s12690_s27 = smul.u32 1536, %s216_s9  ;;  %s12682_s6 = int_to_ptr.vmem [resolvable:$true] %s226_s6 }
  0x25   : > { %s12694_s26 = scalar_lea.sflag [#allocation6], %s214_s14  ;;  %p14230_p6 = pneg %p12686_p2 }
  0x28   : > { %s12680_s28 = scalar_lea.hbm %s14245_s2, %s9789_s10  ;;  %s12341_s29 = scalar_lea.hbm %s14245_s2, 128 }
  0x29   : > { %s12336_s10 = scalar_lea.hbm %s12680_s28, 64  ;;  %p12342_p10 = scmp.lt.u32.totalorder %s12680_s28, %s14245_s2 }
  0x2a   : > { %p12337_p5 = scmp.ne.s32.totalorder %s12680_s28, %s12336_s10  ;;  %p12343_p11 = scmp.lt.u32.totalorder %s12341_s29, %s12336_s10 }
  0x2b   : > { %p12345_p13 = scmp.lt.u32.totalorder %s12336_s10, %s12680_s28 }
  0x2c   : > { %p12339_p8 = pnand %p14230_p6, %p12337_p5  ;;  %p12344_p12 = por %p12343_p11, %p12342_p10 }
  0x2e   : > { %p12340_p9 = pneg %p12339_p8  ;;  %p12346_p3 = por %p12345_p13, %p12344_p12 }
  0x30   : > { %p12347_p4 = pnand %p12346_p3, %p12340_p9 }
  0x32   : > { %12350 = shalt.err (!%p12347_p4)
}
  0x33   : > { %s12351_s14 = scalar_lea.vmem %s12682_s6, 64  ;;  %s12522_s9 = smov [#allocation5]  }
  0x34   : > { %p12352_p5 = scmp.ne.s32.totalorder %s12682_s6, %s12351_s14  ;;  %s12356_s11 = sshll.u32 %s12522_s9, 4  ;;  %s12357_s11 = int_to_ptr.vmem [resolvable:$false] %s12356_s11 }
  0x35   : > { %s12358_s13 = scalar_lea.vmem %s12357_s11, 128  ;;  %p12359_p7 = scmp.lt.s32.totalorder %s12682_s6, %s12357_s11 }
  0x36   : > { %p12354_p8 = pnand %p12352_p5, %p14230_p6  ;;  %p12360_p10 = scmp.lt.s32.totalorder %s12358_s13, %s12351_s14 }
  0x38   : > { %p12355_p0 = pneg %p12354_p8  ;;  %p12361_p11 = por %p12360_p10, %p12359_p7 }
  0x3a   : > { %p12362_p12 = pnand %p12361_p11, %p12355_p0 }
  0x3c   : > { %12365 = shalt.err (!%p12362_p12)
}
  0x3d   : > { %10503 = dma.hbm_to_vmem [thread:$0]  (!%p12686_p2), %s12680_s28, 64, %s12682_s6, %s12694_s26  }
  0x3e   : > { %p14247_p3 = scmp.lt.s32.totalorder %s12520_s25, 9  ;;  %p14248_p4 = scmp.ge.s32.totalorder %s12520_s25, 1 }
  0x3f   : > { %s237_s8 = scalar_lea.vmem [#allocation7], %s12690_s27  ;;  %s190_s15 = sand.u32 1, %s12500_s20  }
  0x40   : > { %p12726_p9 = pnand %p14248_p4, %p14247_p3  ;;  %s245_s29 = sshll.u32 %s237_s8, 4  ;;  %s12731_s29 = int_to_ptr.vmem [resolvable:$true] %s245_s29 }
  0x41   : > { %s9788_s14 = smul.u32 1920, %s12512_s23  ;;  %s12744_s8 = scalar_lea.sflag [#allocation4], %s190_s15 }
  0x42   : > { %s14249_s10 = scalar_select %p12726_p9, 1, 0 }
  0x43   : > { %s10484_s9 = smul.u32 7680, %s190_s15  ;;  %p12368_p0 = pneg %p12671_p1 }
  0x44   : > { %s10485_s11 = smul.u32 7680, %s12516_s24  ;;  %s12371_s17 = scalar_lea.hbm %s14219_s1, 983040 }
  0x45   : > { %s194_s2 = scalar_lea.vmem [#allocation3], %s10484_s9  ;;  %s10487_s27 = smul.u32 24576, %s12516_s24 }
  0x46   : > { %s201_s13 = sadd.s32 %s10485_s11, %s9788_s14  ;;  %s204_s12 = sshll.u32 %s194_s2, 4  ;;  %s12736_s12 = int_to_ptr.vmem [resolvable:$true] %s204_s12 }
  0x47   : > { %s8815_s28 = sshll.u32 %s201_s13, 6 }
  0x48   : > { %s12741_s4 = scalar_lea.hbm %s14219_s1, %s8815_s28 }
  0x49   : > { %s12366_s23 = scalar_lea.hbm %s12741_s4, 122880  ;;  %p12372_p8 = scmp.lt.u32.totalorder %s12741_s4, %s14219_s1 }
  0x4a   : > { %p12367_p7 = scmp.ne.s32.totalorder %s12741_s4, %s12366_s23  ;;  %p12373_p10 = scmp.lt.u32.totalorder %s12371_s17, %s12366_s23 }
  0x4b   : > { %p12375_p12 = scmp.lt.u32.totalorder %s12366_s23, %s12741_s4 }
  0x4c   : > { %p12369_p13 = pnand %p12368_p0, %p12367_p7  ;;  %p12374_p11 = por %p12373_p10, %p12372_p8 }
  0x4e   : > { %p12370_p5 = pneg %p12369_p13  ;;  %p12376_p3 = por %p12375_p12, %p12374_p11 }
  0x50   : > { %p12377_p4 = pnand %p12376_p3, %p12370_p5 }
  0x52   : > { %12380 = shalt.err (!%p12377_p4)
}
  0x53   : > { %s12381_s15 = scalar_lea.vmem %s12736_s12, 122880  ;;  %s12523_s13 = smov [#allocation3]  }
  0x54   : > { %p12382_p7 = scmp.ne.s32.totalorder %s12736_s12, %s12381_s15  ;;  %s12386_s28 = sshll.u32 %s12523_s13, 4  ;;  %s12387_s28 = int_to_ptr.vmem [resolvable:$false] %s12386_s28 }
  0x55   : > { %s12388_s6 = scalar_lea.vmem %s12387_s28, 245760  ;;  %p12389_p9 = scmp.lt.s32.totalorder %s12736_s12, %s12387_s28 }
  0x56   : > { %p12384_p13 = pnand %p12382_p7, %p12368_p0  ;;  %p12390_p8 = scmp.lt.s32.totalorder %s12388_s6, %s12381_s15 }
  0x58   : > { %p12385_p6 = pneg %p12384_p13  ;;  %p12391_p10 = por %p12390_p8, %p12389_p9 }
  0x5a   : > { %p12392_p11 = pnand %p12391_p10, %p12385_p6 }
  0x5c   : > { %12395 = shalt.err (!%p12392_p11)
}
  0x5d   : > { %s12524_s23 = smov 256   ;;  %s12525_s2 = smov 16  }
  0x5e   : > { %10500 = dma.hbm_to_vmem [thread:$0]  (!%p12671_p1), %s12741_s4, 122880, %s12736_s12, %s12744_s8, %s12524_s23, %s12524_s23, %s12525_s2  }
  0x5f   : > { %s12777_s9 = scalar_lea.hbm %s14221_s3, %s10487_s27  ;;  %p14250_p9 = pneg %p12686_p2 }
  0x60   : > { %s12396_s11 = scalar_lea.hbm %s12777_s9, 24576  ;;  %s12401_s4 = scalar_lea.hbm %s14221_s3, 49152 }
  0x61   : > { %p12397_p6 = scmp.ne.s32.totalorder %s12777_s9, %s12396_s11  ;;  %p12402_p1 = scmp.lt.u32.totalorder %s12777_s9, %s14221_s3 }
  0x62   : > { %p12403_p12 = scmp.lt.u32.totalorder %s12401_s4, %s12396_s11  ;;  %p12405_p4 = scmp.lt.u32.totalorder %s12396_s11, %s12777_s9 }
  0x63   : > { %p12399_p0 = pnand %p12397_p6, %p14250_p9 }
  0x64   : > { %p12404_p3 = por %p12403_p12, %p12402_p1 }
  0x65   : > { %p12400_p5 = pneg %p12399_p0 }
  0x66   : > { %p12406_p7 = por %p12405_p4, %p12404_p3 }
  0x68   : > { %p12407_p13 = pnand %p12406_p7, %p12400_p5 }
  0x6a   : > { %12410 = shalt.err (!%p12407_p13)
}
  0x6b   : > { %s12411_s27 = scalar_lea.vmem %s12731_s29, 24576  ;;  %p14251_p10 = pmov %p14250_p9 }
  0x6c   : > { %p12412_p8 = scmp.ne.s32.totalorder %s12731_s29, %s12411_s27  ;;  %s12526_s8 = smov [#allocation7]  }
  0x6d   : > { %s12416_s28 = sshll.u32 %s12526_s8, 4  ;;  %s12417_s28 = int_to_ptr.vmem [resolvable:$false] %s12416_s28 }
  0x6e   : > { %p12414_p11 = pnand %p12412_p8, %p14251_p10  ;;  %s12418_s6 = scalar_lea.vmem %s12417_s28, 49152 }
  0x6f   : > { %p12419_p9 = scmp.lt.s32.totalorder %s12731_s29, %s12417_s28  ;;  %p12420_p0 = scmp.lt.s32.totalorder %s12418_s6, %s12411_s27 }
  0x70   : > { %p12415_p6 = pneg %p12414_p11 }
  0x71   : > { %p12421_p1 = por %p12420_p0, %p12419_p9 }
  0x73   : > { %p12422_p12 = pnand %p12421_p1, %p12415_p6 }
  0x75   : > { %12425 = shalt.err (!%p12422_p12)
}
  0x76   : > { %s12527_s23 = smov 384   ;;  %s12528_s2 = smov 24  }
  0x77   : > { %10506 = dma.hbm_to_vmem [thread:$0]  (!%p12686_p2), %s12777_s9, 24576, %s12731_s29, %s12694_s26, %s12527_s23, %s12527_s23, %s12528_s2  }
  0x78   : > { %p14252_p5 = scmp.ne.s32.totalorder %s14249_s10, 0 }
  0x79   : > { %s259_s14 = sand.u32 (!%p14252_p5), 1, %s12496_s19   ;;  %p14253_p3 = scmp.ne.s32.totalorder (!%p14252_p5), %s14239_s7, 0 }
  0x7a   : > { %257 = sbr.rel (%p14252_p5) target bundleno = 1700 (0x6a4), region = 36  ;;  %s260_s11 = scalar_lea.sflag (!%p14252_p5), [#allocation4], %s259_s14 }
  0x7b   : > { %s10488_s17 = smul.u32 (!%p14252_p5), 7680, %s259_s14 }
  0x7d   : > { %s12806_s15 = scalar_lea.vmem (!%p14252_p5), [#allocation3], %s10488_s17 }
  0x81   : > { %12471 = dma.done.wait (%p14253_p3), %s260_s11, 122880  }
  0x82   : > { %12473 = vsyncadd (%p14253_p3), %s260_s11, 4294844416  ;;  %s14254_s13 = sadd.s32 4294967295, %s12520_s25   ;;  %s270_s26 = sand.u32 1, %s12484_s16  }
  0x83   : > { %s268_s5 = sand.u32 1, %s14254_s13   ;;  %s12815_s10 = sshll.u32 %s270_s26, 2 }
  0x84   : > { %s269_s29 = scalar_lea.sflag [#allocation6], %s268_s5  ;;  %s272_s9 = scalar_lea.vmem [#allocation5], %s12815_s10 }
  0x85   : > { %p14255_p2 = scmp.ne.s32.totalorder %s14243_s18, 0 }
  0x87   : > { %12475 = dma.done.wait (%p14255_p2), %s269_s29, 24640  }
  0x88   : > { %12477 = vsyncadd (%p14255_p2), %s269_s29, 4294942656  ;;  %s10489_s7 = smul.u32 1536, %s270_s26  ;;  %p327_p4 = scmp.lt.s32.totalorder %s12508_s22, 1 }
  0x89   : > { %s319_s4 = smul.u32 30, %s12504_s21  ;;  %s14256_s23 = sld [smem:[#allocation17_spill]] }
  0x8a   : > { %s14278_s22 = smov (!%p327_p4, %s12508_s22), 1  ;;  %s12835_s2 = scalar_lea.vmem [#allocation7], %s10489_s7 }
  0x8b   : > { %p320_p7 = scmp.lt.s32.totalorder %s319_s4, 119  ;;  %s10490_s12 = smul.u32 6, %s14278_s22 }
  0x8c   : > { %p8824_p13 = scmp.ne.s32.totalorder %s12504_s21, 0 }
  0x8d   : > { %s14280_s4 = smov (!%p320_p7, %s319_s4), 119  ;;  %v335_v0 = vlaneseq (!%p8824_p13)  ;;  %v12529_v1 = vmov (!%p8824_p13), 0.0  }
  0x8e   : > { %s12828_s8 = scalar_lea.vmem %s14218_s0, %s14280_s4  ;;  %334 = sbr.rel (%p8824_p13) target bundleno = 149 (0x95), region = 52 }
  0x8f   : > { %s12833_s18 = scalar_lea.vmem %s14256_s23, %s10490_s12  ;;  %vm337_vm0 = vcmp.lt.s32.totalorder (!%p8824_p13), %v335_v0, 512 }
  0x90   : > { %339 = vst.msk [vmem:[#allocation2] sm:$0xf] (!%p8824_p13), %vm337_vm0, %v12529_v1 }
  0x95 PF: > { %v10602_v2 = vld [vmem:[%s12806_s15 + $0x4] ss:$16 sps:$4 sm:$0xff]   ;;  %v10604_v3 = vld [vmem:[%s12806_s15 + $0xc] ss:$16 sps:$4 sm:$0xff]   ;;  %v10606_v4 = vld [vmem:[%s12806_s15] ss:$16 sps:$4 sm:$0xff]   ;;  %v1313_v40 = vlaneseq }
  0x96   : > { %6333 = vmatprep.subr.bf16.mxu0 %v10602_v2  ;;  %v10607_v5 = vld [vmem:[%s12806_s15 + $0x8] ss:$16 sps:$4 sm:$0xff]   ;;  %6948 = vmatprep.subr.bf16.mxu1 %v10604_v3  ;;  %v10608_v6 = vld [vmem:[%s12806_s15 + $0x24] ss:$16 sps:$4 sm:$0xff]   ;;  %v10610_v7 = vld [vmem:[%s12806_s15 + $0x2c] ss:$16 sps:$4 sm:$0xff]  }
  0x97   : > { %6334 = vmatpush1.bf16.msra.mxu0 %v10606_v4  ;;  %6949 = vmatpush1.bf16.msra.mxu1 %v10607_v5  ;;  %v10612_v8 = vld [vmem:[%s12806_s15 + $0x20] ss:$16 sps:$4 sm:$0xff]   ;;  %v10613_v9 = vld [vmem:[%s12806_s15 + $0x28] ss:$16 sps:$4 sm:$0xff]   ;;  %v10614_v10 = vld [vmem:[%s12806_s15 + $0x44] ss:$16 sps:$4 sm:$0xff]  }
  0x98   : > { %6335 = vmatprep.subr.bf16.mxu0 %v10608_v6  ;;  %6950 = vmatprep.subr.bf16.mxu1 %v10610_v7  ;;  %v10616_v11 = vld [vmem:[%s12806_s15 + $0x4c] ss:$16 sps:$4 sm:$0xff]   ;;  %v10618_v12 = vld [vmem:[%s12806_s15 + $0x40] ss:$16 sps:$4 sm:$0xff]   ;;  %v10619_v13 = vld [vmem:[%s12806_s15 + $0x48] ss:$16 sps:$4 sm:$0xff]  }
  0x99   : > { %v10620_v14 = vld [vmem:[%s12806_s15 + $0x64] ss:$16 sps:$4 sm:$0xff]   ;;  %v10622_v15 = vld [vmem:[%s12806_s15 + $0x6c] ss:$16 sps:$4 sm:$0xff]   ;;  %v10624_v16 = vld [vmem:[%s12806_s15 + $0x60] ss:$16 sps:$4 sm:$0xff]  }
  0x9a   : > { %v10625_v17 = vld [vmem:[%s12806_s15 + $0x68] ss:$16 sps:$4 sm:$0xff]   ;;  %v10626_v18 = vld [vmem:[%s12806_s15 + $0x84] ss:$16 sps:$4 sm:$0xff]   ;;  %v10628_v19 = vld [vmem:[%s12806_s15 + $0x8c] ss:$16 sps:$4 sm:$0xff]  }
  0x9b   : > { %6336 = vmatpush1.bf16.msra.mxu0 %v10612_v8  ;;  %6951 = vmatpush1.bf16.msra.mxu1 %v10613_v9  ;;  %v10630_v20 = vld [vmem:[%s12806_s15 + $0x80] ss:$16 sps:$4 sm:$0xff]   ;;  %v10631_v21 = vld [vmem:[%s12806_s15 + $0x88] ss:$16 sps:$4 sm:$0xff]   ;;  %v10632_v22 = vld [vmem:[%s12806_s15 + $0xa4] ss:$16 sps:$4 sm:$0xff]  }
  0x9c   : > { %6337 = vmatprep.subr.bf16.mxu0 %v10614_v10  ;;  %6952 = vmatprep.subr.bf16.mxu1 %v10616_v11  ;;  %v10634_v23 = vld [vmem:[%s12806_s15 + $0xac] ss:$16 sps:$4 sm:$0xff]   ;;  %v10636_v24 = vld [vmem:[%s12806_s15 + $0xa0] ss:$16 sps:$4 sm:$0xff]   ;;  %v10637_v25 = vld [vmem:[%s12806_s15 + $0xa8] ss:$16 sps:$4 sm:$0xff]  }
  0x9d   : > { %v10638_v26 = vld [vmem:[%s12806_s15 + $0xc4] ss:$16 sps:$4 sm:$0xff]   ;;  %v10640_v27 = vld [vmem:[%s12806_s15 + $0xcc] ss:$16 sps:$4 sm:$0xff]   ;;  %v10642_v28 = vld [vmem:[%s12806_s15 + $0xc0] ss:$16 sps:$4 sm:$0xff]  }
  0x9e   : > { %v10643_v29 = vld [vmem:[%s12806_s15 + $0xc8] ss:$16 sps:$4 sm:$0xff]   ;;  %v10644_v30 = vld [vmem:[%s12806_s15 + $0xe4] ss:$16 sps:$4 sm:$0xff]   ;;  %v10646_v31 = vld [vmem:[%s12806_s15 + $0xec] ss:$16 sps:$4 sm:$0xff]  }
  0x9f   : > { %6338 = vmatpush1.bf16.msra.mxu0 %v10618_v12  ;;  %6953 = vmatpush1.bf16.msra.mxu1 %v10619_v13  ;;  %v10648_v32 = vld [vmem:[%s12806_s15 + $0xe0] ss:$16 sps:$4 sm:$0xff]   ;;  %v10649_v33 = vld [vmem:[%s12806_s15 + $0xe8] ss:$16 sps:$4 sm:$0xff]   ;;  %v10650_v34 = vld [vmem:[%s12806_s15 + $0x104] ss:$16 sps:$4 sm:$0xff]  }
  0xa0   : > { %6339 = vmatprep.subr.bf16.mxu0 %v10620_v14  ;;  %6954 = vmatprep.subr.bf16.mxu1 %v10622_v15  ;;  %v10652_v35 = vld [vmem:[%s12806_s15 + $0x10c] ss:$16 sps:$4 sm:$0xff]   ;;  %v10654_v36 = vld [vmem:[%s12806_s15 + $0x100] ss:$16 sps:$4 sm:$0xff]   ;;  %v10655_v37 = vld [vmem:[%s12806_s15 + $0x108] ss:$16 sps:$4 sm:$0xff]  }
  0xa1   : > { %v12530_v38 = vmov 1966171168   ;;  %v10656_v41 = vld [vmem:[%s12806_s15 + $0x124] ss:$16 sps:$4 sm:$0xff]   ;;  %v10658_v42 = vld [vmem:[%s12806_s15 + $0x12c] ss:$16 sps:$4 sm:$0xff]  }
  0xa2   : > { %v1311_v39 = vunpack.c.l.s4 %v12530_v38  ;;  %v10660_v43 = vld [vmem:[%s12806_s15 + $0x120] ss:$16 sps:$4 sm:$0xff]   ;;  %v12878_v45 = vshrl.u32 %v1313_v40, 7  ;;  %v10661_v46 = vld [vmem:[%s12806_s15 + $0x128] ss:$16 sps:$4 sm:$0xff]   ;;  %vm7595_vm1 = vcmp.lt.s32.totalorder %v1313_v40, 512 }
  0xa3   : > { %6340 = vmatpush1.bf16.msra.mxu0 %v10624_v16  ;;  %6955 = vmatpush1.bf16.msra.mxu1 %v10625_v17  ;;  %v10662_v47 = vld [vmem:[%s12806_s15 + $0x144] ss:$16 sps:$4 sm:$0xff]   ;;  %v10664_v48 = vld [vmem:[%s12806_s15 + $0x14c] ss:$16 sps:$4 sm:$0xff]   ;;  %v10666_v49 = vld [vmem:[%s12806_s15 + $0x140] ss:$16 sps:$4 sm:$0xff]  }
  0xa4   : > { %6341 = vmatprep.subr.bf16.mxu0 %v10626_v18  ;;  %6956 = vmatprep.subr.bf16.mxu1 %v10628_v19  ;;  %v1312_v44 = vunpack.c.0.s8 %v1311_v39  ;;  %v10667_v50 = vld [vmem:[%s12806_s15 + $0x148] ss:$16 sps:$4 sm:$0xff]   ;;  %v10668_v52 = vld [vmem:[%s12806_s15 + $0x164] ss:$16 sps:$4 sm:$0xff]   ;;  %v10670_v53 = vld [vmem:[%s12806_s15 + $0x16c] ss:$16 sps:$4 sm:$0xff]  }
  0xa5   : > { %v12891_v54 = vld [vmem:[%s12828_s8] sm:$0xff]  ;;  %v10673_v57 = vld [vmem:[%s12806_s15 + $0x168] ss:$16 sps:$4 sm:$0xff]   ;;  %v10674_v58 = vld [vmem:[%s12806_s15 + $0x184] ss:$16 sps:$4 sm:$0xff]   ;;  %p9785_p8 = scmp.ne.s32.totalorder %s12504_s21, 3 }
  0xa6   : > { %v12886_v51 = vsub.s32 %v1312_v44, %v12878_v45  ;;  %v10672_v55 = vld [vmem:[%s12806_s15 + $0x160] ss:$16 sps:$4 sm:$0xff]   ;;  %v10676_v59 = vld [vmem:[%s12806_s15 + $0x18c] ss:$16 sps:$4 sm:$0xff]   ;;  %v10679_v63 = vld [vmem:[%s12806_s15 + $0x188] ss:$16 sps:$4 sm:$0xff]  }
  0xa7   : > { %6342 = vmatpush1.bf16.msra.mxu0 %v10630_v20  ;;  %6957 = vmatpush1.bf16.msra.mxu1 %v10631_v21  ;;  %v10678_v61 = vld [vmem:[%s12806_s15 + $0x180] ss:$16 sps:$4 sm:$0xff]   ;;  %v10680_v0 = vld [vmem:[%s12806_s15 + $0x1a4] ss:$16 sps:$4 sm:$0xff]   ;;  %v10682_v1 = vld [vmem:[%s12806_s15 + $0x1ac] ss:$16 sps:$4 sm:$0xff]  }
  0xa8   : > { %6343 = vmatprep.subr.bf16.mxu0 %v10632_v22  ;;  %6958 = vmatprep.subr.bf16.mxu1 %v10634_v23  ;;  %v1316_v56 = vrot.slane %v12891_v54, %v12886_v51  ;;  %v10684_v2 = vld [vmem:[%s12806_s15 + $0x1a0] ss:$16 sps:$4 sm:$0xff]   ;;  %v10685_v3 = vld [vmem:[%s12806_s15 + $0x1a8] ss:$16 sps:$4 sm:$0xff]   ;;  %v10686_v4 = vld [vmem:[%s12806_s15 + $0x1c4] ss:$16 sps:$4 sm:$0xff]  }
  0xa9   : > { %v10688_v5 = vld [vmem:[%s12806_s15 + $0x1cc] ss:$16 sps:$4 sm:$0xff]   ;;  %v10690_v6 = vld [vmem:[%s12806_s15 + $0x1c0] ss:$16 sps:$4 sm:$0xff]   ;;  %v10691_v7 = vld [vmem:[%s12806_s15 + $0x1c8] ss:$16 sps:$4 sm:$0xff]  }
  0xaa   : > { %v1324_v60 = vcombine.high %v1316_v56, %v1316_v56  ;;  %v10692_v8 = vld [vmem:[%s12806_s15 + $0x1e4] ss:$16 sps:$4 sm:$0xff]   ;;  %v10694_v9 = vld [vmem:[%s12806_s15 + $0x1ec] ss:$16 sps:$4 sm:$0xff]   ;;  %v10696_v10 = vld [vmem:[%s12806_s15 + $0x1e0] ss:$16 sps:$4 sm:$0xff]   ;;  %v12918_v15 = vrot.slane %v1316_v56, %v12886_v51 }
  0xab   : > { %6344 = vmatpush1.bf16.msra.mxu0 %v10636_v24  ;;  %6959 = vmatpush1.bf16.msra.mxu1 %v10637_v25  ;;  %v10697_v11 = vld [vmem:[%s12806_s15 + $0x1e8] ss:$16 sps:$4 sm:$0xff]   ;;  %v10700_v12 = vld [vmem:[%s12806_s15 + $0x204] ss:$16 sps:$4 sm:$0xff]   ;;  %v10703_v13 = vld [vmem:[%s12806_s15 + $0x20c] ss:$16 sps:$4 sm:$0xff]  }
  0xac   : > { %6345 = vmatprep.subr.bf16.mxu0 %v10638_v26  ;;  %6960 = vmatprep.subr.bf16.mxu1 %v10640_v27  ;;  %v1346_v62 = vrot.slane %v1324_v60, %v12886_v51  ;;  %v10698_v14 = vld [vmem:[%s12806_s15 + $0x200] ss:$16 sps:$4 sm:$0xff]   ;;  %v10701_v16 = vld [vmem:[%s12806_s15 + $0x208] ss:$16 sps:$4 sm:$0xff]   ;;  %v10706_v17 = vld [vmem:[%s12806_s15 + $0x224] ss:$16 sps:$4 sm:$0xff]  }
  0xad   : > { %v10709_v18 = vld [vmem:[%s12806_s15 + $0x22c] ss:$16 sps:$4 sm:$0xff]   ;;  %v10704_v20 = vld [vmem:[%s12806_s15 + $0x220] ss:$16 sps:$4 sm:$0xff]   ;;  %v10707_v21 = vld [vmem:[%s12806_s15 + $0x228] ss:$16 sps:$4 sm:$0xff]  }
  0xae   : > { %6365 = vmatprep.mubr.bf16.mxu0 %v1346_v62  ;;  %6980 = vmatprep.mubr.bf16.mxu1 %v1346_v62  ;;  %v1356_v19 = vcombine.high %v1346_v62, %v1346_v62  ;;  %v10712_v22 = vld [vmem:[%s12806_s15 + $0x244] ss:$16 sps:$4 sm:$0xff]   ;;  %v10715_v23 = vld [vmem:[%s12806_s15 + $0x24c] ss:$16 sps:$4 sm:$0xff]   ;;  %v10710_v24 = vld [vmem:[%s12806_s15 + $0x240] ss:$16 sps:$4 sm:$0xff]  }
  0xaf   : > { %6346 = vmatpush1.bf16.msra.mxu0 %v10642_v28  ;;  %6961 = vmatpush1.bf16.msra.mxu1 %v10643_v29  ;;  %v10713_v25 = vld [vmem:[%s12806_s15 + $0x248] ss:$16 sps:$4 sm:$0xff]   ;;  %v10718_v26 = vld [vmem:[%s12806_s15 + $0x264] ss:$16 sps:$4 sm:$0xff]   ;;  %v10721_v27 = vld [vmem:[%s12806_s15 + $0x26c] ss:$16 sps:$4 sm:$0xff]  }
  0xb0   : > { %6347 = vmatprep.subr.bf16.mxu0 %v10644_v30  ;;  %6962 = vmatprep.subr.bf16.mxu1 %v10646_v31  ;;  %v10716_v28 = vld [vmem:[%s12806_s15 + $0x260] ss:$16 sps:$4 sm:$0xff]   ;;  %v10719_v29 = vld [vmem:[%s12806_s15 + $0x268] ss:$16 sps:$4 sm:$0xff]   ;;  %v10724_v30 = vld [vmem:[%s12806_s15 + $0x284] ss:$16 sps:$4 sm:$0xff]  }
  0xb1   : > { %v10727_v31 = vld [vmem:[%s12806_s15 + $0x28c] ss:$16 sps:$4 sm:$0xff]   ;;  %v10736_v38 = vld [vmem:[%s12806_s15 + $0x2c4] ss:$16 sps:$4 sm:$0xff]   ;;  %v10752_v56 = vld [vmem:[%s12806_s15 + $0x320] ss:$16 sps:$4 sm:$0xff]  }
  0xb2   : > { %v10739_v39 = vld [vmem:[%s12806_s15 + $0x2cc] ss:$16 sps:$4 sm:$0xff]   ;;  %v10758_v60 = vld [vmem:[%s12806_s15 + $0x340] ss:$16 sps:$4 sm:$0xff]   ;;  %v10766_v62 = vld [vmem:[%s12806_s15 + $0x364] ss:$16 sps:$4 sm:$0xff]  }
  0xb3   : > { %6348 = vmatpush1.bf16.msra.mxu0 %v10648_v32  ;;  %6963 = vmatpush1.bf16.msra.mxu1 %v10649_v33  ;;  %v10722_v32 = vld [vmem:[%s12806_s15 + $0x280] ss:$16 sps:$4 sm:$0xff]   ;;  %v10725_v33 = vld [vmem:[%s12806_s15 + $0x288] ss:$16 sps:$4 sm:$0xff]   ;;  %v10745_v44 = vld [vmem:[%s12806_s15 + $0x2ec] ss:$16 sps:$4 sm:$0xff]  }
  0xb4   : > { %6349 = vmatprep.subr.bf16.mxu0 %v10650_v34  ;;  %6964 = vmatprep.subr.bf16.mxu1 %v10652_v35  ;;  %v10730_v34 = vld [vmem:[%s12806_s15 + $0x2a4] ss:$16 sps:$4 sm:$0xff]   ;;  %v10733_v35 = vld [vmem:[%s12806_s15 + $0x2ac] ss:$16 sps:$4 sm:$0xff]   ;;  %vm8676_vm2 = vcmp.lt.s32.totalorder (!%p9785_p8), %v1313_v40, 768 }
  0xb7   : > { %6350 = vmatpush1.bf16.msra.mxu0 %v10654_v36  ;;  %6965 = vmatpush1.bf16.msra.mxu1 %v10655_v37  ;;  %v10728_v36 = vld [vmem:[%s12806_s15 + $0x2a0] ss:$16 sps:$4 sm:$0xff]   ;;  %v10731_v37 = vld [vmem:[%s12806_s15 + $0x2a8] ss:$16 sps:$4 sm:$0xff]  }
  0xb8   : > { %6351 = vmatprep.subr.bf16.mxu0 %v10656_v41  ;;  %6966 = vmatprep.subr.bf16.mxu1 %v10658_v42  ;;  %v10734_v41 = vld [vmem:[%s12806_s15 + $0x2c0] ss:$16 sps:$4 sm:$0xff]   ;;  %v10737_v42 = vld [vmem:[%s12806_s15 + $0x2c8] ss:$16 sps:$4 sm:$0xff]  }
  0xbb   : > { %6352 = vmatpush1.bf16.msra.mxu0 %v10660_v43  ;;  %6967 = vmatpush1.bf16.msra.mxu1 %v10661_v46  ;;  %v10742_v43 = vld [vmem:[%s12806_s15 + $0x2e4] ss:$16 sps:$4 sm:$0xff]   ;;  %v10740_v46 = vld [vmem:[%s12806_s15 + $0x2e0] ss:$16 sps:$4 sm:$0xff]  }
  0xbc   : > { %6353 = vmatprep.subr.bf16.mxu0 %v10662_v47  ;;  %6968 = vmatprep.subr.bf16.mxu1 %v10664_v48  ;;  %v10743_v47 = vld [vmem:[%s12806_s15 + $0x2e8] ss:$16 sps:$4 sm:$0xff]   ;;  %v10748_v48 = vld [vmem:[%s12806_s15 + $0x304] ss:$16 sps:$4 sm:$0xff]  }
  0xbf   : > { %6354 = vmatpush1.bf16.msra.mxu0 %v10666_v49  ;;  %6969 = vmatpush1.bf16.msra.mxu1 %v10667_v50  ;;  %v10751_v49 = vld [vmem:[%s12806_s15 + $0x30c] ss:$16 sps:$4 sm:$0xff]   ;;  %v10746_v50 = vld [vmem:[%s12806_s15 + $0x300] ss:$16 sps:$4 sm:$0xff]  }
  0xc0   : > { %6355 = vmatprep.subr.bf16.mxu0 %v10668_v52  ;;  %6970 = vmatprep.subr.bf16.mxu1 %v10670_v53  ;;  %v10749_v52 = vld [vmem:[%s12806_s15 + $0x308] ss:$16 sps:$4 sm:$0xff]   ;;  %v10754_v53 = vld [vmem:[%s12806_s15 + $0x324] ss:$16 sps:$4 sm:$0xff]  }
  0xc3   : > { %6356 = vmatpush1.bf16.msra.mxu0 %v10672_v55  ;;  %6971 = vmatpush1.bf16.msra.mxu1 %v10673_v57  ;;  %v10757_v55 = vld [vmem:[%s12806_s15 + $0x32c] ss:$16 sps:$4 sm:$0xff]   ;;  %v10755_v57 = vld [vmem:[%s12806_s15 + $0x328] ss:$16 sps:$4 sm:$0xff]  }
  0xc4   : > { %6357 = vmatprep.subr.bf16.mxu0 %v10674_v58  ;;  %6972 = vmatprep.subr.bf16.mxu1 %v10676_v59  ;;  %v10760_v58 = vld [vmem:[%s12806_s15 + $0x344] ss:$16 sps:$4 sm:$0xff]   ;;  %v10763_v59 = vld [vmem:[%s12806_s15 + $0x34c] ss:$16 sps:$4 sm:$0xff]  }
  0xc7   : > { %6358 = vmatpush1.bf16.msra.mxu0 %v10678_v61  ;;  %6973 = vmatpush1.bf16.msra.mxu1 %v10679_v63  ;;  %v10761_v61 = vld [vmem:[%s12806_s15 + $0x348] ss:$16 sps:$4 sm:$0xff]   ;;  %v10769_v63 = vld [vmem:[%s12806_s15 + $0x36c] ss:$16 sps:$4 sm:$0xff]  }
  0xc8   : > { %6359 = vmatprep.subr.bf16.mxu0 %v10680_v0  ;;  %6974 = vmatprep.subr.bf16.mxu1 %v10682_v1  ;;  %v10764_v0 = vld [vmem:[%s12806_s15 + $0x360] ss:$16 sps:$4 sm:$0xff]   ;;  %v10767_v1 = vld [vmem:[%s12806_s15 + $0x368] ss:$16 sps:$4 sm:$0xff]  }
  0xcb   : > { %6360 = vmatpush1.bf16.msra.mxu0 %v10684_v2  ;;  %6975 = vmatpush1.bf16.msra.mxu1 %v10685_v3  ;;  %v10772_v2 = vld [vmem:[%s12806_s15 + $0x384] ss:$16 sps:$4 sm:$0xff]   ;;  %v10775_v3 = vld [vmem:[%s12806_s15 + $0x38c] ss:$16 sps:$4 sm:$0xff]  }
  0xcc   : > { %6361 = vmatprep.subr.bf16.mxu0 %v10686_v4  ;;  %6976 = vmatprep.subr.bf16.mxu1 %v10688_v5  ;;  %v10770_v4 = vld [vmem:[%s12806_s15 + $0x380] ss:$16 sps:$4 sm:$0xff]   ;;  %v10773_v5 = vld [vmem:[%s12806_s15 + $0x388] ss:$16 sps:$4 sm:$0xff]  }
  0xcf   : > { %6362 = vmatpush1.bf16.msra.mxu0 %v10690_v6  ;;  %6977 = vmatpush1.bf16.msra.mxu1 %v10691_v7  ;;  %v10778_v6 = vld [vmem:[%s12806_s15 + $0x3a4] ss:$16 sps:$4 sm:$0xff]   ;;  %v10781_v7 = vld [vmem:[%s12806_s15 + $0x3ac] ss:$16 sps:$4 sm:$0xff]  }
  0xd0   : > { %6363 = vmatprep.subr.bf16.mxu0 %v10692_v8  ;;  %6978 = vmatprep.subr.bf16.mxu1 %v10694_v9  ;;  %v10776_v8 = vld [vmem:[%s12806_s15 + $0x3a0] ss:$16 sps:$4 sm:$0xff]   ;;  %v10779_v9 = vld [vmem:[%s12806_s15 + $0x3a8] ss:$16 sps:$4 sm:$0xff]  }
  0xd3   : > { %6364 = vmatpush1.bf16.msra.mxu0 %v10696_v10  ;;  %6979 = vmatpush1.bf16.msra.mxu1 %v10697_v11  ;;  %v10784_v10 = vld [vmem:[%s12806_s15 + $0x3c4] ss:$16 sps:$4 sm:$0xff]   ;;  %v10787_v11 = vld [vmem:[%s12806_s15 + $0x3cc] ss:$16 sps:$4 sm:$0xff]  }
  0xd4   : > { %6374 = vmatprep.subr.bf16.mxu0 %v10700_v12  ;;  %6989 = vmatprep.subr.bf16.mxu1 %v10703_v13  ;;  %v1309_v12 = vcombine.high %v12891_v54, %v12891_v54  ;;  %v10782_v13 = vld [vmem:[%s12806_s15 + $0x3c0] ss:$16 sps:$4 sm:$0xff]   ;;  %v10791_v54 = vld [vmem:[%s12806_s15 + $0x3e8] ss:$16 sps:$4 sm:$0xff]  }
  0xd6   : > { %6366 = vmatmul.mubr.bf16.vlgmr.msra.gmra.mrb[0].mxu0 %v12918_v15  ;;  %6981 = vmatmul.mubr.bf16.vlgmr.msra.gmra.mrb[0].mxu1 %v12918_v15 }
  0xd7   : > { %6375 = vmatpush1.bf16.msra.mxu0 %v10698_v14  ;;  %6990 = vmatpush1.bf16.msra.mxu1 %v10701_v16  ;;  %v10785_v14 = vld [vmem:[%s12806_s15 + $0x3c8] ss:$16 sps:$4 sm:$0xff]   ;;  %v10790_v16 = vld [vmem:[%s12806_s15 + $0x3e4] ss:$16 sps:$4 sm:$0xff]  }
  0xd8   : > { %6376 = vmatprep.subr.bf16.mxu0 %v10706_v17  ;;  %6991 = vmatprep.subr.bf16.mxu1 %v10709_v18  ;;  %v10793_v17 = vld [vmem:[%s12806_s15 + $0x3ec] ss:$16 sps:$4 sm:$0xff]   ;;  %v12984_v18 = vrot.slane %v1309_v12, %v12886_v51  ;;  %v10866_v12 = vld [vmem:[%s12806_s15 + $0x580] ss:$16 sps:$4 sm:$0xff]  }
  0xd9   : > { %6406 = vmatprep.mubr.bf16.mxu0 %v1356_v19  ;;  %7021 = vmatprep.mubr.bf16.mxu1 %v1356_v19  ;;  %v10788_v19 = vld [vmem:[%s12806_s15 + $0x3e0] ss:$16 sps:$4 sm:$0xff]  }
  0xdb   : > { %6377 = vmatpush1.bf16.msra.mxu0 %v10704_v20  ;;  %6992 = vmatpush1.bf16.msra.mxu1 %v10707_v21  ;;  %v10796_v20 = vld [vmem:[%s12806_s15 + $0x404] ss:$16 sps:$4 sm:$0xff]   ;;  %v10799_v21 = vld [vmem:[%s12806_s15 + $0x40c] ss:$16 sps:$4 sm:$0xff]  }
  0xdc   : > { %6378 = vmatprep.subr.bf16.mxu0 %v10712_v22  ;;  %6993 = vmatprep.subr.bf16.mxu1 %v10715_v23  ;;  %v1325_v22 = vcombine.high %v12984_v18, %v12984_v18  ;;  %v10794_v23 = vld [vmem:[%s12806_s15 + $0x400] ss:$16 sps:$4 sm:$0xff]  }
  0xdf   : > { %6379 = vmatpush1.bf16.msra.mxu0 %v10710_v24  ;;  %6994 = vmatpush1.bf16.msra.mxu1 %v10713_v25  ;;  %v1354_v24 = vcombine.high %v12918_v15, %v12918_v15  ;;  %v10797_v25 = vld [vmem:[%s12806_s15 + $0x408] ss:$16 sps:$4 sm:$0xff]  }
  0xe0   : > { %6380 = vmatprep.subr.bf16.mxu0 %v10718_v26  ;;  %6995 = vmatprep.subr.bf16.mxu1 %v10721_v27  ;;  %v10802_v26 = vld [vmem:[%s12806_s15 + $0x424] ss:$16 sps:$4 sm:$0xff]   ;;  %v10805_v27 = vld [vmem:[%s12806_s15 + $0x42c] ss:$16 sps:$4 sm:$0xff]   ;;  %v10803_v15 = vld [vmem:[%s12806_s15 + $0x428] ss:$16 sps:$4 sm:$0xff]  }
  0xe3   : > { %6381 = vmatpush1.bf16.msra.mxu0 %v10716_v28  ;;  %6996 = vmatpush1.bf16.msra.mxu1 %v10719_v29  ;;  %v12999_v28 = vrot.slane %v1325_v22, %v12886_v51  ;;  %v10800_v29 = vld [vmem:[%s12806_s15 + $0x420] ss:$16 sps:$4 sm:$0xff]   ;;  %v10881_v22 = vld [vmem:[%s12806_s15 + $0x5c8] ss:$16 sps:$4 sm:$0xff]  }
  0xe4   : > { %6382 = vmatprep.subr.bf16.mxu0 %v10724_v30  ;;  %6997 = vmatprep.subr.bf16.mxu1 %v10727_v31  ;;  %v10808_v30 = vld [vmem:[%s12806_s15 + $0x444] ss:$16 sps:$4 sm:$0xff]   ;;  %v10811_v31 = vld [vmem:[%s12806_s15 + $0x44c] ss:$16 sps:$4 sm:$0xff]  }
  0xe7   : > { %6383 = vmatpush1.bf16.msra.mxu0 %v10722_v32  ;;  %6998 = vmatpush1.bf16.msra.mxu1 %v10725_v33  ;;  %v10806_v32 = vld [vmem:[%s12806_s15 + $0x440] ss:$16 sps:$4 sm:$0xff]   ;;  %v10809_v33 = vld [vmem:[%s12806_s15 + $0x448] ss:$16 sps:$4 sm:$0xff]  }
  0xe8   : > { %6384 = vmatprep.subr.bf16.mxu0 %v10730_v34  ;;  %6999 = vmatprep.subr.bf16.mxu1 %v10733_v35  ;;  %v10814_v34 = vld [vmem:[%s12806_s15 + $0x464] ss:$16 sps:$4 sm:$0xff]   ;;  %v10817_v35 = vld [vmem:[%s12806_s15 + $0x46c] ss:$16 sps:$4 sm:$0xff]  }
  0xeb   : > { %6385 = vmatpush1.bf16.msra.mxu0 %v10728_v36  ;;  %7000 = vmatpush1.bf16.msra.mxu1 %v10731_v37  ;;  %v10812_v36 = vld [vmem:[%s12806_s15 + $0x460] ss:$16 sps:$4 sm:$0xff]   ;;  %v10815_v37 = vld [vmem:[%s12806_s15 + $0x468] ss:$16 sps:$4 sm:$0xff]  }
  0xec   : > { %6386 = vmatprep.subr.bf16.mxu0 %v10736_v38  ;;  %7001 = vmatprep.subr.bf16.mxu1 %v10739_v39  ;;  %v10820_v38 = vld [vmem:[%s12806_s15 + $0x484] ss:$16 sps:$4 sm:$0xff]   ;;  %v10823_v39 = vld [vmem:[%s12806_s15 + $0x48c] ss:$16 sps:$4 sm:$0xff]  }
  0xef   : > { %6387 = vmatpush1.bf16.msra.mxu0 %v10734_v41  ;;  %7002 = vmatpush1.bf16.msra.mxu1 %v10737_v42  ;;  %v10818_v41 = vld [vmem:[%s12806_s15 + $0x480] ss:$16 sps:$4 sm:$0xff]   ;;  %v10821_v42 = vld [vmem:[%s12806_s15 + $0x488] ss:$16 sps:$4 sm:$0xff]  }
  0xf0   : > { %6388 = vmatprep.subr.bf16.mxu0 %v10742_v43  ;;  %7003 = vmatprep.subr.bf16.mxu1 %v10745_v44  ;;  %v10826_v43 = vld [vmem:[%s12806_s15 + $0x4a4] ss:$16 sps:$4 sm:$0xff]   ;;  %v10829_v44 = vld [vmem:[%s12806_s15 + $0x4ac] ss:$16 sps:$4 sm:$0xff]  }
  0xf3   : > { %6389 = vmatpush1.bf16.msra.mxu0 %v10740_v46  ;;  %7004 = vmatpush1.bf16.msra.mxu1 %v10743_v47  ;;  %v10824_v46 = vld [vmem:[%s12806_s15 + $0x4a0] ss:$16 sps:$4 sm:$0xff]   ;;  %v10827_v47 = vld [vmem:[%s12806_s15 + $0x4a8] ss:$16 sps:$4 sm:$0xff]  }
  0xf4   : > { %6390 = vmatprep.subr.bf16.mxu0 %v10748_v48  ;;  %7005 = vmatprep.subr.bf16.mxu1 %v10751_v49  ;;  %v10832_v48 = vld [vmem:[%s12806_s15 + $0x4c4] ss:$16 sps:$4 sm:$0xff]   ;;  %v10835_v49 = vld [vmem:[%s12806_s15 + $0x4cc] ss:$16 sps:$4 sm:$0xff]  }
  0xf7   : > { %6391 = vmatpush1.bf16.msra.mxu0 %v10746_v50  ;;  %7006 = vmatpush1.bf16.msra.mxu1 %v10749_v52  ;;  %v10830_v50 = vld [vmem:[%s12806_s15 + $0x4c0] ss:$16 sps:$4 sm:$0xff]   ;;  %v10833_v52 = vld [vmem:[%s12806_s15 + $0x4c8] ss:$16 sps:$4 sm:$0xff]  }
  0xf8   : > { %6392 = vmatprep.subr.bf16.mxu0 %v10754_v53  ;;  %7007 = vmatprep.subr.bf16.mxu1 %v10757_v55  ;;  %v10838_v53 = vld [vmem:[%s12806_s15 + $0x4e4] ss:$16 sps:$4 sm:$0xff]   ;;  %v10841_v55 = vld [vmem:[%s12806_s15 + $0x4ec] ss:$16 sps:$4 sm:$0xff]  }
  0xfb   : > { %6393 = vmatpush1.bf16.msra.mxu0 %v10752_v56  ;;  %7008 = vmatpush1.bf16.msra.mxu1 %v10755_v57  ;;  %v10836_v56 = vld [vmem:[%s12806_s15 + $0x4e0] ss:$16 sps:$4 sm:$0xff]   ;;  %v10839_v57 = vld [vmem:[%s12806_s15 + $0x4e8] ss:$16 sps:$4 sm:$0xff]  }
  0xfc   : > { %6394 = vmatprep.subr.bf16.mxu0 %v10760_v58  ;;  %7009 = vmatprep.subr.bf16.mxu1 %v10763_v59  ;;  %v10844_v58 = vld [vmem:[%s12806_s15 + $0x504] ss:$16 sps:$4 sm:$0xff]   ;;  %v10847_v59 = vld [vmem:[%s12806_s15 + $0x50c] ss:$16 sps:$4 sm:$0xff]  }
  0xff   : > { %6395 = vmatpush1.bf16.msra.mxu0 %v10758_v60  ;;  %7010 = vmatpush1.bf16.msra.mxu1 %v10761_v61  ;;  %v10842_v60 = vld [vmem:[%s12806_s15 + $0x500] ss:$16 sps:$4 sm:$0xff]   ;;  %v10845_v61 = vld [vmem:[%s12806_s15 + $0x508] ss:$16 sps:$4 sm:$0xff]  }
 0x100   : > { %6396 = vmatprep.subr.bf16.mxu0 %v10766_v62  ;;  %7011 = vmatprep.subr.bf16.mxu1 %v10769_v63  ;;  %v10850_v62 = vld [vmem:[%s12806_s15 + $0x524] ss:$16 sps:$4 sm:$0xff]   ;;  %v10853_v63 = vld [vmem:[%s12806_s15 + $0x52c] ss:$16 sps:$4 sm:$0xff]  }
 0x103   : > { %6397 = vmatpush1.bf16.msra.mxu0 %v10764_v0  ;;  %7012 = vmatpush1.bf16.msra.mxu1 %v10767_v1  ;;  %v10848_v0 = vld [vmem:[%s12806_s15 + $0x520] ss:$16 sps:$4 sm:$0xff]   ;;  %v10851_v1 = vld [vmem:[%s12806_s15 + $0x528] ss:$16 sps:$4 sm:$0xff]  }
 0x104   : > { %6398 = vmatprep.subr.bf16.mxu0 %v10772_v2  ;;  %7013 = vmatprep.subr.bf16.mxu1 %v10775_v3  ;;  %v10856_v2 = vld [vmem:[%s12806_s15 + $0x544] ss:$16 sps:$4 sm:$0xff]   ;;  %v10859_v3 = vld [vmem:[%s12806_s15 + $0x54c] ss:$16 sps:$4 sm:$0xff]  }
 0x107   : > { %6399 = vmatpush1.bf16.msra.mxu0 %v10770_v4  ;;  %7014 = vmatpush1.bf16.msra.mxu1 %v10773_v5  ;;  %v10854_v4 = vld [vmem:[%s12806_s15 + $0x540] ss:$16 sps:$4 sm:$0xff]   ;;  %v10857_v5 = vld [vmem:[%s12806_s15 + $0x548] ss:$16 sps:$4 sm:$0xff]  }
 0x108   : > { %6400 = vmatprep.subr.bf16.mxu0 %v10778_v6  ;;  %7015 = vmatprep.subr.bf16.mxu1 %v10781_v7  ;;  %v10862_v6 = vld [vmem:[%s12806_s15 + $0x564] ss:$16 sps:$4 sm:$0xff]   ;;  %v10865_v7 = vld [vmem:[%s12806_s15 + $0x56c] ss:$16 sps:$4 sm:$0xff]  }
 0x10b   : > { %6401 = vmatpush1.bf16.msra.mxu0 %v10776_v8  ;;  %7016 = vmatpush1.bf16.msra.mxu1 %v10779_v9  ;;  %v10860_v8 = vld [vmem:[%s12806_s15 + $0x560] ss:$16 sps:$4 sm:$0xff]   ;;  %v10863_v9 = vld [vmem:[%s12806_s15 + $0x568] ss:$16 sps:$4 sm:$0xff]  }
 0x10c   : > { %6402 = vmatprep.subr.bf16.mxu0 %v10784_v10  ;;  %7017 = vmatprep.subr.bf16.mxu1 %v10787_v11  ;;  %v10868_v10 = vld [vmem:[%s12806_s15 + $0x584] ss:$16 sps:$4 sm:$0xff]   ;;  %v10871_v11 = vld [vmem:[%s12806_s15 + $0x58c] ss:$16 sps:$4 sm:$0xff]  }
 0x10f   : > { %6403 = vmatpush1.bf16.msra.mxu0 %v10782_v13  ;;  %7018 = vmatpush1.bf16.msra.mxu1 %v10785_v14  ;;  %v10869_v13 = vld [vmem:[%s12806_s15 + $0x588] ss:$16 sps:$4 sm:$0xff]   ;;  %v10874_v14 = vld [vmem:[%s12806_s15 + $0x5a4] ss:$16 sps:$4 sm:$0xff]  }
 0x110   : > { %6404 = vmatprep.subr.bf16.mxu0 %v10790_v16  ;;  %7019 = vmatprep.subr.bf16.mxu1 %v10793_v17  ;;  %v10877_v16 = vld [vmem:[%s12806_s15 + $0x5ac] ss:$16 sps:$4 sm:$0xff]   ;;  %v10872_v17 = vld [vmem:[%s12806_s15 + $0x5a0] ss:$16 sps:$4 sm:$0xff]  }
 0x113   : > { %6405 = vmatpush1.bf16.msra.mxu0 %v10788_v19  ;;  %7020 = vmatpush1.bf16.msra.mxu1 %v10791_v54  ;;  %v10875_v19 = vld [vmem:[%s12806_s15 + $0x5a8] ss:$16 sps:$4 sm:$0xff]   ;;  %v10880_v54 = vld [vmem:[%s12806_s15 + $0x5c4] ss:$16 sps:$4 sm:$0xff]  }
 0x114   : > { %6415 = vmatprep.subr.bf16.mxu0 %v10796_v20  ;;  %7030 = vmatprep.subr.bf16.mxu1 %v10799_v21  ;;  %v10883_v20 = vld [vmem:[%s12806_s15 + $0x5cc] ss:$16 sps:$4 sm:$0xff]   ;;  %v10878_v21 = vld [vmem:[%s12806_s15 + $0x5c0] ss:$16 sps:$4 sm:$0xff]  }
 0x116   : > { %6407 = vmatmul.mubr.bf16.vlgmr.msra.gmra.mrb[0].mxu0 %v1354_v24  ;;  %7022 = vmatmul.mubr.bf16.vlgmr.msra.gmra.mrb[0].mxu1 %v1354_v24  ;;  %v10889_v24 = vld [vmem:[%s12806_s15 + $0x5ec] ss:$16 sps:$4 sm:$0xff]  }
 0x117   : > { %6416 = vmatpush1.bf16.msra.mxu0 %v10794_v23  ;;  %7031 = vmatpush1.bf16.msra.mxu1 %v10797_v25  ;;  %v10886_v23 = vld [vmem:[%s12806_s15 + $0x5e4] ss:$16 sps:$4 sm:$0xff]   ;;  %v10884_v25 = vld [vmem:[%s12806_s15 + $0x5e0] ss:$16 sps:$4 sm:$0xff]  }
 0x118   : > { %6417 = vmatprep.subr.bf16.mxu0 %v10802_v26  ;;  %7032 = vmatprep.subr.bf16.mxu1 %v10805_v27  ;;  %v10887_v26 = vld [vmem:[%s12806_s15 + $0x5e8] ss:$16 sps:$4 sm:$0xff]   ;;  %v10893_v27 = vld [vmem:[%s12806_s15 + $0x604] ss:$16 sps:$4 sm:$0xff]  }
 0x119   : > { %6447 = vmatprep.mubr.bf16.mxu0 %v12999_v28  ;;  %7062 = vmatprep.mubr.bf16.mxu1 %v12999_v28 }
 0x11b   : > { %6418 = vmatpush1.bf16.msra.mxu0 %v10800_v29  ;;  %7033 = vmatpush1.bf16.msra.mxu1 %v10803_v15  ;;  %v10896_v29 = vld [vmem:[%s12806_s15 + $0x60c] ss:$16 sps:$4 sm:$0xff]   ;;  %v10891_v15 = vld [vmem:[%s12806_s15 + $0x600] ss:$16 sps:$4 sm:$0xff]  }
 0x11c   : > { %6419 = vmatprep.subr.bf16.mxu0 %v10808_v30  ;;  %7034 = vmatprep.subr.bf16.mxu1 %v10811_v31  ;;  %v13066_v30 = vrot.slane %v12984_v18, %v12886_v51  ;;  %v10894_v31 = vld [vmem:[%s12806_s15 + $0x608] ss:$16 sps:$4 sm:$0xff]   ;;  %v10897_v18 = vld [vmem:[%s12806_s15 + $0x620] ss:$16 sps:$4 sm:$0xff]  }
 0x11f   : > { %6420 = vmatpush1.bf16.msra.mxu0 %v10806_v32  ;;  %7035 = vmatpush1.bf16.msra.mxu1 %v10809_v33  ;;  %v10899_v32 = vld [vmem:[%s12806_s15 + $0x624] ss:$16 sps:$4 sm:$0xff]   ;;  %v10902_v33 = vld [vmem:[%s12806_s15 + $0x62c] ss:$16 sps:$4 sm:$0xff]  }
 0x120   : > { %6421 = vmatprep.subr.bf16.mxu0 %v10814_v34  ;;  %7036 = vmatprep.subr.bf16.mxu1 %v10817_v35  ;;  %v1357_v34 = vcombine.high %v12999_v28, %v12999_v28  ;;  %v10900_v35 = vld [vmem:[%s12806_s15 + $0x628] ss:$16 sps:$4 sm:$0xff]   ;;  %v10903_v28 = vld [vmem:[%s12806_s15 + $0x640] ss:$16 sps:$4 sm:$0xff]  }
 0x123   : > { %6422 = vmatpush1.bf16.msra.mxu0 %v10812_v36  ;;  %7037 = vmatpush1.bf16.msra.mxu1 %v10815_v37  ;;  %v10905_v36 = vld [vmem:[%s12806_s15 + $0x644] ss:$16 sps:$4 sm:$0xff]   ;;  %v10908_v37 = vld [vmem:[%s12806_s15 + $0x64c] ss:$16 sps:$4 sm:$0xff]  }
 0x124   : > { %6423 = vmatprep.subr.bf16.mxu0 %v10820_v38  ;;  %7038 = vmatprep.subr.bf16.mxu1 %v10823_v39  ;;  %v10906_v38 = vld [vmem:[%s12806_s15 + $0x648] ss:$16 sps:$4 sm:$0xff]   ;;  %v10911_v39 = vld [vmem:[%s12806_s15 + $0x664] ss:$16 sps:$4 sm:$0xff]  }
 0x127   : > { %6424 = vmatpush1.bf16.msra.mxu0 %v10818_v41  ;;  %7039 = vmatpush1.bf16.msra.mxu1 %v10821_v42  ;;  %v10914_v41 = vld [vmem:[%s12806_s15 + $0x66c] ss:$16 sps:$4 sm:$0xff]   ;;  %v10909_v42 = vld [vmem:[%s12806_s15 + $0x660] ss:$16 sps:$4 sm:$0xff]  }
 0x128   : > { %6425 = vmatprep.subr.bf16.mxu0 %v10826_v43  ;;  %7040 = vmatprep.subr.bf16.mxu1 %v10829_v44  ;;  %v10912_v43 = vld [vmem:[%s12806_s15 + $0x668] ss:$16 sps:$4 sm:$0xff]   ;;  %v10917_v44 = vld [vmem:[%s12806_s15 + $0x684] ss:$16 sps:$4 sm:$0xff]  }
 0x12b   : > { %6426 = vmatpush1.bf16.msra.mxu0 %v10824_v46  ;;  %7041 = vmatpush1.bf16.msra.mxu1 %v10827_v47  ;;  %v10920_v46 = vld [vmem:[%s12806_s15 + $0x68c] ss:$16 sps:$4 sm:$0xff]   ;;  %v10915_v47 = vld [vmem:[%s12806_s15 + $0x680] ss:$16 sps:$4 sm:$0xff]  }
 0x12c   : > { %6427 = vmatprep.subr.bf16.mxu0 %v10832_v48  ;;  %7042 = vmatprep.subr.bf16.mxu1 %v10835_v49  ;;  %v10918_v48 = vld [vmem:[%s12806_s15 + $0x688] ss:$16 sps:$4 sm:$0xff]   ;;  %v10923_v49 = vld [vmem:[%s12806_s15 + $0x6a4] ss:$16 sps:$4 sm:$0xff]  }
 0x12f   : > { %6428 = vmatpush1.bf16.msra.mxu0 %v10830_v50  ;;  %7043 = vmatpush1.bf16.msra.mxu1 %v10833_v52  ;;  %v10926_v50 = vld [vmem:[%s12806_s15 + $0x6ac] ss:$16 sps:$4 sm:$0xff]   ;;  %v10921_v52 = vld [vmem:[%s12806_s15 + $0x6a0] ss:$16 sps:$4 sm:$0xff]  }
 0x130   : > { %6429 = vmatprep.subr.bf16.mxu0 %v10838_v53  ;;  %7044 = vmatprep.subr.bf16.mxu1 %v10841_v55  ;;  %v10924_v53 = vld [vmem:[%s12806_s15 + $0x6a8] ss:$16 sps:$4 sm:$0xff]   ;;  %v10929_v55 = vld [vmem:[%s12806_s15 + $0x6c4] ss:$16 sps:$4 sm:$0xff]  }
 0x133   : > { %6430 = vmatpush1.bf16.msra.mxu0 %v10836_v56  ;;  %7045 = vmatpush1.bf16.msra.mxu1 %v10839_v57  ;;  %v10932_v56 = vld [vmem:[%s12806_s15 + $0x6cc] ss:$16 sps:$4 sm:$0xff]   ;;  %v10927_v57 = vld [vmem:[%s12806_s15 + $0x6c0] ss:$16 sps:$4 sm:$0xff]  }
 0x134   : > { %6431 = vmatprep.subr.bf16.mxu0 %v10844_v58  ;;  %7046 = vmatprep.subr.bf16.mxu1 %v10847_v59  ;;  %v10930_v58 = vld [vmem:[%s12806_s15 + $0x6c8] ss:$16 sps:$4 sm:$0xff]   ;;  %v10935_v59 = vld [vmem:[%s12806_s15 + $0x6e4] ss:$16 sps:$4 sm:$0xff]  }
 0x137   : > { %6432 = vmatpush1.bf16.msra.mxu0 %v10842_v60  ;;  %7047 = vmatpush1.bf16.msra.mxu1 %v10845_v61  ;;  %v10938_v60 = vld [vmem:[%s12806_s15 + $0x6ec] ss:$16 sps:$4 sm:$0xff]   ;;  %v10933_v61 = vld [vmem:[%s12806_s15 + $0x6e0] ss:$16 sps:$4 sm:$0xff]  }
 0x138   : > { %6433 = vmatprep.subr.bf16.mxu0 %v10850_v62  ;;  %7048 = vmatprep.subr.bf16.mxu1 %v10853_v63  ;;  %v10936_v62 = vld [vmem:[%s12806_s15 + $0x6e8] ss:$16 sps:$4 sm:$0xff]   ;;  %v10941_v63 = vld [vmem:[%s12806_s15 + $0x704] ss:$16 sps:$4 sm:$0xff]  }
 0x13b   : > { %6434 = vmatpush1.bf16.msra.mxu0 %v10848_v0  ;;  %7049 = vmatpush1.bf16.msra.mxu1 %v10851_v1  ;;  %v10944_v0 = vld [vmem:[%s12806_s15 + $0x70c] ss:$16 sps:$4 sm:$0xff]   ;;  %v10939_v1 = vld [vmem:[%s12806_s15 + $0x700] ss:$16 sps:$4 sm:$0xff]  }
 0x13c   : > { %6435 = vmatprep.subr.bf16.mxu0 %v10856_v2  ;;  %7050 = vmatprep.subr.bf16.mxu1 %v10859_v3  ;;  %v10942_v2 = vld [vmem:[%s12806_s15 + $0x708] ss:$16 sps:$4 sm:$0xff]   ;;  %v10947_v3 = vld [vmem:[%s12806_s15 + $0x724] ss:$16 sps:$4 sm:$0xff]  }
 0x13f   : > { %6436 = vmatpush1.bf16.msra.mxu0 %v10854_v4  ;;  %7051 = vmatpush1.bf16.msra.mxu1 %v10857_v5  ;;  %v10950_v4 = vld [vmem:[%s12806_s15 + $0x72c] ss:$16 sps:$4 sm:$0xff]   ;;  %v10945_v5 = vld [vmem:[%s12806_s15 + $0x720] ss:$16 sps:$4 sm:$0xff]  }
 0x140   : > { %6437 = vmatprep.subr.bf16.mxu0 %v10862_v6  ;;  %7052 = vmatprep.subr.bf16.mxu1 %v10865_v7  ;;  %v10948_v6 = vld [vmem:[%s12806_s15 + $0x728] ss:$16 sps:$4 sm:$0xff]   ;;  %v10953_v7 = vld [vmem:[%s12806_s15 + $0x744] ss:$16 sps:$4 sm:$0xff]  }
 0x143   : > { %6438 = vmatpush1.bf16.msra.mxu0 %v10860_v8  ;;  %7053 = vmatpush1.bf16.msra.mxu1 %v10863_v9  ;;  %v10956_v8 = vld [vmem:[%s12806_s15 + $0x74c] ss:$16 sps:$4 sm:$0xff]   ;;  %v10951_v9 = vld [vmem:[%s12806_s15 + $0x740] ss:$16 sps:$4 sm:$0xff]  }
 0x144   : > { %6439 = vmatprep.subr.bf16.mxu0 %v10868_v10  ;;  %7054 = vmatprep.subr.bf16.mxu1 %v10871_v11  ;;  %v10954_v10 = vld [vmem:[%s12806_s15 + $0x748] ss:$16 sps:$4 sm:$0xff]   ;;  %v10959_v11 = vld [vmem:[%s12806_s15 + $0x764] ss:$16 sps:$4 sm:$0xff]  }
 0x147   : > { %6440 = vmatpush1.bf16.msra.mxu0 %v10866_v12  ;;  %7055 = vmatpush1.bf16.msra.mxu1 %v10869_v13  ;;  %v10962_v12 = vld [vmem:[%s12806_s15 + $0x76c] ss:$16 sps:$4 sm:$0xff]   ;;  %v10957_v13 = vld [vmem:[%s12806_s15 + $0x760] ss:$16 sps:$4 sm:$0xff]  }
 0x148   : > { %6441 = vmatprep.subr.bf16.mxu0 %v10874_v14  ;;  %7056 = vmatprep.subr.bf16.mxu1 %v10877_v16  ;;  %v10960_v14 = vld [vmem:[%s12806_s15 + $0x768] ss:$16 sps:$4 sm:$0xff]   ;;  %v10965_v16 = vld [vmem:[%s12806_s15 + $0x784] ss:$16 sps:$4 sm:$0xff]  }
 0x14b   : > { %6442 = vmatpush1.bf16.msra.mxu0 %v10872_v17  ;;  %7057 = vmatpush1.bf16.msra.mxu1 %v10875_v19  ;;  %v10968_v17 = vld [vmem:[%s12806_s15 + $0x78c] ss:$16 sps:$4 sm:$0xff]   ;;  %v10963_v19 = vld [vmem:[%s12806_s15 + $0x780] ss:$16 sps:$4 sm:$0xff]  }
 0x14c   : > { %6443 = vmatprep.subr.bf16.mxu0 %v10880_v54  ;;  %7058 = vmatprep.subr.bf16.mxu1 %v10883_v20  ;;  %v10966_v54 = vld [vmem:[%s12806_s15 + $0x788] ss:$16 sps:$4 sm:$0xff]   ;;  %v10971_v20 = vld [vmem:[%s12806_s15 + $0x7a4] ss:$16 sps:$4 sm:$0xff]  }
 0x14f   : > { %6444 = vmatpush1.bf16.msra.mxu0 %v10878_v21  ;;  %7059 = vmatpush1.bf16.msra.mxu1 %v10881_v22  ;;  %v10974_v21 = vld [vmem:[%s12806_s15 + $0x7ac] ss:$16 sps:$4 sm:$0xff]   ;;  %v10969_v22 = vld [vmem:[%s12806_s15 + $0x7a0] ss:$16 sps:$4 sm:$0xff]  }
 0x150   : > { %6445 = vmatprep.subr.bf16.mxu0 %v10886_v23  ;;  %7060 = vmatprep.subr.bf16.mxu1 %v10889_v24  ;;  %v10972_v23 = vld [vmem:[%s12806_s15 + $0x7a8] ss:$16 sps:$4 sm:$0xff]   ;;  %v10977_v24 = vld [vmem:[%s12806_s15 + $0x7c4] ss:$16 sps:$4 sm:$0xff]  }
 0x153   : > { %6446 = vmatpush1.bf16.msra.mxu0 %v10884_v25  ;;  %7061 = vmatpush1.bf16.msra.mxu1 %v10887_v26  ;;  %v10980_v25 = vld [vmem:[%s12806_s15 + $0x7cc] ss:$16 sps:$4 sm:$0xff]   ;;  %v13128_v26 = vld.sshfl [vmem:[%s12828_s8 + $0x8] sm:$0xff pattern:$0x75316420] }
 0x154   : > { %6456 = vmatprep.subr.bf16.mxu0 %v10893_v27  ;;  %7071 = vmatprep.subr.bf16.mxu1 %v10896_v29  ;;  %v10975_v27 = vld [vmem:[%s12806_s15 + $0x7c0] ss:$16 sps:$4 sm:$0xff]   ;;  %v10978_v29 = vld [vmem:[%s12806_s15 + $0x7c8] ss:$16 sps:$4 sm:$0xff]  }
 0x156   : > { %6448 = vmatmul.mubr.bf16.vlgmr.msra.gmra.mrb[0].mxu0 %v13066_v30  ;;  %7063 = vmatmul.mubr.bf16.vlgmr.msra.gmra.mrb[0].mxu1 %v13066_v30 }
 0x157   : > { %6457 = vmatpush1.bf16.msra.mxu0 %v10891_v15  ;;  %7072 = vmatpush1.bf16.msra.mxu1 %v10894_v31  ;;  %v10983_v15 = vld [vmem:[%s12806_s15 + $0x7e4] ss:$16 sps:$4 sm:$0xff]   ;;  %v10986_v31 = vld [vmem:[%s12806_s15 + $0x7ec] ss:$16 sps:$4 sm:$0xff]  }
 0x158   : > { %6458 = vmatprep.subr.bf16.mxu0 %v10899_v32  ;;  %7073 = vmatprep.subr.bf16.mxu1 %v10902_v33  ;;  %v10981_v32 = vld [vmem:[%s12806_s15 + $0x7e0] ss:$16 sps:$4 sm:$0xff]   ;;  %v10984_v33 = vld [vmem:[%s12806_s15 + $0x7e8] ss:$16 sps:$4 sm:$0xff]  }
 0x159   : > { %6488 = vmatprep.mubr.bf16.mxu0 %v1357_v34  ;;  %7103 = vmatprep.mubr.bf16.mxu1 %v1357_v34  ;;  %v10989_v34 = vld [vmem:[%s12806_s15 + $0x804] ss:$16 sps:$4 sm:$0xff]  }
 0x15b   : > { %6459 = vmatpush1.bf16.msra.mxu0 %v10897_v18  ;;  %7074 = vmatpush1.bf16.msra.mxu1 %v10900_v35  ;;  %v10992_v18 = vld [vmem:[%s12806_s15 + $0x80c] ss:$16 sps:$4 sm:$0xff]   ;;  %v1373_v35 = vcombine.high %v13128_v26, %v13128_v26 }
 0x15c   : > { %6460 = vmatprep.subr.bf16.mxu0 %v10905_v36  ;;  %7075 = vmatprep.subr.bf16.mxu1 %v10908_v37  ;;  %v1355_v36 = vcombine.high %v13066_v30, %v13066_v30  ;;  %v10987_v37 = vld [vmem:[%s12806_s15 + $0x800] ss:$16 sps:$4 sm:$0xff]  }
 0x15d   : > { %v10993_v30 = vld [vmem:[%s12806_s15 + $0x820] ss:$16 sps:$4 sm:$0xff]  }
 0x15f   : > { %6461 = vmatpush1.bf16.msra.mxu0 %v10903_v28  ;;  %7076 = vmatpush1.bf16.msra.mxu1 %v10906_v38  ;;  %v10990_v28 = vld [vmem:[%s12806_s15 + $0x808] ss:$16 sps:$4 sm:$0xff]   ;;  %v10995_v38 = vld [vmem:[%s12806_s15 + $0x824] ss:$16 sps:$4 sm:$0xff]  }
 0x160   : > { %6462 = vmatprep.subr.bf16.mxu0 %v10911_v39  ;;  %7077 = vmatprep.subr.bf16.mxu1 %v10914_v41  ;;  %v10998_v39 = vld [vmem:[%s12806_s15 + $0x82c] ss:$16 sps:$4 sm:$0xff]   ;;  %v13147_v41 = vrot.slane %v1373_v35, %v12886_v51  ;;  %v11074_v35 = vld [vmem:[%s12806_s15 + $0x9c8] ss:$16 sps:$4 sm:$0xff]  }
 0x163   : > { %6463 = vmatpush1.bf16.msra.mxu0 %v10909_v42  ;;  %7078 = vmatpush1.bf16.msra.mxu1 %v10912_v43  ;;  %v10996_v42 = vld [vmem:[%s12806_s15 + $0x828] ss:$16 sps:$4 sm:$0xff]   ;;  %v11001_v43 = vld [vmem:[%s12806_s15 + $0x844] ss:$16 sps:$4 sm:$0xff]  }
 0x164   : > { %6464 = vmatprep.subr.bf16.mxu0 %v10917_v44  ;;  %7079 = vmatprep.subr.bf16.mxu1 %v10920_v46  ;;  %v11004_v44 = vld [vmem:[%s12806_s15 + $0x84c] ss:$16 sps:$4 sm:$0xff]   ;;  %v10999_v46 = vld [vmem:[%s12806_s15 + $0x840] ss:$16 sps:$4 sm:$0xff]  }
 0x167   : > { %6465 = vmatpush1.bf16.msra.mxu0 %v10915_v47  ;;  %7080 = vmatpush1.bf16.msra.mxu1 %v10918_v48  ;;  %v11002_v47 = vld [vmem:[%s12806_s15 + $0x848] ss:$16 sps:$4 sm:$0xff]   ;;  %v11007_v48 = vld [vmem:[%s12806_s15 + $0x864] ss:$16 sps:$4 sm:$0xff]  }
 0x168   : > { %6466 = vmatprep.subr.bf16.mxu0 %v10923_v49  ;;  %7081 = vmatprep.subr.bf16.mxu1 %v10926_v50  ;;  %v11010_v49 = vld [vmem:[%s12806_s15 + $0x86c] ss:$16 sps:$4 sm:$0xff]   ;;  %v11005_v50 = vld [vmem:[%s12806_s15 + $0x860] ss:$16 sps:$4 sm:$0xff]  }
 0x16b   : > { %6467 = vmatpush1.bf16.msra.mxu0 %v10921_v52  ;;  %7082 = vmatpush1.bf16.msra.mxu1 %v10924_v53  ;;  %v11008_v52 = vld [vmem:[%s12806_s15 + $0x868] ss:$16 sps:$4 sm:$0xff]   ;;  %v11013_v53 = vld [vmem:[%s12806_s15 + $0x884] ss:$16 sps:$4 sm:$0xff]  }
 0x16c   : > { %6468 = vmatprep.subr.bf16.mxu0 %v10929_v55  ;;  %7083 = vmatprep.subr.bf16.mxu1 %v10932_v56  ;;  %v11016_v55 = vld [vmem:[%s12806_s15 + $0x88c] ss:$16 sps:$4 sm:$0xff]   ;;  %v11011_v56 = vld [vmem:[%s12806_s15 + $0x880] ss:$16 sps:$4 sm:$0xff]  }
 0x16f   : > { %6469 = vmatpush1.bf16.msra.mxu0 %v10927_v57  ;;  %7084 = vmatpush1.bf16.msra.mxu1 %v10930_v58  ;;  %v11014_v57 = vld [vmem:[%s12806_s15 + $0x888] ss:$16 sps:$4 sm:$0xff]   ;;  %v11019_v58 = vld [vmem:[%s12806_s15 + $0x8a4] ss:$16 sps:$4 sm:$0xff]  }
 0x170   : > { %6470 = vmatprep.subr.bf16.mxu0 %v10935_v59  ;;  %7085 = vmatprep.subr.bf16.mxu1 %v10938_v60  ;;  %v11022_v59 = vld [vmem:[%s12806_s15 + $0x8ac] ss:$16 sps:$4 sm:$0xff]   ;;  %v11017_v60 = vld [vmem:[%s12806_s15 + $0x8a0] ss:$16 sps:$4 sm:$0xff]  }
 0x173   : > { %6471 = vmatpush1.bf16.msra.mxu0 %v10933_v61  ;;  %7086 = vmatpush1.bf16.msra.mxu1 %v10936_v62  ;;  %v11020_v61 = vld [vmem:[%s12806_s15 + $0x8a8] ss:$16 sps:$4 sm:$0xff]   ;;  %v11025_v62 = vld [vmem:[%s12806_s15 + $0x8c4] ss:$16 sps:$4 sm:$0xff]  }
 0x174   : > { %6472 = vmatprep.subr.bf16.mxu0 %v10941_v63  ;;  %7087 = vmatprep.subr.bf16.mxu1 %v10944_v0  ;;  %v11028_v63 = vld [vmem:[%s12806_s15 + $0x8cc] ss:$16 sps:$4 sm:$0xff]   ;;  %v11023_v0 = vld [vmem:[%s12806_s15 + $0x8c0] ss:$16 sps:$4 sm:$0xff]  }
 0x177   : > { %6473 = vmatpush1.bf16.msra.mxu0 %v10939_v1  ;;  %7088 = vmatpush1.bf16.msra.mxu1 %v10942_v2  ;;  %v11026_v1 = vld [vmem:[%s12806_s15 + $0x8c8] ss:$16 sps:$4 sm:$0xff]   ;;  %v11031_v2 = vld [vmem:[%s12806_s15 + $0x8e4] ss:$16 sps:$4 sm:$0xff]  }
 0x178   : > { %6474 = vmatprep.subr.bf16.mxu0 %v10947_v3  ;;  %7089 = vmatprep.subr.bf16.mxu1 %v10950_v4  ;;  %v11034_v3 = vld [vmem:[%s12806_s15 + $0x8ec] ss:$16 sps:$4 sm:$0xff]   ;;  %v11029_v4 = vld [vmem:[%s12806_s15 + $0x8e0] ss:$16 sps:$4 sm:$0xff]  }
 0x17b   : > { %6475 = vmatpush1.bf16.msra.mxu0 %v10945_v5  ;;  %7090 = vmatpush1.bf16.msra.mxu1 %v10948_v6  ;;  %v11032_v5 = vld [vmem:[%s12806_s15 + $0x8e8] ss:$16 sps:$4 sm:$0xff]   ;;  %v11037_v6 = vld [vmem:[%s12806_s15 + $0x904] ss:$16 sps:$4 sm:$0xff]  }
 0x17c   : > { %6476 = vmatprep.subr.bf16.mxu0 %v10953_v7  ;;  %7091 = vmatprep.subr.bf16.mxu1 %v10956_v8  ;;  %v11040_v7 = vld [vmem:[%s12806_s15 + $0x90c] ss:$16 sps:$4 sm:$0xff]   ;;  %v11035_v8 = vld [vmem:[%s12806_s15 + $0x900] ss:$16 sps:$4 sm:$0xff]  }
 0x17f   : > { %6477 = vmatpush1.bf16.msra.mxu0 %v10951_v9  ;;  %7092 = vmatpush1.bf16.msra.mxu1 %v10954_v10  ;;  %v11038_v9 = vld [vmem:[%s12806_s15 + $0x908] ss:$16 sps:$4 sm:$0xff]   ;;  %v11043_v10 = vld [vmem:[%s12806_s15 + $0x924] ss:$16 sps:$4 sm:$0xff]  }
 0x180   : > { %6478 = vmatprep.subr.bf16.mxu0 %v10959_v11  ;;  %7093 = vmatprep.subr.bf16.mxu1 %v10962_v12  ;;  %v11046_v11 = vld [vmem:[%s12806_s15 + $0x92c] ss:$16 sps:$4 sm:$0xff]   ;;  %v11041_v12 = vld [vmem:[%s12806_s15 + $0x920] ss:$16 sps:$4 sm:$0xff]  }
 0x183   : > { %6479 = vmatpush1.bf16.msra.mxu0 %v10957_v13  ;;  %7094 = vmatpush1.bf16.msra.mxu1 %v10960_v14  ;;  %v11044_v13 = vld [vmem:[%s12806_s15 + $0x928] ss:$16 sps:$4 sm:$0xff]   ;;  %v11049_v14 = vld [vmem:[%s12806_s15 + $0x944] ss:$16 sps:$4 sm:$0xff]  }
 0x184   : > { %6480 = vmatprep.subr.bf16.mxu0 %v10965_v16  ;;  %7095 = vmatprep.subr.bf16.mxu1 %v10968_v17  ;;  %v11052_v16 = vld [vmem:[%s12806_s15 + $0x94c] ss:$16 sps:$4 sm:$0xff]   ;;  %v11047_v17 = vld [vmem:[%s12806_s15 + $0x940] ss:$16 sps:$4 sm:$0xff]  }
 0x187   : > { %6481 = vmatpush1.bf16.msra.mxu0 %v10963_v19  ;;  %7096 = vmatpush1.bf16.msra.mxu1 %v10966_v54  ;;  %v11050_v19 = vld [vmem:[%s12806_s15 + $0x948] ss:$16 sps:$4 sm:$0xff]   ;;  %v11055_v54 = vld [vmem:[%s12806_s15 + $0x964] ss:$16 sps:$4 sm:$0xff]  }
 0x188   : > { %6482 = vmatprep.subr.bf16.mxu0 %v10971_v20  ;;  %7097 = vmatprep.subr.bf16.mxu1 %v10974_v21  ;;  %v11058_v20 = vld [vmem:[%s12806_s15 + $0x96c] ss:$16 sps:$4 sm:$0xff]   ;;  %v11053_v21 = vld [vmem:[%s12806_s15 + $0x960] ss:$16 sps:$4 sm:$0xff]  }
 0x18b   : > { %6483 = vmatpush1.bf16.msra.mxu0 %v10969_v22  ;;  %7098 = vmatpush1.bf16.msra.mxu1 %v10972_v23  ;;  %v11056_v22 = vld [vmem:[%s12806_s15 + $0x968] ss:$16 sps:$4 sm:$0xff]   ;;  %v11061_v23 = vld [vmem:[%s12806_s15 + $0x984] ss:$16 sps:$4 sm:$0xff]  }
 0x18c   : > { %6484 = vmatprep.subr.bf16.mxu0 %v10977_v24  ;;  %7099 = vmatprep.subr.bf16.mxu1 %v10980_v25  ;;  %v11064_v24 = vld [vmem:[%s12806_s15 + $0x98c] ss:$16 sps:$4 sm:$0xff]   ;;  %v11059_v25 = vld [vmem:[%s12806_s15 + $0x980] ss:$16 sps:$4 sm:$0xff]  }
 0x18f   : > { %6485 = vmatpush1.bf16.msra.mxu0 %v10975_v27  ;;  %7100 = vmatpush1.bf16.msra.mxu1 %v10978_v29  ;;  %v11062_v27 = vld [vmem:[%s12806_s15 + $0x988] ss:$16 sps:$4 sm:$0xff]   ;;  %v11067_v29 = vld [vmem:[%s12806_s15 + $0x9a4] ss:$16 sps:$4 sm:$0xff]  }
 0x190   : > { %6486 = vmatprep.subr.bf16.mxu0 %v10983_v15  ;;  %7101 = vmatprep.subr.bf16.mxu1 %v10986_v31  ;;  %v11070_v15 = vld [vmem:[%s12806_s15 + $0x9ac] ss:$16 sps:$4 sm:$0xff]   ;;  %v11065_v31 = vld [vmem:[%s12806_s15 + $0x9a0] ss:$16 sps:$4 sm:$0xff]  }
 0x193   : > { %6487 = vmatpush1.bf16.msra.mxu0 %v10981_v32  ;;  %7102 = vmatpush1.bf16.msra.mxu1 %v10984_v33  ;;  %v11068_v32 = vld [vmem:[%s12806_s15 + $0x9a8] ss:$16 sps:$4 sm:$0xff]   ;;  %v11073_v33 = vld [vmem:[%s12806_s15 + $0x9c4] ss:$16 sps:$4 sm:$0xff]  }
 0x194   : > { %6497 = vmatprep.subr.bf16.mxu0 %v10989_v34  ;;  %7112 = vmatprep.subr.bf16.mxu1 %v10992_v18  ;;  %v11076_v34 = vld [vmem:[%s12806_s15 + $0x9cc] ss:$16 sps:$4 sm:$0xff]   ;;  %v11071_v18 = vld [vmem:[%s12806_s15 + $0x9c0] ss:$16 sps:$4 sm:$0xff]  }
 0x196   : > { %6489 = vmatmul.mubr.bf16.vlgmr.msra.gmra.mrb[0].mxu0 %v1355_v36  ;;  %7104 = vmatmul.mubr.bf16.vlgmr.msra.gmra.mrb[0].mxu1 %v1355_v36  ;;  %v11079_v36 = vld [vmem:[%s12806_s15 + $0x9e4] ss:$16 sps:$4 sm:$0xff]  }
 0x197   : > { %6498 = vmatpush1.bf16.msra.mxu0 %v10987_v37  ;;  %7113 = vmatpush1.bf16.msra.mxu1 %v10990_v28  ;;  %v11082_v37 = vld [vmem:[%s12806_s15 + $0x9ec] ss:$16 sps:$4 sm:$0xff]   ;;  %v11077_v28 = vld [vmem:[%s12806_s15 + $0x9e0] ss:$16 sps:$4 sm:$0xff]  }
 0x198   : > { %6499 = vmatprep.subr.bf16.mxu0 %v10995_v38  ;;  %7114 = vmatprep.subr.bf16.mxu1 %v10998_v39  ;;  %v11080_v38 = vld [vmem:[%s12806_s15 + $0x9e8] ss:$16 sps:$4 sm:$0xff]   ;;  %v11085_v39 = vld [vmem:[%s12806_s15 + $0xa04] ss:$16 sps:$4 sm:$0xff]  }
 0x199   : > { %6529 = vmatprep.mubr.bf16.mxu0 %v13147_v41  ;;  %7144 = vmatprep.mubr.bf16.mxu1 %v13147_v41 }
 0x19b   : > { %6500 = vmatpush1.bf16.msra.mxu0 %v10993_v30  ;;  %7115 = vmatpush1.bf16.msra.mxu1 %v10996_v42  ;;  %v11088_v30 = vld [vmem:[%s12806_s15 + $0xa0c] ss:$16 sps:$4 sm:$0xff]   ;;  %v13213_v42 = vrot.slane %v13128_v26, %v12886_v51  ;;  %v11089_v26 = vld [vmem:[%s12806_s15 + $0xa20] ss:$16 sps:$4 sm:$0xff]  }
 0x19c   : > { %6501 = vmatprep.subr.bf16.mxu0 %v11001_v43  ;;  %7116 = vmatprep.subr.bf16.mxu1 %v11004_v44  ;;  %v11083_v43 = vld [vmem:[%s12806_s15 + $0xa00] ss:$16 sps:$4 sm:$0xff]   ;;  %v11086_v44 = vld [vmem:[%s12806_s15 + $0xa08] ss:$16 sps:$4 sm:$0xff]  }
 0x19f   : > { %6502 = vmatpush1.bf16.msra.mxu0 %v10999_v46  ;;  %7117 = vmatpush1.bf16.msra.mxu1 %v11002_v47  ;;  %v11091_v46 = vld [vmem:[%s12806_s15 + $0xa24] ss:$16 sps:$4 sm:$0xff]   ;;  %v11094_v47 = vld [vmem:[%s12806_s15 + $0xa2c] ss:$16 sps:$4 sm:$0xff]  }
 0x1a0   : > { %6503 = vmatprep.subr.bf16.mxu0 %v11007_v48  ;;  %7118 = vmatprep.subr.bf16.mxu1 %v11010_v49  ;;  %v1405_v48 = vcombine.high %v13147_v41, %v13147_v41  ;;  %v11092_v49 = vld [vmem:[%s12806_s15 + $0xa28] ss:$16 sps:$4 sm:$0xff]   ;;  %v11095_v41 = vld [vmem:[%s12806_s15 + $0xa40] ss:$16 sps:$4 sm:$0xff]  }
 0x1a3   : > { %6504 = vmatpush1.bf16.msra.mxu0 %v11005_v50  ;;  %7119 = vmatpush1.bf16.msra.mxu1 %v11008_v52  ;;  %v11097_v50 = vld [vmem:[%s12806_s15 + $0xa44] ss:$16 sps:$4 sm:$0xff]   ;;  %v11100_v52 = vld [vmem:[%s12806_s15 + $0xa4c] ss:$16 sps:$4 sm:$0xff]  }
 0x1a4   : > { %6505 = vmatprep.subr.bf16.mxu0 %v11013_v53  ;;  %7120 = vmatprep.subr.bf16.mxu1 %v11016_v55  ;;  %v11098_v53 = vld [vmem:[%s12806_s15 + $0xa48] ss:$16 sps:$4 sm:$0xff]   ;;  %v11103_v55 = vld [vmem:[%s12806_s15 + $0xa64] ss:$16 sps:$4 sm:$0xff]  }
 0x1a7   : > { %6506 = vmatpush1.bf16.msra.mxu0 %v11011_v56  ;;  %7121 = vmatpush1.bf16.msra.mxu1 %v11014_v57  ;;  %v11106_v56 = vld [vmem:[%s12806_s15 + $0xa6c] ss:$16 sps:$4 sm:$0xff]   ;;  %v11101_v57 = vld [vmem:[%s12806_s15 + $0xa60] ss:$16 sps:$4 sm:$0xff]  }
 0x1a8   : > { %6507 = vmatprep.subr.bf16.mxu0 %v11019_v58  ;;  %7122 = vmatprep.subr.bf16.mxu1 %v11022_v59  ;;  %v11104_v58 = vld [vmem:[%s12806_s15 + $0xa68] ss:$16 sps:$4 sm:$0xff]   ;;  %v11109_v59 = vld [vmem:[%s12806_s15 + $0xa84] ss:$16 sps:$4 sm:$0xff]  }
 0x1ab   : > { %6508 = vmatpush1.bf16.msra.mxu0 %v11017_v60  ;;  %7123 = vmatpush1.bf16.msra.mxu1 %v11020_v61  ;;  %v11112_v60 = vld [vmem:[%s12806_s15 + $0xa8c] ss:$16 sps:$4 sm:$0xff]   ;;  %v11107_v61 = vld [vmem:[%s12806_s15 + $0xa80] ss:$16 sps:$4 sm:$0xff]  }
 0x1ac   : > { %6509 = vmatprep.subr.bf16.mxu0 %v11025_v62  ;;  %7124 = vmatprep.subr.bf16.mxu1 %v11028_v63  ;;  %v11110_v62 = vld [vmem:[%s12806_s15 + $0xa88] ss:$16 sps:$4 sm:$0xff]   ;;  %v11115_v63 = vld [vmem:[%s12806_s15 + $0xaa4] ss:$16 sps:$4 sm:$0xff]  }
 0x1af   : > { %6510 = vmatpush1.bf16.msra.mxu0 %v11023_v0  ;;  %7125 = vmatpush1.bf16.msra.mxu1 %v11026_v1  ;;  %v11118_v0 = vld [vmem:[%s12806_s15 + $0xaac] ss:$16 sps:$4 sm:$0xff]   ;;  %v11113_v1 = vld [vmem:[%s12806_s15 + $0xaa0] ss:$16 sps:$4 sm:$0xff]  }
 0x1b0   : > { %6511 = vmatprep.subr.bf16.mxu0 %v11031_v2  ;;  %7126 = vmatprep.subr.bf16.mxu1 %v11034_v3  ;;  %v11116_v2 = vld [vmem:[%s12806_s15 + $0xaa8] ss:$16 sps:$4 sm:$0xff]   ;;  %v11121_v3 = vld [vmem:[%s12806_s15 + $0xac4] ss:$16 sps:$4 sm:$0xff]  }
 0x1b3   : > { %6512 = vmatpush1.bf16.msra.mxu0 %v11029_v4  ;;  %7127 = vmatpush1.bf16.msra.mxu1 %v11032_v5  ;;  %v11124_v4 = vld [vmem:[%s12806_s15 + $0xacc] ss:$16 sps:$4 sm:$0xff]   ;;  %v11119_v5 = vld [vmem:[%s12806_s15 + $0xac0] ss:$16 sps:$4 sm:$0xff]  }
 0x1b4   : > { %6513 = vmatprep.subr.bf16.mxu0 %v11037_v6  ;;  %7128 = vmatprep.subr.bf16.mxu1 %v11040_v7  ;;  %v11122_v6 = vld [vmem:[%s12806_s15 + $0xac8] ss:$16 sps:$4 sm:$0xff]   ;;  %v11127_v7 = vld [vmem:[%s12806_s15 + $0xae4] ss:$16 sps:$4 sm:$0xff]  }
 0x1b7   : > { %6514 = vmatpush1.bf16.msra.mxu0 %v11035_v8  ;;  %7129 = vmatpush1.bf16.msra.mxu1 %v11038_v9  ;;  %v11130_v8 = vld [vmem:[%s12806_s15 + $0xaec] ss:$16 sps:$4 sm:$0xff]   ;;  %v11125_v9 = vld [vmem:[%s12806_s15 + $0xae0] ss:$16 sps:$4 sm:$0xff]  }
 0x1b8   : > { %6515 = vmatprep.subr.bf16.mxu0 %v11043_v10  ;;  %7130 = vmatprep.subr.bf16.mxu1 %v11046_v11  ;;  %v11128_v10 = vld [vmem:[%s12806_s15 + $0xae8] ss:$16 sps:$4 sm:$0xff]   ;;  %v11133_v11 = vld [vmem:[%s12806_s15 + $0xb04] ss:$16 sps:$4 sm:$0xff]  }
 0x1bb   : > { %6516 = vmatpush1.bf16.msra.mxu0 %v11041_v12  ;;  %7131 = vmatpush1.bf16.msra.mxu1 %v11044_v13  ;;  %v11136_v12 = vld [vmem:[%s12806_s15 + $0xb0c] ss:$16 sps:$4 sm:$0xff]   ;;  %v11131_v13 = vld [vmem:[%s12806_s15 + $0xb00] ss:$16 sps:$4 sm:$0xff]  }
 0x1bc   : > { %6517 = vmatprep.subr.bf16.mxu0 %v11049_v14  ;;  %7132 = vmatprep.subr.bf16.mxu1 %v11052_v16  ;;  %v11134_v14 = vld [vmem:[%s12806_s15 + $0xb08] ss:$16 sps:$4 sm:$0xff]   ;;  %v11139_v16 = vld [vmem:[%s12806_s15 + $0xb24] ss:$16 sps:$4 sm:$0xff]  }
 0x1bf   : > { %6518 = vmatpush1.bf16.msra.mxu0 %v11047_v17  ;;  %7133 = vmatpush1.bf16.msra.mxu1 %v11050_v19  ;;  %v11142_v17 = vld [vmem:[%s12806_s15 + $0xb2c] ss:$16 sps:$4 sm:$0xff]   ;;  %v11137_v19 = vld [vmem:[%s12806_s15 + $0xb20] ss:$16 sps:$4 sm:$0xff]  }
 0x1c0   : > { %6519 = vmatprep.subr.bf16.mxu0 %v11055_v54  ;;  %7134 = vmatprep.subr.bf16.mxu1 %v11058_v20  ;;  %v11140_v54 = vld [vmem:[%s12806_s15 + $0xb28] ss:$16 sps:$4 sm:$0xff]   ;;  %v11145_v20 = vld [vmem:[%s12806_s15 + $0xb44] ss:$16 sps:$4 sm:$0xff]  }
 0x1c3   : > { %6520 = vmatpush1.bf16.msra.mxu0 %v11053_v21  ;;  %7135 = vmatpush1.bf16.msra.mxu1 %v11056_v22  ;;  %v11148_v21 = vld [vmem:[%s12806_s15 + $0xb4c] ss:$16 sps:$4 sm:$0xff]   ;;  %v11143_v22 = vld [vmem:[%s12806_s15 + $0xb40] ss:$16 sps:$4 sm:$0xff]  }
 0x1c4   : > { %6521 = vmatprep.subr.bf16.mxu0 %v11061_v23  ;;  %7136 = vmatprep.subr.bf16.mxu1 %v11064_v24  ;;  %v11146_v23 = vld [vmem:[%s12806_s15 + $0xb48] ss:$16 sps:$4 sm:$0xff]   ;;  %v11151_v24 = vld [vmem:[%s12806_s15 + $0xb64] ss:$16 sps:$4 sm:$0xff]  }
 0x1c7   : > { %6522 = vmatpush1.bf16.msra.mxu0 %v11059_v25  ;;  %7137 = vmatpush1.bf16.msra.mxu1 %v11062_v27  ;;  %v11154_v25 = vld [vmem:[%s12806_s15 + $0xb6c] ss:$16 sps:$4 sm:$0xff]   ;;  %v11149_v27 = vld [vmem:[%s12806_s15 + $0xb60] ss:$16 sps:$4 sm:$0xff]  }
 0x1c8   : > { %6523 = vmatprep.subr.bf16.mxu0 %v11067_v29  ;;  %7138 = vmatprep.subr.bf16.mxu1 %v11070_v15  ;;  %v11152_v29 = vld [vmem:[%s12806_s15 + $0xb68] ss:$16 sps:$4 sm:$0xff]   ;;  %v11157_v15 = vld [vmem:[%s12806_s15 + $0xb84] ss:$16 sps:$4 sm:$0xff]  }
 0x1cb   : > { %6524 = vmatpush1.bf16.msra.mxu0 %v11065_v31  ;;  %7139 = vmatpush1.bf16.msra.mxu1 %v11068_v32  ;;  %v11160_v31 = vld [vmem:[%s12806_s15 + $0xb8c] ss:$16 sps:$4 sm:$0xff]   ;;  %v11155_v32 = vld [vmem:[%s12806_s15 + $0xb80] ss:$16 sps:$4 sm:$0xff]  }
 0x1cc   : > { %6525 = vmatprep.subr.bf16.mxu0 %v11073_v33  ;;  %7140 = vmatprep.subr.bf16.mxu1 %v11076_v34  ;;  %v11158_v33 = vld [vmem:[%s12806_s15 + $0xb88] ss:$16 sps:$4 sm:$0xff]   ;;  %v11163_v34 = vld [vmem:[%s12806_s15 + $0xba4] ss:$16 sps:$4 sm:$0xff]  }
 0x1cf   : > { %6526 = vmatpush1.bf16.msra.mxu0 %v11071_v18  ;;  %7141 = vmatpush1.bf16.msra.mxu1 %v11074_v35  ;;  %v11166_v18 = vld [vmem:[%s12806_s15 + $0xbac] ss:$16 sps:$4 sm:$0xff]   ;;  %v11161_v35 = vld [vmem:[%s12806_s15 + $0xba0] ss:$16 sps:$4 sm:$0xff]  }
 0x1d0   : > { %6527 = vmatprep.subr.bf16.mxu0 %v11079_v36  ;;  %7142 = vmatprep.subr.bf16.mxu1 %v11082_v37  ;;  %v11164_v36 = vld [vmem:[%s12806_s15 + $0xba8] ss:$16 sps:$4 sm:$0xff]   ;;  %v11169_v37 = vld [vmem:[%s12806_s15 + $0xbc4] ss:$16 sps:$4 sm:$0xff]  }
 0x1d3   : > { %6528 = vmatpush1.bf16.msra.mxu0 %v11077_v28  ;;  %7143 = vmatpush1.bf16.msra.mxu1 %v11080_v38  ;;  %v11172_v28 = vld [vmem:[%s12806_s15 + $0xbcc] ss:$16 sps:$4 sm:$0xff]   ;;  %v12046_v38 = vld [vmem:[%s12828_s8 + $0x8] sm:$0xff] }
 0x1d4   : > { %6538 = vmatprep.subr.bf16.mxu0 %v11085_v39  ;;  %7153 = vmatprep.subr.bf16.mxu1 %v11088_v30  ;;  %v1358_v39 = vcombine.high %v12046_v38, %v12046_v38  ;;  %v11167_v30 = vld [vmem:[%s12806_s15 + $0xbc0] ss:$16 sps:$4 sm:$0xff]   ;;  %v11256_v38 = vld [vmem:[%s12806_s15 + $0xd8c] ss:$16 sps:$4 sm:$0xff]  }
 0x1d6   : > { %6530 = vmatmul.mubr.bf16.vlgmr.msra.gmra.mrb[0].mxu0 %v13213_v42  ;;  %7145 = vmatmul.mubr.bf16.vlgmr.msra.gmra.mrb[0].mxu1 %v13213_v42 }
 0x1d7   : > { %6539 = vmatpush1.bf16.msra.mxu0 %v11083_v43  ;;  %7154 = vmatpush1.bf16.msra.mxu1 %v11086_v44  ;;  %v11170_v43 = vld [vmem:[%s12806_s15 + $0xbc8] ss:$16 sps:$4 sm:$0xff]   ;;  %v11175_v44 = vld [vmem:[%s12806_s15 + $0xbe4] ss:$16 sps:$4 sm:$0xff]  }
 0x1d8   : > { %6540 = vmatprep.subr.bf16.mxu0 %v11091_v46  ;;  %7155 = vmatprep.subr.bf16.mxu1 %v11094_v47  ;;  %v11178_v46 = vld [vmem:[%s12806_s15 + $0xbec] ss:$16 sps:$4 sm:$0xff]   ;;  %v13281_v47 = vrot.slane %v1358_v39, %v12886_v51  ;;  %v11251_v39 = vld [vmem:[%s12806_s15 + $0xd80] ss:$16 sps:$4 sm:$0xff]  }
 0x1d9   : > { %6570 = vmatprep.mubr.bf16.mxu0 %v1405_v48  ;;  %7185 = vmatprep.mubr.bf16.mxu1 %v1405_v48  ;;  %v11173_v48 = vld [vmem:[%s12806_s15 + $0xbe0] ss:$16 sps:$4 sm:$0xff]  }
 0x1db   : > { %6541 = vmatpush1.bf16.msra.mxu0 %v11089_v26  ;;  %7156 = vmatpush1.bf16.msra.mxu1 %v11092_v49  ;;  %v11176_v26 = vld [vmem:[%s12806_s15 + $0xbe8] ss:$16 sps:$4 sm:$0xff]   ;;  %v11181_v49 = vld [vmem:[%s12806_s15 + $0xc04] ss:$16 sps:$4 sm:$0xff]  }
 0x1dc   : > { %6542 = vmatprep.subr.bf16.mxu0 %v11097_v50  ;;  %7157 = vmatprep.subr.bf16.mxu1 %v11100_v52  ;;  %v11184_v50 = vld [vmem:[%s12806_s15 + $0xc0c] ss:$16 sps:$4 sm:$0xff]   ;;  %v1374_v52 = vcombine.high %v13281_v47, %v13281_v47 }
 0x1df   : > { %6543 = vmatpush1.bf16.msra.mxu0 %v11095_v41  ;;  %7158 = vmatpush1.bf16.msra.mxu1 %v11098_v53  ;;  %v1403_v41 = vcombine.high %v13213_v42, %v13213_v42  ;;  %v11179_v53 = vld [vmem:[%s12806_s15 + $0xc00] ss:$16 sps:$4 sm:$0xff]  }
 0x1e0   : > { %6544 = vmatprep.subr.bf16.mxu0 %v11103_v55  ;;  %7159 = vmatprep.subr.bf16.mxu1 %v11106_v56  ;;  %v11182_v55 = vld [vmem:[%s12806_s15 + $0xc08] ss:$16 sps:$4 sm:$0xff]   ;;  %v11187_v56 = vld [vmem:[%s12806_s15 + $0xc24] ss:$16 sps:$4 sm:$0xff]   ;;  %v11185_v42 = vld [vmem:[%s12806_s15 + $0xc20] ss:$16 sps:$4 sm:$0xff]  }
 0x1e3   : > { %6545 = vmatpush1.bf16.msra.mxu0 %v11101_v57  ;;  %7160 = vmatpush1.bf16.msra.mxu1 %v11104_v58  ;;  %v11190_v57 = vld [vmem:[%s12806_s15 + $0xc2c] ss:$16 sps:$4 sm:$0xff]   ;;  %v13296_v58 = vrot.slane %v1374_v52, %v12886_v51  ;;  %v11266_v52 = vld [vmem:[%s12806_s15 + $0xdc8] ss:$16 sps:$4 sm:$0xff]  }
 0x1e4   : > { %6546 = vmatprep.subr.bf16.mxu0 %v11109_v59  ;;  %7161 = vmatprep.subr.bf16.mxu1 %v11112_v60  ;;  %v11188_v59 = vld [vmem:[%s12806_s15 + $0xc28] ss:$16 sps:$4 sm:$0xff]   ;;  %v11193_v60 = vld [vmem:[%s12806_s15 + $0xc44] ss:$16 sps:$4 sm:$0xff]  }
 0x1e7   : > { %6547 = vmatpush1.bf16.msra.mxu0 %v11107_v61  ;;  %7162 = vmatpush1.bf16.msra.mxu1 %v11110_v62  ;;  %v11196_v61 = vld [vmem:[%s12806_s15 + $0xc4c] ss:$16 sps:$4 sm:$0xff]   ;;  %v11191_v62 = vld [vmem:[%s12806_s15 + $0xc40] ss:$16 sps:$4 sm:$0xff]  }
 0x1e8   : > { %6548 = vmatprep.subr.bf16.mxu0 %v11115_v63  ;;  %7163 = vmatprep.subr.bf16.mxu1 %v11118_v0  ;;  %v11194_v63 = vld [vmem:[%s12806_s15 + $0xc48] ss:$16 sps:$4 sm:$0xff]   ;;  %v11199_v0 = vld [vmem:[%s12806_s15 + $0xc64] ss:$16 sps:$4 sm:$0xff]  }
 0x1eb   : > { %6549 = vmatpush1.bf16.msra.mxu0 %v11113_v1  ;;  %7164 = vmatpush1.bf16.msra.mxu1 %v11116_v2  ;;  %v11202_v1 = vld [vmem:[%s12806_s15 + $0xc6c] ss:$16 sps:$4 sm:$0xff]   ;;  %v11197_v2 = vld [vmem:[%s12806_s15 + $0xc60] ss:$16 sps:$4 sm:$0xff]  }
 0x1ec   : > { %6550 = vmatprep.subr.bf16.mxu0 %v11121_v3  ;;  %7165 = vmatprep.subr.bf16.mxu1 %v11124_v4  ;;  %v11200_v3 = vld [vmem:[%s12806_s15 + $0xc68] ss:$16 sps:$4 sm:$0xff]   ;;  %v11205_v4 = vld [vmem:[%s12806_s15 + $0xc84] ss:$16 sps:$4 sm:$0xff]  }
 0x1ef   : > { %6551 = vmatpush1.bf16.msra.mxu0 %v11119_v5  ;;  %7166 = vmatpush1.bf16.msra.mxu1 %v11122_v6  ;;  %v11208_v5 = vld [vmem:[%s12806_s15 + $0xc8c] ss:$16 sps:$4 sm:$0xff]   ;;  %v11203_v6 = vld [vmem:[%s12806_s15 + $0xc80] ss:$16 sps:$4 sm:$0xff]  }
 0x1f0   : > { %6552 = vmatprep.subr.bf16.mxu0 %v11127_v7  ;;  %7167 = vmatprep.subr.bf16.mxu1 %v11130_v8  ;;  %v11206_v7 = vld [vmem:[%s12806_s15 + $0xc88] ss:$16 sps:$4 sm:$0xff]   ;;  %v11211_v8 = vld [vmem:[%s12806_s15 + $0xca4] ss:$16 sps:$4 sm:$0xff]  }
 0x1f3   : > { %6553 = vmatpush1.bf16.msra.mxu0 %v11125_v9  ;;  %7168 = vmatpush1.bf16.msra.mxu1 %v11128_v10  ;;  %v11214_v9 = vld [vmem:[%s12806_s15 + $0xcac] ss:$16 sps:$4 sm:$0xff]   ;;  %v11209_v10 = vld [vmem:[%s12806_s15 + $0xca0] ss:$16 sps:$4 sm:$0xff]  }
 0x1f4   : > { %6554 = vmatprep.subr.bf16.mxu0 %v11133_v11  ;;  %7169 = vmatprep.subr.bf16.mxu1 %v11136_v12  ;;  %v11212_v11 = vld [vmem:[%s12806_s15 + $0xca8] ss:$16 sps:$4 sm:$0xff]   ;;  %v11217_v12 = vld [vmem:[%s12806_s15 + $0xcc4] ss:$16 sps:$4 sm:$0xff]  }
 0x1f7   : > { %6555 = vmatpush1.bf16.msra.mxu0 %v11131_v13  ;;  %7170 = vmatpush1.bf16.msra.mxu1 %v11134_v14  ;;  %v11220_v13 = vld [vmem:[%s12806_s15 + $0xccc] ss:$16 sps:$4 sm:$0xff]   ;;  %v11215_v14 = vld [vmem:[%s12806_s15 + $0xcc0] ss:$16 sps:$4 sm:$0xff]  }
 0x1f8   : > { %6556 = vmatprep.subr.bf16.mxu0 %v11139_v16  ;;  %7171 = vmatprep.subr.bf16.mxu1 %v11142_v17  ;;  %v11218_v16 = vld [vmem:[%s12806_s15 + $0xcc8] ss:$16 sps:$4 sm:$0xff]   ;;  %v11223_v17 = vld [vmem:[%s12806_s15 + $0xce4] ss:$16 sps:$4 sm:$0xff]  }
 0x1fb   : > { %6557 = vmatpush1.bf16.msra.mxu0 %v11137_v19  ;;  %7172 = vmatpush1.bf16.msra.mxu1 %v11140_v54  ;;  %v11226_v19 = vld [vmem:[%s12806_s15 + $0xcec] ss:$16 sps:$4 sm:$0xff]   ;;  %v11221_v54 = vld [vmem:[%s12806_s15 + $0xce0] ss:$16 sps:$4 sm:$0xff]  }
 0x1fc   : > { %6558 = vmatprep.subr.bf16.mxu0 %v11145_v20  ;;  %7173 = vmatprep.subr.bf16.mxu1 %v11148_v21  ;;  %v11224_v20 = vld [vmem:[%s12806_s15 + $0xce8] ss:$16 sps:$4 sm:$0xff]   ;;  %v11229_v21 = vld [vmem:[%s12806_s15 + $0xd04] ss:$16 sps:$4 sm:$0xff]  }
 0x1ff   : > { %6559 = vmatpush1.bf16.msra.mxu0 %v11143_v22  ;;  %7174 = vmatpush1.bf16.msra.mxu1 %v11146_v23  ;;  %v11232_v22 = vld [vmem:[%s12806_s15 + $0xd0c] ss:$16 sps:$4 sm:$0xff]   ;;  %v11227_v23 = vld [vmem:[%s12806_s15 + $0xd00] ss:$16 sps:$4 sm:$0xff]  }
 0x200   : > { %6560 = vmatprep.subr.bf16.mxu0 %v11151_v24  ;;  %7175 = vmatprep.subr.bf16.mxu1 %v11154_v25  ;;  %v11230_v24 = vld [vmem:[%s12806_s15 + $0xd08] ss:$16 sps:$4 sm:$0xff]   ;;  %v11235_v25 = vld [vmem:[%s12806_s15 + $0xd24] ss:$16 sps:$4 sm:$0xff]  }
 0x203   : > { %6561 = vmatpush1.bf16.msra.mxu0 %v11149_v27  ;;  %7176 = vmatpush1.bf16.msra.mxu1 %v11152_v29  ;;  %v11238_v27 = vld [vmem:[%s12806_s15 + $0xd2c] ss:$16 sps:$4 sm:$0xff]   ;;  %v11233_v29 = vld [vmem:[%s12806_s15 + $0xd20] ss:$16 sps:$4 sm:$0xff]  }
 0x204   : > { %6562 = vmatprep.subr.bf16.mxu0 %v11157_v15  ;;  %7177 = vmatprep.subr.bf16.mxu1 %v11160_v31  ;;  %v11236_v15 = vld [vmem:[%s12806_s15 + $0xd28] ss:$16 sps:$4 sm:$0xff]   ;;  %v11241_v31 = vld [vmem:[%s12806_s15 + $0xd44] ss:$16 sps:$4 sm:$0xff]  }
 0x207   : > { %6563 = vmatpush1.bf16.msra.mxu0 %v11155_v32  ;;  %7178 = vmatpush1.bf16.msra.mxu1 %v11158_v33  ;;  %v11244_v32 = vld [vmem:[%s12806_s15 + $0xd4c] ss:$16 sps:$4 sm:$0xff]   ;;  %v11239_v33 = vld [vmem:[%s12806_s15 + $0xd40] ss:$16 sps:$4 sm:$0xff]  }
 0x208   : > { %6564 = vmatprep.subr.bf16.mxu0 %v11163_v34  ;;  %7179 = vmatprep.subr.bf16.mxu1 %v11166_v18  ;;  %v11242_v34 = vld [vmem:[%s12806_s15 + $0xd48] ss:$16 sps:$4 sm:$0xff]   ;;  %v11247_v18 = vld [vmem:[%s12806_s15 + $0xd64] ss:$16 sps:$4 sm:$0xff]  }
 0x20b   : > { %6565 = vmatpush1.bf16.msra.mxu0 %v11161_v35  ;;  %7180 = vmatpush1.bf16.msra.mxu1 %v11164_v36  ;;  %v11250_v35 = vld [vmem:[%s12806_s15 + $0xd6c] ss:$16 sps:$4 sm:$0xff]   ;;  %v11245_v36 = vld [vmem:[%s12806_s15 + $0xd60] ss:$16 sps:$4 sm:$0xff]  }
 0x20c   : > { %6566 = vmatprep.subr.bf16.mxu0 %v11169_v37  ;;  %7181 = vmatprep.subr.bf16.mxu1 %v11172_v28  ;;  %v11248_v37 = vld [vmem:[%s12806_s15 + $0xd68] ss:$16 sps:$4 sm:$0xff]   ;;  %v11253_v28 = vld [vmem:[%s12806_s15 + $0xd84] ss:$16 sps:$4 sm:$0xff]  }
 0x20f   : > { %6567 = vmatpush1.bf16.msra.mxu0 %v11167_v30  ;;  %7182 = vmatpush1.bf16.msra.mxu1 %v11170_v43  ;;  %v11254_v30 = vld [vmem:[%s12806_s15 + $0xd88] ss:$16 sps:$4 sm:$0xff]   ;;  %v11259_v43 = vld [vmem:[%s12806_s15 + $0xda4] ss:$16 sps:$4 sm:$0xff]  }
 0x210   : > { %6568 = vmatprep.subr.bf16.mxu0 %v11175_v44  ;;  %7183 = vmatprep.subr.bf16.mxu1 %v11178_v46  ;;  %v11262_v44 = vld [vmem:[%s12806_s15 + $0xdac] ss:$16 sps:$4 sm:$0xff]   ;;  %v11257_v46 = vld [vmem:[%s12806_s15 + $0xda0] ss:$16 sps:$4 sm:$0xff]  }
 0x213   : > { %6569 = vmatpush1.bf16.msra.mxu0 %v11173_v48  ;;  %7184 = vmatpush1.bf16.msra.mxu1 %v11176_v26  ;;  %v11260_v48 = vld [vmem:[%s12806_s15 + $0xda8] ss:$16 sps:$4 sm:$0xff]   ;;  %v11265_v26 = vld [vmem:[%s12806_s15 + $0xdc4] ss:$16 sps:$4 sm:$0xff]  }
 0x214   : > { %6579 = vmatprep.subr.bf16.mxu0 %v11181_v49  ;;  %7194 = vmatprep.subr.bf16.mxu1 %v11184_v50  ;;  %v11268_v49 = vld [vmem:[%s12806_s15 + $0xdcc] ss:$16 sps:$4 sm:$0xff]   ;;  %v11263_v50 = vld [vmem:[%s12806_s15 + $0xdc0] ss:$16 sps:$4 sm:$0xff]  }
 0x216   : > { %6571 = vmatmul.mubr.bf16.vlgmr.msra.gmra.mrb[0].mxu0 %v1403_v41  ;;  %7186 = vmatmul.mubr.bf16.vlgmr.msra.gmra.mrb[0].mxu1 %v1403_v41  ;;  %v11271_v41 = vld [vmem:[%s12806_s15 + $0xde4] ss:$16 sps:$4 sm:$0xff]  }
 0x217   : > { %6580 = vmatpush1.bf16.msra.mxu0 %v11179_v53  ;;  %7195 = vmatpush1.bf16.msra.mxu1 %v11182_v55  ;;  %v11274_v53 = vld [vmem:[%s12806_s15 + $0xdec] ss:$16 sps:$4 sm:$0xff]   ;;  %v11269_v55 = vld [vmem:[%s12806_s15 + $0xde0] ss:$16 sps:$4 sm:$0xff]  }
 0x218   : > { %6581 = vmatprep.subr.bf16.mxu0 %v11187_v56  ;;  %7196 = vmatprep.subr.bf16.mxu1 %v11190_v57  ;;  %v11272_v56 = vld [vmem:[%s12806_s15 + $0xde8] ss:$16 sps:$4 sm:$0xff]   ;;  %v11278_v57 = vld [vmem:[%s12806_s15 + $0xe04] ss:$16 sps:$4 sm:$0xff]  }
 0x219   : > { %6611 = vmatprep.mubr.bf16.mxu0 %v13296_v58  ;;  %7226 = vmatprep.mubr.bf16.mxu1 %v13296_v58 }
 0x21b   : > { %6582 = vmatpush1.bf16.msra.mxu0 %v11185_v42  ;;  %7197 = vmatpush1.bf16.msra.mxu1 %v11188_v59  ;;  %v11281_v42 = vld [vmem:[%s12806_s15 + $0xe0c] ss:$16 sps:$4 sm:$0xff]   ;;  %v13362_v59 = vrot.slane %v13281_v47, %v12886_v51  ;;  %v11282_v47 = vld [vmem:[%s12806_s15 + $0xe20] ss:$16 sps:$4 sm:$0xff]  }
 0x21c   : > { %6583 = vmatprep.subr.bf16.mxu0 %v11193_v60  ;;  %7198 = vmatprep.subr.bf16.mxu1 %v11196_v61  ;;  %v11276_v60 = vld [vmem:[%s12806_s15 + $0xe00] ss:$16 sps:$4 sm:$0xff]   ;;  %v11279_v61 = vld [vmem:[%s12806_s15 + $0xe08] ss:$16 sps:$4 sm:$0xff]  }
 0x21f   : > { %6584 = vmatpush1.bf16.msra.mxu0 %v11191_v62  ;;  %7199 = vmatpush1.bf16.msra.mxu1 %v11194_v63  ;;  %v11284_v62 = vld [vmem:[%s12806_s15 + $0xe24] ss:$16 sps:$4 sm:$0xff]   ;;  %v11287_v63 = vld [vmem:[%s12806_s15 + $0xe2c] ss:$16 sps:$4 sm:$0xff]  }
 0x220   : > { %6585 = vmatprep.subr.bf16.mxu0 %v11199_v0  ;;  %7200 = vmatprep.subr.bf16.mxu1 %v11202_v1  ;;  %v1406_v0 = vcombine.high %v13296_v58, %v13296_v58  ;;  %v11285_v1 = vld [vmem:[%s12806_s15 + $0xe28] ss:$16 sps:$4 sm:$0xff]   ;;  %v11288_v58 = vld [vmem:[%s12806_s15 + $0xe40] ss:$16 sps:$4 sm:$0xff]  }
 0x223   : > { %6586 = vmatpush1.bf16.msra.mxu0 %v11197_v2  ;;  %7201 = vmatpush1.bf16.msra.mxu1 %v11200_v3  ;;  %v11290_v2 = vld [vmem:[%s12806_s15 + $0xe44] ss:$16 sps:$4 sm:$0xff]   ;;  %v11293_v3 = vld [vmem:[%s12806_s15 + $0xe4c] ss:$16 sps:$4 sm:$0xff]  }
 0x224   : > { %6587 = vmatprep.subr.bf16.mxu0 %v11205_v4  ;;  %7202 = vmatprep.subr.bf16.mxu1 %v11208_v5  ;;  %v11291_v4 = vld [vmem:[%s12806_s15 + $0xe48] ss:$16 sps:$4 sm:$0xff]   ;;  %v11296_v5 = vld [vmem:[%s12806_s15 + $0xe64] ss:$16 sps:$4 sm:$0xff]  }
 0x227   : > { %6588 = vmatpush1.bf16.msra.mxu0 %v11203_v6  ;;  %7203 = vmatpush1.bf16.msra.mxu1 %v11206_v7  ;;  %v11299_v6 = vld [vmem:[%s12806_s15 + $0xe6c] ss:$16 sps:$4 sm:$0xff]   ;;  %v11294_v7 = vld [vmem:[%s12806_s15 + $0xe60] ss:$16 sps:$4 sm:$0xff]  }
 0x228   : > { %6589 = vmatprep.subr.bf16.mxu0 %v11211_v8  ;;  %7204 = vmatprep.subr.bf16.mxu1 %v11214_v9  ;;  %v11297_v8 = vld [vmem:[%s12806_s15 + $0xe68] ss:$16 sps:$4 sm:$0xff]   ;;  %v11302_v9 = vld [vmem:[%s12806_s15 + $0xe84] ss:$16 sps:$4 sm:$0xff]  }
 0x22b   : > { %6590 = vmatpush1.bf16.msra.mxu0 %v11209_v10  ;;  %7205 = vmatpush1.bf16.msra.mxu1 %v11212_v11  ;;  %v11305_v10 = vld [vmem:[%s12806_s15 + $0xe8c] ss:$16 sps:$4 sm:$0xff]   ;;  %v11300_v11 = vld [vmem:[%s12806_s15 + $0xe80] ss:$16 sps:$4 sm:$0xff]  }
 0x22c   : > { %6591 = vmatprep.subr.bf16.mxu0 %v11217_v12  ;;  %7206 = vmatprep.subr.bf16.mxu1 %v11220_v13  ;;  %v11303_v12 = vld [vmem:[%s12806_s15 + $0xe88] ss:$16 sps:$4 sm:$0xff]   ;;  %v11308_v13 = vld [vmem:[%s12806_s15 + $0xea4] ss:$16 sps:$4 sm:$0xff]  }
 0x22f   : > { %6592 = vmatpush1.bf16.msra.mxu0 %v11215_v14  ;;  %7207 = vmatpush1.bf16.msra.mxu1 %v11218_v16  ;;  %v11311_v14 = vld [vmem:[%s12806_s15 + $0xeac] ss:$16 sps:$4 sm:$0xff]   ;;  %v11306_v16 = vld [vmem:[%s12806_s15 + $0xea0] ss:$16 sps:$4 sm:$0xff]  }
 0x230   : > { %6593 = vmatprep.subr.bf16.mxu0 %v11223_v17  ;;  %7208 = vmatprep.subr.bf16.mxu1 %v11226_v19  ;;  %v11309_v17 = vld [vmem:[%s12806_s15 + $0xea8] ss:$16 sps:$4 sm:$0xff]   ;;  %v11314_v19 = vld [vmem:[%s12806_s15 + $0xec4] ss:$16 sps:$4 sm:$0xff]  }
 0x233   : > { %6594 = vmatpush1.bf16.msra.mxu0 %v11221_v54  ;;  %7209 = vmatpush1.bf16.msra.mxu1 %v11224_v20  ;;  %v11317_v54 = vld [vmem:[%s12806_s15 + $0xecc] ss:$16 sps:$4 sm:$0xff]   ;;  %v11312_v20 = vld [vmem:[%s12806_s15 + $0xec0] ss:$16 sps:$4 sm:$0xff]  }
 0x234   : > { %6595 = vmatprep.subr.bf16.mxu0 %v11229_v21  ;;  %7210 = vmatprep.subr.bf16.mxu1 %v11232_v22  ;;  %v11315_v21 = vld [vmem:[%s12806_s15 + $0xec8] ss:$16 sps:$4 sm:$0xff]   ;;  %v11320_v22 = vld [vmem:[%s12806_s15 + $0xee4] ss:$16 sps:$4 sm:$0xff]  }
 0x237   : > { %6596 = vmatpush1.bf16.msra.mxu0 %v11227_v23  ;;  %7211 = vmatpush1.bf16.msra.mxu1 %v11230_v24  ;;  %v11323_v23 = vld [vmem:[%s12806_s15 + $0xeec] ss:$16 sps:$4 sm:$0xff]   ;;  %v11318_v24 = vld [vmem:[%s12806_s15 + $0xee0] ss:$16 sps:$4 sm:$0xff]  }
 0x238   : > { %6597 = vmatprep.subr.bf16.mxu0 %v11235_v25  ;;  %7212 = vmatprep.subr.bf16.mxu1 %v11238_v27  ;;  %v11321_v25 = vld [vmem:[%s12806_s15 + $0xee8] ss:$16 sps:$4 sm:$0xff]   ;;  %v11326_v27 = vld [vmem:[%s12806_s15 + $0xf04] ss:$16 sps:$4 sm:$0xff]  }
 0x23b   : > { %6598 = vmatpush1.bf16.msra.mxu0 %v11233_v29  ;;  %7213 = vmatpush1.bf16.msra.mxu1 %v11236_v15  ;;  %v11329_v29 = vld [vmem:[%s12806_s15 + $0xf0c] ss:$16 sps:$4 sm:$0xff]   ;;  %v11324_v15 = vld [vmem:[%s12806_s15 + $0xf00] ss:$16 sps:$4 sm:$0xff]  }
 0x23c   : > { %6599 = vmatprep.subr.bf16.mxu0 %v11241_v31  ;;  %7214 = vmatprep.subr.bf16.mxu1 %v11244_v32  ;;  %v11327_v31 = vld [vmem:[%s12806_s15 + $0xf08] ss:$16 sps:$4 sm:$0xff]   ;;  %v11332_v32 = vld [vmem:[%s12806_s15 + $0xf24] ss:$16 sps:$4 sm:$0xff]  }
 0x23f   : > { %6600 = vmatpush1.bf16.msra.mxu0 %v11239_v33  ;;  %7215 = vmatpush1.bf16.msra.mxu1 %v11242_v34  ;;  %v11335_v33 = vld [vmem:[%s12806_s15 + $0xf2c] ss:$16 sps:$4 sm:$0xff]   ;;  %v11330_v34 = vld [vmem:[%s12806_s15 + $0xf20] ss:$16 sps:$4 sm:$0xff]  }
 0x240   : > { %6601 = vmatprep.subr.bf16.mxu0 %v11247_v18  ;;  %7216 = vmatprep.subr.bf16.mxu1 %v11250_v35  ;;  %v11333_v18 = vld [vmem:[%s12806_s15 + $0xf28] ss:$16 sps:$4 sm:$0xff]   ;;  %v11338_v35 = vld [vmem:[%s12806_s15 + $0xf44] ss:$16 sps:$4 sm:$0xff]  }
 0x243   : > { %6602 = vmatpush1.bf16.msra.mxu0 %v11245_v36  ;;  %7217 = vmatpush1.bf16.msra.mxu1 %v11248_v37  ;;  %v11341_v36 = vld [vmem:[%s12806_s15 + $0xf4c] ss:$16 sps:$4 sm:$0xff]   ;;  %v11336_v37 = vld [vmem:[%s12806_s15 + $0xf40] ss:$16 sps:$4 sm:$0xff]  }
 0x244   : > { %6603 = vmatprep.subr.bf16.mxu0 %v11253_v28  ;;  %7218 = vmatprep.subr.bf16.mxu1 %v11256_v38  ;;  %v11339_v28 = vld [vmem:[%s12806_s15 + $0xf48] ss:$16 sps:$4 sm:$0xff]   ;;  %v11344_v38 = vld [vmem:[%s12806_s15 + $0xf64] ss:$16 sps:$4 sm:$0xff]  }
 0x247   : > { %6604 = vmatpush1.bf16.msra.mxu0 %v11251_v39  ;;  %7219 = vmatpush1.bf16.msra.mxu1 %v11254_v30  ;;  %v11347_v39 = vld [vmem:[%s12806_s15 + $0xf6c] ss:$16 sps:$4 sm:$0xff]   ;;  %v11342_v30 = vld [vmem:[%s12806_s15 + $0xf60] ss:$16 sps:$4 sm:$0xff]  }
 0x248   : > { %6605 = vmatprep.subr.bf16.mxu0 %v11259_v43  ;;  %7220 = vmatprep.subr.bf16.mxu1 %v11262_v44  ;;  %v11345_v43 = vld [vmem:[%s12806_s15 + $0xf68] ss:$16 sps:$4 sm:$0xff]   ;;  %v11350_v44 = vld [vmem:[%s12806_s15 + $0xf84] ss:$16 sps:$4 sm:$0xff]  }
 0x24b   : > { %6606 = vmatpush1.bf16.msra.mxu0 %v11257_v46  ;;  %7221 = vmatpush1.bf16.msra.mxu1 %v11260_v48  ;;  %v11353_v46 = vld [vmem:[%s12806_s15 + $0xf8c] ss:$16 sps:$4 sm:$0xff]   ;;  %v11348_v48 = vld [vmem:[%s12806_s15 + $0xf80] ss:$16 sps:$4 sm:$0xff]  }
 0x24c   : > { %6607 = vmatprep.subr.bf16.mxu0 %v11265_v26  ;;  %7222 = vmatprep.subr.bf16.mxu1 %v11268_v49  ;;  %v11351_v26 = vld [vmem:[%s12806_s15 + $0xf88] ss:$16 sps:$4 sm:$0xff]   ;;  %v11356_v49 = vld [vmem:[%s12806_s15 + $0xfa4] ss:$16 sps:$4 sm:$0xff]  }
 0x24f   : > { %6608 = vmatpush1.bf16.msra.mxu0 %v11263_v50  ;;  %7223 = vmatpush1.bf16.msra.mxu1 %v11266_v52  ;;  %v11359_v50 = vld [vmem:[%s12806_s15 + $0xfac] ss:$16 sps:$4 sm:$0xff]   ;;  %v11354_v52 = vld [vmem:[%s12806_s15 + $0xfa0] ss:$16 sps:$4 sm:$0xff]  }
 0x250   : > { %6609 = vmatprep.subr.bf16.mxu0 %v11271_v41  ;;  %7224 = vmatprep.subr.bf16.mxu1 %v11274_v53  ;;  %v11357_v41 = vld [vmem:[%s12806_s15 + $0xfa8] ss:$16 sps:$4 sm:$0xff]   ;;  %v11362_v53 = vld [vmem:[%s12806_s15 + $0xfc4] ss:$16 sps:$4 sm:$0xff]  }
 0x253   : > { %6610 = vmatpush1.bf16.msra.mxu0 %v11269_v55  ;;  %7225 = vmatpush1.bf16.msra.mxu1 %v11272_v56  ;;  %v11365_v55 = vld [vmem:[%s12806_s15 + $0xfcc] ss:$16 sps:$4 sm:$0xff]  }
 0x254   : > { %6620 = vmatprep.subr.bf16.mxu0 %v11278_v57  ;;  %7235 = vmatprep.subr.bf16.mxu1 %v11281_v42  ;;  %v13425_v56 = vld [vmem:[%s12828_s8 + $0x10] sm:$0xff]  ;;  %v11363_v42 = vld [vmem:[%s12806_s15 + $0xfc8] ss:$16 sps:$4 sm:$0xff]  }
 0x255   : > { %v11360_v57 = vld [vmem:[%s12806_s15 + $0xfc0] ss:$16 sps:$4 sm:$0xff]  }
 0x256   : > { %6612 = vmatmul.mubr.bf16.vlgmr.msra.gmra.mrb[0].mxu0 %v13362_v59  ;;  %7227 = vmatmul.mubr.bf16.vlgmr.msra.gmra.mrb[0].mxu1 %v13362_v59 }
 0x257   : > { %6621 = vmatpush1.bf16.msra.mxu0 %v11276_v60  ;;  %7236 = vmatpush1.bf16.msra.mxu1 %v11279_v61  ;;  %v11368_v60 = vld [vmem:[%s12806_s15 + $0xfe4] ss:$16 sps:$4 sm:$0xff]   ;;  %v11371_v61 = vld [vmem:[%s12806_s15 + $0xfec] ss:$16 sps:$4 sm:$0xff]  }
 0x258   : > { %6622 = vmatprep.subr.bf16.mxu0 %v11284_v62  ;;  %7237 = vmatprep.subr.bf16.mxu1 %v11287_v63  ;;  %v13433_v62 = vrot.slane %v13425_v56, %v12886_v51  ;;  %v11366_v63 = vld [vmem:[%s12806_s15 + $0xfe0] ss:$16 sps:$4 sm:$0xff]  }
 0x259   : > { %6652 = vmatprep.mubr.bf16.mxu0 %v1406_v0  ;;  %7267 = vmatprep.mubr.bf16.mxu1 %v1406_v0  ;;  %v11369_v0 = vld [vmem:[%s12806_s15 + $0xfe8] ss:$16 sps:$4 sm:$0xff]  }
 0x25b   : > { %6623 = vmatpush1.bf16.msra.mxu0 %v11282_v47  ;;  %7238 = vmatpush1.bf16.msra.mxu1 %v11285_v1  ;;  %v11374_v47 = vld [vmem:[%s12806_s15 + $0x1004] ss:$16 sps:$4 sm:$0xff]   ;;  %v11377_v1 = vld [vmem:[%s12806_s15 + $0x100c] ss:$16 sps:$4 sm:$0xff]  }
 0x25c   : > { %6624 = vmatprep.subr.bf16.mxu0 %v11290_v2  ;;  %7239 = vmatprep.subr.bf16.mxu1 %v11293_v3  ;;  %v1422_v2 = vcombine.high %v13433_v62, %v13433_v62  ;;  %v1404_v3 = vcombine.high %v13362_v59, %v13362_v59  ;;  %v11378_v59 = vld [vmem:[%s12806_s15 + $0x1020] ss:$16 sps:$4 sm:$0xff]  }
 0x25f   : > { %6625 = vmatpush1.bf16.msra.mxu0 %v11288_v58  ;;  %7240 = vmatpush1.bf16.msra.mxu1 %v11291_v4  ;;  %v11372_v58 = vld [vmem:[%s12806_s15 + $0x1000] ss:$16 sps:$4 sm:$0xff]   ;;  %v11375_v4 = vld [vmem:[%s12806_s15 + $0x1008] ss:$16 sps:$4 sm:$0xff]  }
 0x260   : > { %6626 = vmatprep.subr.bf16.mxu0 %v11296_v5  ;;  %7241 = vmatprep.subr.bf16.mxu1 %v11299_v6  ;;  %v11380_v5 = vld [vmem:[%s12806_s15 + $0x1024] ss:$16 sps:$4 sm:$0xff]   ;;  %v11383_v6 = vld [vmem:[%s12806_s15 + $0x102c] ss:$16 sps:$4 sm:$0xff]  }
 0x263   : > { %6627 = vmatpush1.bf16.msra.mxu0 %v11294_v7  ;;  %7242 = vmatpush1.bf16.msra.mxu1 %v11297_v8  ;;  %v13448_v7 = vrot.slane %v1422_v2, %v12886_v51  ;;  %v11381_v8 = vld [vmem:[%s12806_s15 + $0x1028] ss:$16 sps:$4 sm:$0xff]   ;;  %v11456_v2 = vld [vmem:[%s12806_s15 + $0x11c0] ss:$16 sps:$4 sm:$0xff]  }
 0x264   : > { %6628 = vmatprep.subr.bf16.mxu0 %v11302_v9  ;;  %7243 = vmatprep.subr.bf16.mxu1 %v11305_v10  ;;  %v11386_v9 = vld [vmem:[%s12806_s15 + $0x1044] ss:$16 sps:$4 sm:$0xff]   ;;  %v11389_v10 = vld [vmem:[%s12806_s15 + $0x104c] ss:$16 sps:$4 sm:$0xff]  }
 0x267   : > { %6629 = vmatpush1.bf16.msra.mxu0 %v11300_v11  ;;  %7244 = vmatpush1.bf16.msra.mxu1 %v11303_v12  ;;  %v11384_v11 = vld [vmem:[%s12806_s15 + $0x1040] ss:$16 sps:$4 sm:$0xff]   ;;  %v11387_v12 = vld [vmem:[%s12806_s15 + $0x1048] ss:$16 sps:$4 sm:$0xff]  }
 0x268   : > { %6630 = vmatprep.subr.bf16.mxu0 %v11308_v13  ;;  %7245 = vmatprep.subr.bf16.mxu1 %v11311_v14  ;;  %v11392_v13 = vld [vmem:[%s12806_s15 + $0x1064] ss:$16 sps:$4 sm:$0xff]   ;;  %v11395_v14 = vld [vmem:[%s12806_s15 + $0x106c] ss:$16 sps:$4 sm:$0xff]  }
 0x26b   : > { %6631 = vmatpush1.bf16.msra.mxu0 %v11306_v16  ;;  %7246 = vmatpush1.bf16.msra.mxu1 %v11309_v17  ;;  %v11390_v16 = vld [vmem:[%s12806_s15 + $0x1060] ss:$16 sps:$4 sm:$0xff]   ;;  %v11393_v17 = vld [vmem:[%s12806_s15 + $0x1068] ss:$16 sps:$4 sm:$0xff]  }
 0x26c   : > { %6632 = vmatprep.subr.bf16.mxu0 %v11314_v19  ;;  %7247 = vmatprep.subr.bf16.mxu1 %v11317_v54  ;;  %v11398_v19 = vld [vmem:[%s12806_s15 + $0x1084] ss:$16 sps:$4 sm:$0xff]   ;;  %v11401_v54 = vld [vmem:[%s12806_s15 + $0x108c] ss:$16 sps:$4 sm:$0xff]  }
 0x26f   : > { %6633 = vmatpush1.bf16.msra.mxu0 %v11312_v20  ;;  %7248 = vmatpush1.bf16.msra.mxu1 %v11315_v21  ;;  %v11396_v20 = vld [vmem:[%s12806_s15 + $0x1080] ss:$16 sps:$4 sm:$0xff]   ;;  %v11399_v21 = vld [vmem:[%s12806_s15 + $0x1088] ss:$16 sps:$4 sm:$0xff]  }
 0x270   : > { %6634 = vmatprep.subr.bf16.mxu0 %v11320_v22  ;;  %7249 = vmatprep.subr.bf16.mxu1 %v11323_v23  ;;  %v11404_v22 = vld [vmem:[%s12806_s15 + $0x10a4] ss:$16 sps:$4 sm:$0xff]   ;;  %v11407_v23 = vld [vmem:[%s12806_s15 + $0x10ac] ss:$16 sps:$4 sm:$0xff]  }
 0x273   : > { %6635 = vmatpush1.bf16.msra.mxu0 %v11318_v24  ;;  %7250 = vmatpush1.bf16.msra.mxu1 %v11321_v25  ;;  %v11402_v24 = vld [vmem:[%s12806_s15 + $0x10a0] ss:$16 sps:$4 sm:$0xff]   ;;  %v11405_v25 = vld [vmem:[%s12806_s15 + $0x10a8] ss:$16 sps:$4 sm:$0xff]  }
 0x274   : > { %6636 = vmatprep.subr.bf16.mxu0 %v11326_v27  ;;  %7251 = vmatprep.subr.bf16.mxu1 %v11329_v29  ;;  %v11410_v27 = vld [vmem:[%s12806_s15 + $0x10c4] ss:$16 sps:$4 sm:$0xff]   ;;  %v11413_v29 = vld [vmem:[%s12806_s15 + $0x10cc] ss:$16 sps:$4 sm:$0xff]  }
 0x277   : > { %6637 = vmatpush1.bf16.msra.mxu0 %v11324_v15  ;;  %7252 = vmatpush1.bf16.msra.mxu1 %v11327_v31  ;;  %v11408_v15 = vld [vmem:[%s12806_s15 + $0x10c0] ss:$16 sps:$4 sm:$0xff]   ;;  %v11411_v31 = vld [vmem:[%s12806_s15 + $0x10c8] ss:$16 sps:$4 sm:$0xff]  }
 0x278   : > { %6638 = vmatprep.subr.bf16.mxu0 %v11332_v32  ;;  %7253 = vmatprep.subr.bf16.mxu1 %v11335_v33  ;;  %v11416_v32 = vld [vmem:[%s12806_s15 + $0x10e4] ss:$16 sps:$4 sm:$0xff]   ;;  %v11419_v33 = vld [vmem:[%s12806_s15 + $0x10ec] ss:$16 sps:$4 sm:$0xff]  }
 0x27b   : > { %6639 = vmatpush1.bf16.msra.mxu0 %v11330_v34  ;;  %7254 = vmatpush1.bf16.msra.mxu1 %v11333_v18  ;;  %v11414_v34 = vld [vmem:[%s12806_s15 + $0x10e0] ss:$16 sps:$4 sm:$0xff]   ;;  %v11417_v18 = vld [vmem:[%s12806_s15 + $0x10e8] ss:$16 sps:$4 sm:$0xff]  }
 0x27c   : > { %6640 = vmatprep.subr.bf16.mxu0 %v11338_v35  ;;  %7255 = vmatprep.subr.bf16.mxu1 %v11341_v36  ;;  %v11422_v35 = vld [vmem:[%s12806_s15 + $0x1104] ss:$16 sps:$4 sm:$0xff]   ;;  %v11425_v36 = vld [vmem:[%s12806_s15 + $0x110c] ss:$16 sps:$4 sm:$0xff]  }
 0x27f   : > { %6641 = vmatpush1.bf16.msra.mxu0 %v11336_v37  ;;  %7256 = vmatpush1.bf16.msra.mxu1 %v11339_v28  ;;  %v11420_v37 = vld [vmem:[%s12806_s15 + $0x1100] ss:$16 sps:$4 sm:$0xff]   ;;  %v11423_v28 = vld [vmem:[%s12806_s15 + $0x1108] ss:$16 sps:$4 sm:$0xff]  }
 0x280   : > { %6642 = vmatprep.subr.bf16.mxu0 %v11344_v38  ;;  %7257 = vmatprep.subr.bf16.mxu1 %v11347_v39  ;;  %v11428_v38 = vld [vmem:[%s12806_s15 + $0x1124] ss:$16 sps:$4 sm:$0xff]   ;;  %v11431_v39 = vld [vmem:[%s12806_s15 + $0x112c] ss:$16 sps:$4 sm:$0xff]  }
 0x283   : > { %6643 = vmatpush1.bf16.msra.mxu0 %v11342_v30  ;;  %7258 = vmatpush1.bf16.msra.mxu1 %v11345_v43  ;;  %v11426_v30 = vld [vmem:[%s12806_s15 + $0x1120] ss:$16 sps:$4 sm:$0xff]   ;;  %v11429_v43 = vld [vmem:[%s12806_s15 + $0x1128] ss:$16 sps:$4 sm:$0xff]  }
 0x284   : > { %6644 = vmatprep.subr.bf16.mxu0 %v11350_v44  ;;  %7259 = vmatprep.subr.bf16.mxu1 %v11353_v46  ;;  %v11434_v44 = vld [vmem:[%s12806_s15 + $0x1144] ss:$16 sps:$4 sm:$0xff]   ;;  %v11437_v46 = vld [vmem:[%s12806_s15 + $0x114c] ss:$16 sps:$4 sm:$0xff]  }
 0x287   : > { %6645 = vmatpush1.bf16.msra.mxu0 %v11348_v48  ;;  %7260 = vmatpush1.bf16.msra.mxu1 %v11351_v26  ;;  %v11432_v48 = vld [vmem:[%s12806_s15 + $0x1140] ss:$16 sps:$4 sm:$0xff]   ;;  %v11435_v26 = vld [vmem:[%s12806_s15 + $0x1148] ss:$16 sps:$4 sm:$0xff]  }
 0x288   : > { %6646 = vmatprep.subr.bf16.mxu0 %v11356_v49  ;;  %7261 = vmatprep.subr.bf16.mxu1 %v11359_v50  ;;  %v11440_v49 = vld [vmem:[%s12806_s15 + $0x1164] ss:$16 sps:$4 sm:$0xff]   ;;  %v11443_v50 = vld [vmem:[%s12806_s15 + $0x116c] ss:$16 sps:$4 sm:$0xff]  }
 0x28b   : > { %6647 = vmatpush1.bf16.msra.mxu0 %v11354_v52  ;;  %7262 = vmatpush1.bf16.msra.mxu1 %v11357_v41  ;;  %v11438_v52 = vld [vmem:[%s12806_s15 + $0x1160] ss:$16 sps:$4 sm:$0xff]   ;;  %v11441_v41 = vld [vmem:[%s12806_s15 + $0x1168] ss:$16 sps:$4 sm:$0xff]  }
 0x28c   : > { %6648 = vmatprep.subr.bf16.mxu0 %v11362_v53  ;;  %7263 = vmatprep.subr.bf16.mxu1 %v11365_v55  ;;  %v11446_v53 = vld [vmem:[%s12806_s15 + $0x1184] ss:$16 sps:$4 sm:$0xff]   ;;  %v11449_v55 = vld [vmem:[%s12806_s15 + $0x118c] ss:$16 sps:$4 sm:$0xff]  }
 0x28f   : > { %6649 = vmatpush1.bf16.msra.mxu0 %v11360_v57  ;;  %7264 = vmatpush1.bf16.msra.mxu1 %v11363_v42  ;;  %v11444_v57 = vld [vmem:[%s12806_s15 + $0x1180] ss:$16 sps:$4 sm:$0xff]   ;;  %v11447_v42 = vld [vmem:[%s12806_s15 + $0x1188] ss:$16 sps:$4 sm:$0xff]  }
 0x290   : > { %6650 = vmatprep.subr.bf16.mxu0 %v11368_v60  ;;  %7265 = vmatprep.subr.bf16.mxu1 %v11371_v61  ;;  %v11452_v60 = vld [vmem:[%s12806_s15 + $0x11a4] ss:$16 sps:$4 sm:$0xff]   ;;  %v11455_v61 = vld [vmem:[%s12806_s15 + $0x11ac] ss:$16 sps:$4 sm:$0xff]  }
 0x293   : > { %6651 = vmatpush1.bf16.msra.mxu0 %v11366_v63  ;;  %7266 = vmatpush1.bf16.msra.mxu1 %v11369_v0  ;;  %v11450_v63 = vld [vmem:[%s12806_s15 + $0x11a0] ss:$16 sps:$4 sm:$0xff]   ;;  %v11453_v0 = vld [vmem:[%s12806_s15 + $0x11a8] ss:$16 sps:$4 sm:$0xff]  }
 0x294   : > { %6661 = vmatprep.subr.bf16.mxu0 %v11374_v47  ;;  %7276 = vmatprep.subr.bf16.mxu1 %v11377_v1  ;;  %v11458_v47 = vld [vmem:[%s12806_s15 + $0x11c4] ss:$16 sps:$4 sm:$0xff]   ;;  %v11461_v1 = vld [vmem:[%s12806_s15 + $0x11cc] ss:$16 sps:$4 sm:$0xff]  }
 0x296   : > { %6653 = vmatmul.mubr.bf16.vlgmr.msra.gmra.mrb[0].mxu0 %v1404_v3  ;;  %7268 = vmatmul.mubr.bf16.vlgmr.msra.gmra.mrb[0].mxu1 %v1404_v3  ;;  %v11459_v3 = vld [vmem:[%s12806_s15 + $0x11c8] ss:$16 sps:$4 sm:$0xff]  }
 0x297   : > { %6662 = vmatpush1.bf16.msra.mxu0 %v11372_v58  ;;  %7277 = vmatpush1.bf16.msra.mxu1 %v11375_v4  ;;  %v11464_v58 = vld [vmem:[%s12806_s15 + $0x11e4] ss:$16 sps:$4 sm:$0xff]   ;;  %v11467_v4 = vld [vmem:[%s12806_s15 + $0x11ec] ss:$16 sps:$4 sm:$0xff]  }
 0x298   : > { %6663 = vmatprep.subr.bf16.mxu0 %v11380_v5  ;;  %7278 = vmatprep.subr.bf16.mxu1 %v11383_v6  ;;  %v11462_v5 = vld [vmem:[%s12806_s15 + $0x11e0] ss:$16 sps:$4 sm:$0xff]   ;;  %v11465_v6 = vld [vmem:[%s12806_s15 + $0x11e8] ss:$16 sps:$4 sm:$0xff]  }
 0x299   : > { %6693 = vmatprep.mubr.bf16.mxu0 %v13448_v7  ;;  %7308 = vmatprep.mubr.bf16.mxu1 %v13448_v7 }
 0x29b   : > { %6664 = vmatpush1.bf16.msra.mxu0 %v11378_v59  ;;  %7279 = vmatpush1.bf16.msra.mxu1 %v11381_v8  ;;  %v11470_v59 = vld [vmem:[%s12806_s15 + $0x1204] ss:$16 sps:$4 sm:$0xff]   ;;  %v11473_v8 = vld [vmem:[%s12806_s15 + $0x120c] ss:$16 sps:$4 sm:$0xff]  }
 0x29c   : > { %6665 = vmatprep.subr.bf16.mxu0 %v11386_v9  ;;  %7280 = vmatprep.subr.bf16.mxu1 %v11389_v10  ;;  %v13514_v9 = vrot.slane %v13433_v62, %v12886_v51  ;;  %v11468_v10 = vld [vmem:[%s12806_s15 + $0x1200] ss:$16 sps:$4 sm:$0xff]  }
 0x29d   : > { %v11474_v62 = vld [vmem:[%s12806_s15 + $0x1220] ss:$16 sps:$4 sm:$0xff]  }
 0x29f   : > { %6666 = vmatpush1.bf16.msra.mxu0 %v11384_v11  ;;  %7281 = vmatpush1.bf16.msra.mxu1 %v11387_v12  ;;  %v11471_v11 = vld [vmem:[%s12806_s15 + $0x1208] ss:$16 sps:$4 sm:$0xff]   ;;  %v11476_v12 = vld [vmem:[%s12806_s15 + $0x1224] ss:$16 sps:$4 sm:$0xff]  }
 0x2a0   : > { %6667 = vmatprep.subr.bf16.mxu0 %v11392_v13  ;;  %7282 = vmatprep.subr.bf16.mxu1 %v11395_v14  ;;  %v11479_v13 = vld [vmem:[%s12806_s15 + $0x122c] ss:$16 sps:$4 sm:$0xff]   ;;  %v1454_v14 = vcombine.high %v13448_v7, %v13448_v7  ;;  %v11480_v7 = vld [vmem:[%s12806_s15 + $0x1240] ss:$16 sps:$4 sm:$0xff]  }
 0x2a3   : > { %6668 = vmatpush1.bf16.msra.mxu0 %v11390_v16  ;;  %7283 = vmatpush1.bf16.msra.mxu1 %v11393_v17  ;;  %v11477_v16 = vld [vmem:[%s12806_s15 + $0x1228] ss:$16 sps:$4 sm:$0xff]   ;;  %v11482_v17 = vld [vmem:[%s12806_s15 + $0x1244] ss:$16 sps:$4 sm:$0xff]  }
 0x2a4   : > { %6669 = vmatprep.subr.bf16.mxu0 %v11398_v19  ;;  %7284 = vmatprep.subr.bf16.mxu1 %v11401_v54  ;;  %v11485_v19 = vld [vmem:[%s12806_s15 + $0x124c] ss:$16 sps:$4 sm:$0xff]   ;;  %v11483_v54 = vld [vmem:[%s12806_s15 + $0x1248] ss:$16 sps:$4 sm:$0xff]  }
 0x2a7   : > { %6670 = vmatpush1.bf16.msra.mxu0 %v11396_v20  ;;  %7285 = vmatpush1.bf16.msra.mxu1 %v11399_v21  ;;  %v11488_v20 = vld [vmem:[%s12806_s15 + $0x1264] ss:$16 sps:$4 sm:$0xff]   ;;  %v11491_v21 = vld [vmem:[%s12806_s15 + $0x126c] ss:$16 sps:$4 sm:$0xff]  }
 0x2a8   : > { %6671 = vmatprep.subr.bf16.mxu0 %v11404_v22  ;;  %7286 = vmatprep.subr.bf16.mxu1 %v11407_v23  ;;  %v11486_v22 = vld [vmem:[%s12806_s15 + $0x1260] ss:$16 sps:$4 sm:$0xff]   ;;  %v11489_v23 = vld [vmem:[%s12806_s15 + $0x1268] ss:$16 sps:$4 sm:$0xff]  }
 0x2ab   : > { %6672 = vmatpush1.bf16.msra.mxu0 %v11402_v24  ;;  %7287 = vmatpush1.bf16.msra.mxu1 %v11405_v25  ;;  %v11494_v24 = vld [vmem:[%s12806_s15 + $0x1284] ss:$16 sps:$4 sm:$0xff]   ;;  %v11497_v25 = vld [vmem:[%s12806_s15 + $0x128c] ss:$16 sps:$4 sm:$0xff]  }
 0x2ac   : > { %6673 = vmatprep.subr.bf16.mxu0 %v11410_v27  ;;  %7288 = vmatprep.subr.bf16.mxu1 %v11413_v29  ;;  %v11492_v27 = vld [vmem:[%s12806_s15 + $0x1280] ss:$16 sps:$4 sm:$0xff]   ;;  %v11495_v29 = vld [vmem:[%s12806_s15 + $0x1288] ss:$16 sps:$4 sm:$0xff]  }
 0x2af   : > { %6674 = vmatpush1.bf16.msra.mxu0 %v11408_v15  ;;  %7289 = vmatpush1.bf16.msra.mxu1 %v11411_v31  ;;  %v11500_v15 = vld [vmem:[%s12806_s15 + $0x12a4] ss:$16 sps:$4 sm:$0xff]   ;;  %v11503_v31 = vld [vmem:[%s12806_s15 + $0x12ac] ss:$16 sps:$4 sm:$0xff]  }
 0x2b0   : > { %6675 = vmatprep.subr.bf16.mxu0 %v11416_v32  ;;  %7290 = vmatprep.subr.bf16.mxu1 %v11419_v33  ;;  %v11498_v32 = vld [vmem:[%s12806_s15 + $0x12a0] ss:$16 sps:$4 sm:$0xff]   ;;  %v11501_v33 = vld [vmem:[%s12806_s15 + $0x12a8] ss:$16 sps:$4 sm:$0xff]  }
 0x2b3   : > { %6676 = vmatpush1.bf16.msra.mxu0 %v11414_v34  ;;  %7291 = vmatpush1.bf16.msra.mxu1 %v11417_v18  ;;  %v11506_v34 = vld [vmem:[%s12806_s15 + $0x12c4] ss:$16 sps:$4 sm:$0xff]   ;;  %v11509_v18 = vld [vmem:[%s12806_s15 + $0x12cc] ss:$16 sps:$4 sm:$0xff]  }
 0x2b4   : > { %6677 = vmatprep.subr.bf16.mxu0 %v11422_v35  ;;  %7292 = vmatprep.subr.bf16.mxu1 %v11425_v36  ;;  %v11504_v35 = vld [vmem:[%s12806_s15 + $0x12c0] ss:$16 sps:$4 sm:$0xff]   ;;  %v11507_v36 = vld [vmem:[%s12806_s15 + $0x12c8] ss:$16 sps:$4 sm:$0xff]  }
 0x2b7   : > { %6678 = vmatpush1.bf16.msra.mxu0 %v11420_v37  ;;  %7293 = vmatpush1.bf16.msra.mxu1 %v11423_v28  ;;  %v11512_v37 = vld [vmem:[%s12806_s15 + $0x12e4] ss:$16 sps:$4 sm:$0xff]   ;;  %v11515_v28 = vld [vmem:[%s12806_s15 + $0x12ec] ss:$16 sps:$4 sm:$0xff]  }
 0x2b8   : > { %6679 = vmatprep.subr.bf16.mxu0 %v11428_v38  ;;  %7294 = vmatprep.subr.bf16.mxu1 %v11431_v39  ;;  %v11510_v38 = vld [vmem:[%s12806_s15 + $0x12e0] ss:$16 sps:$4 sm:$0xff]   ;;  %v11513_v39 = vld [vmem:[%s12806_s15 + $0x12e8] ss:$16 sps:$4 sm:$0xff]  }
 0x2bb   : > { %6680 = vmatpush1.bf16.msra.mxu0 %v11426_v30  ;;  %7295 = vmatpush1.bf16.msra.mxu1 %v11429_v43  ;;  %v11518_v30 = vld [vmem:[%s12806_s15 + $0x1304] ss:$16 sps:$4 sm:$0xff]   ;;  %v11521_v43 = vld [vmem:[%s12806_s15 + $0x130c] ss:$16 sps:$4 sm:$0xff]  }
 0x2bc   : > { %6681 = vmatprep.subr.bf16.mxu0 %v11434_v44  ;;  %7296 = vmatprep.subr.bf16.mxu1 %v11437_v46  ;;  %v11516_v44 = vld [vmem:[%s12806_s15 + $0x1300] ss:$16 sps:$4 sm:$0xff]   ;;  %v11519_v46 = vld [vmem:[%s12806_s15 + $0x1308] ss:$16 sps:$4 sm:$0xff]  }
 0x2bf   : > { %6682 = vmatpush1.bf16.msra.mxu0 %v11432_v48  ;;  %7297 = vmatpush1.bf16.msra.mxu1 %v11435_v26  ;;  %v11524_v48 = vld [vmem:[%s12806_s15 + $0x1324] ss:$16 sps:$4 sm:$0xff]   ;;  %v11527_v26 = vld [vmem:[%s12806_s15 + $0x132c] ss:$16 sps:$4 sm:$0xff]  }
 0x2c0   : > { %6683 = vmatprep.subr.bf16.mxu0 %v11440_v49  ;;  %7298 = vmatprep.subr.bf16.mxu1 %v11443_v50  ;;  %v11522_v49 = vld [vmem:[%s12806_s15 + $0x1320] ss:$16 sps:$4 sm:$0xff]   ;;  %v11525_v50 = vld [vmem:[%s12806_s15 + $0x1328] ss:$16 sps:$4 sm:$0xff]  }
 0x2c3   : > { %6684 = vmatpush1.bf16.msra.mxu0 %v11438_v52  ;;  %7299 = vmatpush1.bf16.msra.mxu1 %v11441_v41  ;;  %v11530_v52 = vld [vmem:[%s12806_s15 + $0x1344] ss:$16 sps:$4 sm:$0xff]   ;;  %v11533_v41 = vld [vmem:[%s12806_s15 + $0x134c] ss:$16 sps:$4 sm:$0xff]  }
 0x2c4   : > { %6685 = vmatprep.subr.bf16.mxu0 %v11446_v53  ;;  %7300 = vmatprep.subr.bf16.mxu1 %v11449_v55  ;;  %v11528_v53 = vld [vmem:[%s12806_s15 + $0x1340] ss:$16 sps:$4 sm:$0xff]   ;;  %v11531_v55 = vld [vmem:[%s12806_s15 + $0x1348] ss:$16 sps:$4 sm:$0xff]  }
 0x2c7   : > { %6686 = vmatpush1.bf16.msra.mxu0 %v11444_v57  ;;  %7301 = vmatpush1.bf16.msra.mxu1 %v11447_v42  ;;  %v11536_v57 = vld [vmem:[%s12806_s15 + $0x1364] ss:$16 sps:$4 sm:$0xff]   ;;  %v11539_v42 = vld [vmem:[%s12806_s15 + $0x136c] ss:$16 sps:$4 sm:$0xff]  }
 0x2c8   : > { %6687 = vmatprep.subr.bf16.mxu0 %v11452_v60  ;;  %7302 = vmatprep.subr.bf16.mxu1 %v11455_v61  ;;  %v11534_v60 = vld [vmem:[%s12806_s15 + $0x1360] ss:$16 sps:$4 sm:$0xff]   ;;  %v11537_v61 = vld [vmem:[%s12806_s15 + $0x1368] ss:$16 sps:$4 sm:$0xff]  }
 0x2cb   : > { %6688 = vmatpush1.bf16.msra.mxu0 %v11450_v63  ;;  %7303 = vmatpush1.bf16.msra.mxu1 %v11453_v0  ;;  %v11542_v63 = vld [vmem:[%s12806_s15 + $0x1384] ss:$16 sps:$4 sm:$0xff]   ;;  %v11545_v0 = vld [vmem:[%s12806_s15 + $0x138c] ss:$16 sps:$4 sm:$0xff]  }
 0x2cc   : > { %6689 = vmatprep.subr.bf16.mxu0 %v11458_v47  ;;  %7304 = vmatprep.subr.bf16.mxu1 %v11461_v1  ;;  %v11540_v47 = vld [vmem:[%s12806_s15 + $0x1380] ss:$16 sps:$4 sm:$0xff]   ;;  %v11543_v1 = vld [vmem:[%s12806_s15 + $0x1388] ss:$16 sps:$4 sm:$0xff]  }
 0x2cf   : > { %6690 = vmatpush1.bf16.msra.mxu0 %v11456_v2  ;;  %7305 = vmatpush1.bf16.msra.mxu1 %v11459_v3  ;;  %v11548_v2 = vld [vmem:[%s12806_s15 + $0x13a4] ss:$16 sps:$4 sm:$0xff]   ;;  %v11551_v3 = vld [vmem:[%s12806_s15 + $0x13ac] ss:$16 sps:$4 sm:$0xff]  }
 0x2d0   : > { %6691 = vmatprep.subr.bf16.mxu0 %v11464_v58  ;;  %7306 = vmatprep.subr.bf16.mxu1 %v11467_v4  ;;  %v11546_v58 = vld [vmem:[%s12806_s15 + $0x13a0] ss:$16 sps:$4 sm:$0xff]   ;;  %v11549_v4 = vld [vmem:[%s12806_s15 + $0x13a8] ss:$16 sps:$4 sm:$0xff]  }
 0x2d3   : > { %6692 = vmatpush1.bf16.msra.mxu0 %v11462_v5  ;;  %7307 = vmatpush1.bf16.msra.mxu1 %v11465_v6  ;;  %v11554_v5 = vld [vmem:[%s12806_s15 + $0x13c4] ss:$16 sps:$4 sm:$0xff]   ;;  %v11557_v6 = vld [vmem:[%s12806_s15 + $0x13cc] ss:$16 sps:$4 sm:$0xff]  }
 0x2d4   : > { %6702 = vmatprep.subr.bf16.mxu0 %v11470_v59  ;;  %7317 = vmatprep.subr.bf16.mxu1 %v11473_v8  ;;  %v1407_v59 = vcombine.high %v13425_v56, %v13425_v56  ;;  %v11552_v8 = vld [vmem:[%s12806_s15 + $0x13c0] ss:$16 sps:$4 sm:$0xff]  }
 0x2d5   : > { %v11558_v56 = vld [vmem:[%s12806_s15 + $0x13e0] ss:$16 sps:$4 sm:$0xff]  }
 0x2d6   : > { %6694 = vmatmul.mubr.bf16.vlgmr.msra.gmra.mrb[0].mxu0 %v13514_v9  ;;  %7309 = vmatmul.mubr.bf16.vlgmr.msra.gmra.mrb[0].mxu1 %v13514_v9 }
 0x2d7   : > { %6703 = vmatpush1.bf16.msra.mxu0 %v11468_v10  ;;  %7318 = vmatpush1.bf16.msra.mxu1 %v11471_v11  ;;  %v11555_v10 = vld [vmem:[%s12806_s15 + $0x13c8] ss:$16 sps:$4 sm:$0xff]   ;;  %v11560_v11 = vld [vmem:[%s12806_s15 + $0x13e4] ss:$16 sps:$4 sm:$0xff]  }
 0x2d8   : > { %6704 = vmatprep.subr.bf16.mxu0 %v11476_v12  ;;  %7319 = vmatprep.subr.bf16.mxu1 %v11479_v13  ;;  %v11563_v12 = vld [vmem:[%s12806_s15 + $0x13ec] ss:$16 sps:$4 sm:$0xff]   ;;  %v13583_v13 = vrot.slane %v1407_v59, %v12886_v51  ;;  %v11636_v59 = vld [vmem:[%s12806_s15 + $0x1580] ss:$16 sps:$4 sm:$0xff]  }
 0x2d9   : > { %6734 = vmatprep.mubr.bf16.mxu0 %v1454_v14  ;;  %7349 = vmatprep.mubr.bf16.mxu1 %v1454_v14  ;;  %v11561_v14 = vld [vmem:[%s12806_s15 + $0x13e8] ss:$16 sps:$4 sm:$0xff]  }
 0x2db   : > { %6705 = vmatpush1.bf16.msra.mxu0 %v11474_v62  ;;  %7320 = vmatpush1.bf16.msra.mxu1 %v11477_v16  ;;  %v11566_v62 = vld [vmem:[%s12806_s15 + $0x1404] ss:$16 sps:$4 sm:$0xff]   ;;  %v11569_v16 = vld [vmem:[%s12806_s15 + $0x140c] ss:$16 sps:$4 sm:$0xff]  }
 0x2dc   : > { %6706 = vmatprep.subr.bf16.mxu0 %v11482_v17  ;;  %7321 = vmatprep.subr.bf16.mxu1 %v11485_v19  ;;  %v1423_v17 = vcombine.high %v13583_v13, %v13583_v13  ;;  %v1452_v19 = vcombine.high %v13514_v9, %v13514_v9  ;;  %v11570_v9 = vld [vmem:[%s12806_s15 + $0x1420] ss:$16 sps:$4 sm:$0xff]  }
 0x2df   : > { %6707 = vmatpush1.bf16.msra.mxu0 %v11480_v7  ;;  %7322 = vmatpush1.bf16.msra.mxu1 %v11483_v54  ;;  %v11564_v7 = vld [vmem:[%s12806_s15 + $0x1400] ss:$16 sps:$4 sm:$0xff]   ;;  %v11567_v54 = vld [vmem:[%s12806_s15 + $0x1408] ss:$16 sps:$4 sm:$0xff]  }
 0x2e0   : > { %6708 = vmatprep.subr.bf16.mxu0 %v11488_v20  ;;  %7323 = vmatprep.subr.bf16.mxu1 %v11491_v21  ;;  %v11572_v20 = vld [vmem:[%s12806_s15 + $0x1424] ss:$16 sps:$4 sm:$0xff]   ;;  %v11575_v21 = vld [vmem:[%s12806_s15 + $0x142c] ss:$16 sps:$4 sm:$0xff]  }
 0x2e3   : > { %6709 = vmatpush1.bf16.msra.mxu0 %v11486_v22  ;;  %7324 = vmatpush1.bf16.msra.mxu1 %v11489_v23  ;;  %v13598_v22 = vrot.slane %v1423_v17, %v12886_v51  ;;  %v11573_v23 = vld [vmem:[%s12806_s15 + $0x1428] ss:$16 sps:$4 sm:$0xff]  }
 0x2e4   : > { %6710 = vmatprep.subr.bf16.mxu0 %v11494_v24  ;;  %7325 = vmatprep.subr.bf16.mxu1 %v11497_v25  ;;  %v11578_v24 = vld [vmem:[%s12806_s15 + $0x1444] ss:$16 sps:$4 sm:$0xff]   ;;  %v11581_v25 = vld [vmem:[%s12806_s15 + $0x144c] ss:$16 sps:$4 sm:$0xff]   ;;  %v11651_v17 = vld [vmem:[%s12806_s15 + $0x15c8] ss:$16 sps:$4 sm:$0xff]  }
 0x2e7   : > { %6711 = vmatpush1.bf16.msra.mxu0 %v11492_v27  ;;  %7326 = vmatpush1.bf16.msra.mxu1 %v11495_v29  ;;  %v11576_v27 = vld [vmem:[%s12806_s15 + $0x1440] ss:$16 sps:$4 sm:$0xff]   ;;  %v11579_v29 = vld [vmem:[%s12806_s15 + $0x1448] ss:$16 sps:$4 sm:$0xff]  }
 0x2e8   : > { %6712 = vmatprep.subr.bf16.mxu0 %v11500_v15  ;;  %7327 = vmatprep.subr.bf16.mxu1 %v11503_v31  ;;  %v11584_v15 = vld [vmem:[%s12806_s15 + $0x1464] ss:$16 sps:$4 sm:$0xff]   ;;  %v11587_v31 = vld [vmem:[%s12806_s15 + $0x146c] ss:$16 sps:$4 sm:$0xff]  }
 0x2eb   : > { %6713 = vmatpush1.bf16.msra.mxu0 %v11498_v32  ;;  %7328 = vmatpush1.bf16.msra.mxu1 %v11501_v33  ;;  %v11582_v32 = vld [vmem:[%s12806_s15 + $0x1460] ss:$16 sps:$4 sm:$0xff]   ;;  %v11585_v33 = vld [vmem:[%s12806_s15 + $0x1468] ss:$16 sps:$4 sm:$0xff]  }
 0x2ec   : > { %6714 = vmatprep.subr.bf16.mxu0 %v11506_v34  ;;  %7329 = vmatprep.subr.bf16.mxu1 %v11509_v18  ;;  %v11590_v34 = vld [vmem:[%s12806_s15 + $0x1484] ss:$16 sps:$4 sm:$0xff]   ;;  %v11593_v18 = vld [vmem:[%s12806_s15 + $0x148c] ss:$16 sps:$4 sm:$0xff]  }
 0x2ef   : > { %6715 = vmatpush1.bf16.msra.mxu0 %v11504_v35  ;;  %7330 = vmatpush1.bf16.msra.mxu1 %v11507_v36  ;;  %v11588_v35 = vld [vmem:[%s12806_s15 + $0x1480] ss:$16 sps:$4 sm:$0xff]   ;;  %v11591_v36 = vld [vmem:[%s12806_s15 + $0x1488] ss:$16 sps:$4 sm:$0xff]  }
 0x2f0   : > { %6716 = vmatprep.subr.bf16.mxu0 %v11512_v37  ;;  %7331 = vmatprep.subr.bf16.mxu1 %v11515_v28  ;;  %v11596_v37 = vld [vmem:[%s12806_s15 + $0x14a4] ss:$16 sps:$4 sm:$0xff]   ;;  %v11599_v28 = vld [vmem:[%s12806_s15 + $0x14ac] ss:$16 sps:$4 sm:$0xff]  }
 0x2f3   : > { %6717 = vmatpush1.bf16.msra.mxu0 %v11510_v38  ;;  %7332 = vmatpush1.bf16.msra.mxu1 %v11513_v39  ;;  %v11594_v38 = vld [vmem:[%s12806_s15 + $0x14a0] ss:$16 sps:$4 sm:$0xff]   ;;  %v11597_v39 = vld [vmem:[%s12806_s15 + $0x14a8] ss:$16 sps:$4 sm:$0xff]  }
 0x2f4   : > { %6718 = vmatprep.subr.bf16.mxu0 %v11518_v30  ;;  %7333 = vmatprep.subr.bf16.mxu1 %v11521_v43  ;;  %v11602_v30 = vld [vmem:[%s12806_s15 + $0x14c4] ss:$16 sps:$4 sm:$0xff]   ;;  %v11605_v43 = vld [vmem:[%s12806_s15 + $0x14cc] ss:$16 sps:$4 sm:$0xff]  }
 0x2f7   : > { %6719 = vmatpush1.bf16.msra.mxu0 %v11516_v44  ;;  %7334 = vmatpush1.bf16.msra.mxu1 %v11519_v46  ;;  %v11600_v44 = vld [vmem:[%s12806_s15 + $0x14c0] ss:$16 sps:$4 sm:$0xff]   ;;  %v11603_v46 = vld [vmem:[%s12806_s15 + $0x14c8] ss:$16 sps:$4 sm:$0xff]  }
 0x2f8   : > { %6720 = vmatprep.subr.bf16.mxu0 %v11524_v48  ;;  %7335 = vmatprep.subr.bf16.mxu1 %v11527_v26  ;;  %v11608_v48 = vld [vmem:[%s12806_s15 + $0x14e4] ss:$16 sps:$4 sm:$0xff]   ;;  %v11611_v26 = vld [vmem:[%s12806_s15 + $0x14ec] ss:$16 sps:$4 sm:$0xff]  }
 0x2fb   : > { %6721 = vmatpush1.bf16.msra.mxu0 %v11522_v49  ;;  %7336 = vmatpush1.bf16.msra.mxu1 %v11525_v50  ;;  %v11606_v49 = vld [vmem:[%s12806_s15 + $0x14e0] ss:$16 sps:$4 sm:$0xff]   ;;  %v11609_v50 = vld [vmem:[%s12806_s15 + $0x14e8] ss:$16 sps:$4 sm:$0xff]  }
 0x2fc   : > { %6722 = vmatprep.subr.bf16.mxu0 %v11530_v52  ;;  %7337 = vmatprep.subr.bf16.mxu1 %v11533_v41  ;;  %v11614_v52 = vld [vmem:[%s12806_s15 + $0x1504] ss:$16 sps:$4 sm:$0xff]   ;;  %v11617_v41 = vld [vmem:[%s12806_s15 + $0x150c] ss:$16 sps:$4 sm:$0xff]  }
 0x2ff   : > { %6723 = vmatpush1.bf16.msra.mxu0 %v11528_v53  ;;  %7338 = vmatpush1.bf16.msra.mxu1 %v11531_v55  ;;  %v11612_v53 = vld [vmem:[%s12806_s15 + $0x1500] ss:$16 sps:$4 sm:$0xff]   ;;  %v11615_v55 = vld [vmem:[%s12806_s15 + $0x1508] ss:$16 sps:$4 sm:$0xff]  }
 0x300   : > { %6724 = vmatprep.subr.bf16.mxu0 %v11536_v57  ;;  %7339 = vmatprep.subr.bf16.mxu1 %v11539_v42  ;;  %v11620_v57 = vld [vmem:[%s12806_s15 + $0x1524] ss:$16 sps:$4 sm:$0xff]   ;;  %v11623_v42 = vld [vmem:[%s12806_s15 + $0x152c] ss:$16 sps:$4 sm:$0xff]  }
 0x303   : > { %6725 = vmatpush1.bf16.msra.mxu0 %v11534_v60  ;;  %7340 = vmatpush1.bf16.msra.mxu1 %v11537_v61  ;;  %v11618_v60 = vld [vmem:[%s12806_s15 + $0x1520] ss:$16 sps:$4 sm:$0xff]   ;;  %v11621_v61 = vld [vmem:[%s12806_s15 + $0x1528] ss:$16 sps:$4 sm:$0xff]  }
 0x304   : > { %6726 = vmatprep.subr.bf16.mxu0 %v11542_v63  ;;  %7341 = vmatprep.subr.bf16.mxu1 %v11545_v0  ;;  %v11626_v63 = vld [vmem:[%s12806_s15 + $0x1544] ss:$16 sps:$4 sm:$0xff]   ;;  %v11629_v0 = vld [vmem:[%s12806_s15 + $0x154c] ss:$16 sps:$4 sm:$0xff]  }
 0x307   : > { %6727 = vmatpush1.bf16.msra.mxu0 %v11540_v47  ;;  %7342 = vmatpush1.bf16.msra.mxu1 %v11543_v1  ;;  %v11624_v47 = vld [vmem:[%s12806_s15 + $0x1540] ss:$16 sps:$4 sm:$0xff]   ;;  %v11627_v1 = vld [vmem:[%s12806_s15 + $0x1548] ss:$16 sps:$4 sm:$0xff]  }
 0x308   : > { %6728 = vmatprep.subr.bf16.mxu0 %v11548_v2  ;;  %7343 = vmatprep.subr.bf16.mxu1 %v11551_v3  ;;  %v11632_v2 = vld [vmem:[%s12806_s15 + $0x1564] ss:$16 sps:$4 sm:$0xff]   ;;  %v11635_v3 = vld [vmem:[%s12806_s15 + $0x156c] ss:$16 sps:$4 sm:$0xff]  }
 0x30b   : > { %6729 = vmatpush1.bf16.msra.mxu0 %v11546_v58  ;;  %7344 = vmatpush1.bf16.msra.mxu1 %v11549_v4  ;;  %v11630_v58 = vld [vmem:[%s12806_s15 + $0x1560] ss:$16 sps:$4 sm:$0xff]   ;;  %v11633_v4 = vld [vmem:[%s12806_s15 + $0x1568] ss:$16 sps:$4 sm:$0xff]  }
 0x30c   : > { %6730 = vmatprep.subr.bf16.mxu0 %v11554_v5  ;;  %7345 = vmatprep.subr.bf16.mxu1 %v11557_v6  ;;  %v11638_v5 = vld [vmem:[%s12806_s15 + $0x1584] ss:$16 sps:$4 sm:$0xff]   ;;  %v11641_v6 = vld [vmem:[%s12806_s15 + $0x158c] ss:$16 sps:$4 sm:$0xff]  }
 0x30f   : > { %6731 = vmatpush1.bf16.msra.mxu0 %v11552_v8  ;;  %7346 = vmatpush1.bf16.msra.mxu1 %v11555_v10  ;;  %v11639_v8 = vld [vmem:[%s12806_s15 + $0x1588] ss:$16 sps:$4 sm:$0xff]   ;;  %v11644_v10 = vld [vmem:[%s12806_s15 + $0x15a4] ss:$16 sps:$4 sm:$0xff]  }
 0x310   : > { %6732 = vmatprep.subr.bf16.mxu0 %v11560_v11  ;;  %7347 = vmatprep.subr.bf16.mxu1 %v11563_v12  ;;  %v11647_v11 = vld [vmem:[%s12806_s15 + $0x15ac] ss:$16 sps:$4 sm:$0xff]   ;;  %v11642_v12 = vld [vmem:[%s12806_s15 + $0x15a0] ss:$16 sps:$4 sm:$0xff]  }
 0x313   : > { %6733 = vmatpush1.bf16.msra.mxu0 %v11558_v56  ;;  %7348 = vmatpush1.bf16.msra.mxu1 %v11561_v14  ;;  %v11645_v56 = vld [vmem:[%s12806_s15 + $0x15a8] ss:$16 sps:$4 sm:$0xff]   ;;  %v11650_v14 = vld [vmem:[%s12806_s15 + $0x15c4] ss:$16 sps:$4 sm:$0xff]  }
 0x314   : > { %6743 = vmatprep.subr.bf16.mxu0 %v11566_v62  ;;  %7358 = vmatprep.subr.bf16.mxu1 %v11569_v16  ;;  %v11653_v62 = vld [vmem:[%s12806_s15 + $0x15cc] ss:$16 sps:$4 sm:$0xff]   ;;  %v11648_v16 = vld [vmem:[%s12806_s15 + $0x15c0] ss:$16 sps:$4 sm:$0xff]  }
 0x316   : > { %6735 = vmatmul.mubr.bf16.vlgmr.msra.gmra.mrb[0].mxu0 %v1452_v19  ;;  %7350 = vmatmul.mubr.bf16.vlgmr.msra.gmra.mrb[0].mxu1 %v1452_v19  ;;  %v11656_v19 = vld [vmem:[%s12806_s15 + $0x15e4] ss:$16 sps:$4 sm:$0xff]  }
 0x317   : > { %6744 = vmatpush1.bf16.msra.mxu0 %v11564_v7  ;;  %7359 = vmatpush1.bf16.msra.mxu1 %v11567_v54  ;;  %v11659_v7 = vld [vmem:[%s12806_s15 + $0x15ec] ss:$16 sps:$4 sm:$0xff]   ;;  %v11654_v54 = vld [vmem:[%s12806_s15 + $0x15e0] ss:$16 sps:$4 sm:$0xff]  }
 0x318   : > { %6745 = vmatprep.subr.bf16.mxu0 %v11572_v20  ;;  %7360 = vmatprep.subr.bf16.mxu1 %v11575_v21  ;;  %v11657_v20 = vld [vmem:[%s12806_s15 + $0x15e8] ss:$16 sps:$4 sm:$0xff]   ;;  %v11663_v21 = vld [vmem:[%s12806_s15 + $0x1604] ss:$16 sps:$4 sm:$0xff]  }
 0x319   : > { %6775 = vmatprep.mubr.bf16.mxu0 %v13598_v22  ;;  %7390 = vmatprep.mubr.bf16.mxu1 %v13598_v22 }
 0x31b   : > { %6746 = vmatpush1.bf16.msra.mxu0 %v11570_v9  ;;  %7361 = vmatpush1.bf16.msra.mxu1 %v11573_v23  ;;  %v11666_v9 = vld [vmem:[%s12806_s15 + $0x160c] ss:$16 sps:$4 sm:$0xff]   ;;  %v13664_v23 = vrot.slane %v13583_v13, %v12886_v51  ;;  %v11667_v13 = vld [vmem:[%s12806_s15 + $0x1620] ss:$16 sps:$4 sm:$0xff]  }
 0x31c   : > { %6747 = vmatprep.subr.bf16.mxu0 %v11578_v24  ;;  %7362 = vmatprep.subr.bf16.mxu1 %v11581_v25  ;;  %v11661_v24 = vld [vmem:[%s12806_s15 + $0x1600] ss:$16 sps:$4 sm:$0xff]   ;;  %v11664_v25 = vld [vmem:[%s12806_s15 + $0x1608] ss:$16 sps:$4 sm:$0xff]  }
 0x31f   : > { %6748 = vmatpush1.bf16.msra.mxu0 %v11576_v27  ;;  %7363 = vmatpush1.bf16.msra.mxu1 %v11579_v29  ;;  %v11669_v27 = vld [vmem:[%s12806_s15 + $0x1624] ss:$16 sps:$4 sm:$0xff]   ;;  %v11672_v29 = vld [vmem:[%s12806_s15 + $0x162c] ss:$16 sps:$4 sm:$0xff]  }
 0x320   : > { %6749 = vmatprep.subr.bf16.mxu0 %v11584_v15  ;;  %7364 = vmatprep.subr.bf16.mxu1 %v11587_v31  ;;  %v1455_v15 = vcombine.high %v13598_v22, %v13598_v22  ;;  %v11670_v31 = vld [vmem:[%s12806_s15 + $0x1628] ss:$16 sps:$4 sm:$0xff]   ;;  %v11673_v22 = vld [vmem:[%s12806_s15 + $0x1640] ss:$16 sps:$4 sm:$0xff]  }
 0x323   : > { %6750 = vmatpush1.bf16.msra.mxu0 %v11582_v32  ;;  %7365 = vmatpush1.bf16.msra.mxu1 %v11585_v33  ;;  %v11675_v32 = vld [vmem:[%s12806_s15 + $0x1644] ss:$16 sps:$4 sm:$0xff]   ;;  %v11678_v33 = vld [vmem:[%s12806_s15 + $0x164c] ss:$16 sps:$4 sm:$0xff]  }
 0x324   : > { %6751 = vmatprep.subr.bf16.mxu0 %v11590_v34  ;;  %7366 = vmatprep.subr.bf16.mxu1 %v11593_v18  ;;  %v11676_v34 = vld [vmem:[%s12806_s15 + $0x1648] ss:$16 sps:$4 sm:$0xff]   ;;  %v11681_v18 = vld [vmem:[%s12806_s15 + $0x1664] ss:$16 sps:$4 sm:$0xff]  }
 0x327   : > { %6752 = vmatpush1.bf16.msra.mxu0 %v11588_v35  ;;  %7367 = vmatpush1.bf16.msra.mxu1 %v11591_v36  ;;  %v11684_v35 = vld [vmem:[%s12806_s15 + $0x166c] ss:$16 sps:$4 sm:$0xff]   ;;  %v11679_v36 = vld [vmem:[%s12806_s15 + $0x1660] ss:$16 sps:$4 sm:$0xff]  }
 0x328   : > { %6753 = vmatprep.subr.bf16.mxu0 %v11596_v37  ;;  %7368 = vmatprep.subr.bf16.mxu1 %v11599_v28  ;;  %v11682_v37 = vld [vmem:[%s12806_s15 + $0x1668] ss:$16 sps:$4 sm:$0xff]   ;;  %v11687_v28 = vld [vmem:[%s12806_s15 + $0x1684] ss:$16 sps:$4 sm:$0xff]  }
 0x32b   : > { %6754 = vmatpush1.bf16.msra.mxu0 %v11594_v38  ;;  %7369 = vmatpush1.bf16.msra.mxu1 %v11597_v39  ;;  %v11690_v38 = vld [vmem:[%s12806_s15 + $0x168c] ss:$16 sps:$4 sm:$0xff]   ;;  %v11685_v39 = vld [vmem:[%s12806_s15 + $0x1680] ss:$16 sps:$4 sm:$0xff]  }
 0x32c   : > { %6755 = vmatprep.subr.bf16.mxu0 %v11602_v30  ;;  %7370 = vmatprep.subr.bf16.mxu1 %v11605_v43  ;;  %v11688_v30 = vld [vmem:[%s12806_s15 + $0x1688] ss:$16 sps:$4 sm:$0xff]   ;;  %v11693_v43 = vld [vmem:[%s12806_s15 + $0x16a4] ss:$16 sps:$4 sm:$0xff]  }
 0x32f   : > { %6756 = vmatpush1.bf16.msra.mxu0 %v11600_v44  ;;  %7371 = vmatpush1.bf16.msra.mxu1 %v11603_v46  ;;  %v11696_v44 = vld [vmem:[%s12806_s15 + $0x16ac] ss:$16 sps:$4 sm:$0xff]   ;;  %v11691_v46 = vld [vmem:[%s12806_s15 + $0x16a0] ss:$16 sps:$4 sm:$0xff]  }
 0x330   : > { %6757 = vmatprep.subr.bf16.mxu0 %v11608_v48  ;;  %7372 = vmatprep.subr.bf16.mxu1 %v11611_v26  ;;  %v11694_v48 = vld [vmem:[%s12806_s15 + $0x16a8] ss:$16 sps:$4 sm:$0xff]   ;;  %v11699_v26 = vld [vmem:[%s12806_s15 + $0x16c4] ss:$16 sps:$4 sm:$0xff]  }
 0x333   : > { %6758 = vmatpush1.bf16.msra.mxu0 %v11606_v49  ;;  %7373 = vmatpush1.bf16.msra.mxu1 %v11609_v50  ;;  %v11702_v49 = vld [vmem:[%s12806_s15 + $0x16cc] ss:$16 sps:$4 sm:$0xff]   ;;  %v11697_v50 = vld [vmem:[%s12806_s15 + $0x16c0] ss:$16 sps:$4 sm:$0xff]  }
 0x334   : > { %6759 = vmatprep.subr.bf16.mxu0 %v11614_v52  ;;  %7374 = vmatprep.subr.bf16.mxu1 %v11617_v41  ;;  %v11700_v52 = vld [vmem:[%s12806_s15 + $0x16c8] ss:$16 sps:$4 sm:$0xff]   ;;  %v11705_v41 = vld [vmem:[%s12806_s15 + $0x16e4] ss:$16 sps:$4 sm:$0xff]  }
 0x337   : > { %6760 = vmatpush1.bf16.msra.mxu0 %v11612_v53  ;;  %7375 = vmatpush1.bf16.msra.mxu1 %v11615_v55  ;;  %v11708_v53 = vld [vmem:[%s12806_s15 + $0x16ec] ss:$16 sps:$4 sm:$0xff]   ;;  %v11703_v55 = vld [vmem:[%s12806_s15 + $0x16e0] ss:$16 sps:$4 sm:$0xff]  }
 0x338   : > { %6761 = vmatprep.subr.bf16.mxu0 %v11620_v57  ;;  %7376 = vmatprep.subr.bf16.mxu1 %v11623_v42  ;;  %v11706_v57 = vld [vmem:[%s12806_s15 + $0x16e8] ss:$16 sps:$4 sm:$0xff]   ;;  %v11711_v42 = vld [vmem:[%s12806_s15 + $0x1704] ss:$16 sps:$4 sm:$0xff]  }
 0x33b   : > { %6762 = vmatpush1.bf16.msra.mxu0 %v11618_v60  ;;  %7377 = vmatpush1.bf16.msra.mxu1 %v11621_v61  ;;  %v11714_v60 = vld [vmem:[%s12806_s15 + $0x170c] ss:$16 sps:$4 sm:$0xff]   ;;  %v11709_v61 = vld [vmem:[%s12806_s15 + $0x1700] ss:$16 sps:$4 sm:$0xff]  }
 0x33c   : > { %6763 = vmatprep.subr.bf16.mxu0 %v11626_v63  ;;  %7378 = vmatprep.subr.bf16.mxu1 %v11629_v0  ;;  %v11712_v63 = vld [vmem:[%s12806_s15 + $0x1708] ss:$16 sps:$4 sm:$0xff]   ;;  %v11717_v0 = vld [vmem:[%s12806_s15 + $0x1724] ss:$16 sps:$4 sm:$0xff]  }
 0x33f   : > { %6764 = vmatpush1.bf16.msra.mxu0 %v11624_v47  ;;  %7379 = vmatpush1.bf16.msra.mxu1 %v11627_v1  ;;  %v11720_v47 = vld [vmem:[%s12806_s15 + $0x172c] ss:$16 sps:$4 sm:$0xff]   ;;  %v11715_v1 = vld [vmem:[%s12806_s15 + $0x1720] ss:$16 sps:$4 sm:$0xff]  }
 0x340   : > { %6765 = vmatprep.subr.bf16.mxu0 %v11632_v2  ;;  %7380 = vmatprep.subr.bf16.mxu1 %v11635_v3  ;;  %v11718_v2 = vld [vmem:[%s12806_s15 + $0x1728] ss:$16 sps:$4 sm:$0xff]   ;;  %v11723_v3 = vld [vmem:[%s12806_s15 + $0x1744] ss:$16 sps:$4 sm:$0xff]  }
 0x343   : > { %6766 = vmatpush1.bf16.msra.mxu0 %v11630_v58  ;;  %7381 = vmatpush1.bf16.msra.mxu1 %v11633_v4  ;;  %v11726_v58 = vld [vmem:[%s12806_s15 + $0x174c] ss:$16 sps:$4 sm:$0xff]   ;;  %v11721_v4 = vld [vmem:[%s12806_s15 + $0x1740] ss:$16 sps:$4 sm:$0xff]  }
 0x344   : > { %6767 = vmatprep.subr.bf16.mxu0 %v11638_v5  ;;  %7382 = vmatprep.subr.bf16.mxu1 %v11641_v6  ;;  %v11724_v5 = vld [vmem:[%s12806_s15 + $0x1748] ss:$16 sps:$4 sm:$0xff]   ;;  %v11729_v6 = vld [vmem:[%s12806_s15 + $0x1764] ss:$16 sps:$4 sm:$0xff]  }
 0x347   : > { %6768 = vmatpush1.bf16.msra.mxu0 %v11636_v59  ;;  %7383 = vmatpush1.bf16.msra.mxu1 %v11639_v8  ;;  %v11732_v59 = vld [vmem:[%s12806_s15 + $0x176c] ss:$16 sps:$4 sm:$0xff]   ;;  %v11727_v8 = vld [vmem:[%s12806_s15 + $0x1760] ss:$16 sps:$4 sm:$0xff]  }
 0x348   : > { %6769 = vmatprep.subr.bf16.mxu0 %v11644_v10  ;;  %7384 = vmatprep.subr.bf16.mxu1 %v11647_v11  ;;  %v11730_v10 = vld [vmem:[%s12806_s15 + $0x1768] ss:$16 sps:$4 sm:$0xff]   ;;  %v11735_v11 = vld [vmem:[%s12806_s15 + $0x1784] ss:$16 sps:$4 sm:$0xff]  }
 0x34b   : > { %6770 = vmatpush1.bf16.msra.mxu0 %v11642_v12  ;;  %7385 = vmatpush1.bf16.msra.mxu1 %v11645_v56  ;;  %v11738_v12 = vld [vmem:[%s12806_s15 + $0x178c] ss:$16 sps:$4 sm:$0xff]   ;;  %v11733_v56 = vld [vmem:[%s12806_s15 + $0x1780] ss:$16 sps:$4 sm:$0xff]  }
 0x34c   : > { %6771 = vmatprep.subr.bf16.mxu0 %v11650_v14  ;;  %7386 = vmatprep.subr.bf16.mxu1 %v11653_v62  ;;  %v11736_v14 = vld [vmem:[%s12806_s15 + $0x1788] ss:$16 sps:$4 sm:$0xff]   ;;  %v11741_v62 = vld [vmem:[%s12806_s15 + $0x17a4] ss:$16 sps:$4 sm:$0xff]  }
 0x34f   : > { %6772 = vmatpush1.bf16.msra.mxu0 %v11648_v16  ;;  %7387 = vmatpush1.bf16.msra.mxu1 %v11651_v17  ;;  %v11744_v16 = vld [vmem:[%s12806_s15 + $0x17ac] ss:$16 sps:$4 sm:$0xff]   ;;  %v11739_v17 = vld [vmem:[%s12806_s15 + $0x17a0] ss:$16 sps:$4 sm:$0xff]  }
 0x350   : > { %6773 = vmatprep.subr.bf16.mxu0 %v11656_v19  ;;  %7388 = vmatprep.subr.bf16.mxu1 %v11659_v7  ;;  %v11742_v19 = vld [vmem:[%s12806_s15 + $0x17a8] ss:$16 sps:$4 sm:$0xff]   ;;  %v11747_v7 = vld [vmem:[%s12806_s15 + $0x17c4] ss:$16 sps:$4 sm:$0xff]  }
 0x353   : > { %6774 = vmatpush1.bf16.msra.mxu0 %v11654_v54  ;;  %7389 = vmatpush1.bf16.msra.mxu1 %v11657_v20  ;;  %v11750_v54 = vld [vmem:[%s12806_s15 + $0x17cc] ss:$16 sps:$4 sm:$0xff]   ;;  %v13727_v20 = vld [vmem:[%s12828_s8 + $0x18] sm:$0x3f] }
 0x354   : > { %6784 = vmatprep.subr.bf16.mxu0 %v11663_v21  ;;  %7399 = vmatprep.subr.bf16.mxu1 %v11666_v9  ;;  %v11745_v21 = vld [vmem:[%s12806_s15 + $0x17c0] ss:$16 sps:$4 sm:$0xff]   ;;  %v11748_v9 = vld [vmem:[%s12806_s15 + $0x17c8] ss:$16 sps:$4 sm:$0xff]  }
 0x356   : > { %6776 = vmatmul.mubr.bf16.vlgmr.msra.gmra.mrb[0].mxu0 %v13664_v23  ;;  %7391 = vmatmul.mubr.bf16.vlgmr.msra.gmra.mrb[0].mxu1 %v13664_v23 }
 0x357   : > { %6785 = vmatpush1.bf16.msra.mxu0 %v11661_v24  ;;  %7400 = vmatpush1.bf16.msra.mxu1 %v11664_v25  ;;  %v11753_v24 = vld [vmem:[%s12806_s15 + $0x17e4] ss:$16 sps:$4 sm:$0xff]   ;;  %v11756_v25 = vld [vmem:[%s12806_s15 + $0x17ec] ss:$16 sps:$4 sm:$0xff]  }
 0x358   : > { %6786 = vmatprep.subr.bf16.mxu0 %v11669_v27  ;;  %7401 = vmatprep.subr.bf16.mxu1 %v11672_v29  ;;  %v13735_v27 = vrot.slane %v13727_v20, %v12886_v51  ;;  %v11751_v29 = vld [vmem:[%s12806_s15 + $0x17e0] ss:$16 sps:$4 sm:$0xff]  }
 0x359   : > { %6816 = vmatprep.mubr.bf16.mxu0 %v1455_v15  ;;  %7431 = vmatprep.mubr.bf16.mxu1 %v1455_v15  ;;  %v11754_v15 = vld [vmem:[%s12806_s15 + $0x17e8] ss:$16 sps:$4 sm:$0xff]  }
 0x35b   : > { %6787 = vmatpush1.bf16.msra.mxu0 %v11667_v13  ;;  %7402 = vmatpush1.bf16.msra.mxu1 %v11670_v31  ;;  %v11759_v13 = vld [vmem:[%s12806_s15 + $0x1804] ss:$16 sps:$4 sm:$0xff]   ;;  %v11762_v31 = vld [vmem:[%s12806_s15 + $0x180c] ss:$16 sps:$4 sm:$0xff]  }
 0x35c   : > { %6788 = vmatprep.subr.bf16.mxu0 %v11675_v32  ;;  %7403 = vmatprep.subr.bf16.mxu1 %v11678_v33  ;;  %v1471_v32 = vcombine.high %v13735_v27, %v13735_v27  ;;  %v1453_v33 = vcombine.high %v13664_v23, %v13664_v23  ;;  %v11763_v23 = vld [vmem:[%s12806_s15 + $0x1820] ss:$16 sps:$4 sm:$0xff]  }
 0x35f   : > { %6789 = vmatpush1.bf16.msra.mxu0 %v11673_v22  ;;  %7404 = vmatpush1.bf16.msra.mxu1 %v11676_v34  ;;  %v11757_v22 = vld [vmem:[%s12806_s15 + $0x1800] ss:$16 sps:$4 sm:$0xff]   ;;  %v11760_v34 = vld [vmem:[%s12806_s15 + $0x1808] ss:$16 sps:$4 sm:$0xff]  }
 0x360   : > { %6790 = vmatprep.subr.bf16.mxu0 %v11681_v18  ;;  %7405 = vmatprep.subr.bf16.mxu1 %v11684_v35  ;;  %v11765_v18 = vld [vmem:[%s12806_s15 + $0x1824] ss:$16 sps:$4 sm:$0xff]   ;;  %v11768_v35 = vld [vmem:[%s12806_s15 + $0x182c] ss:$16 sps:$4 sm:$0xff]  }
 0x363   : > { %6791 = vmatpush1.bf16.msra.mxu0 %v11679_v36  ;;  %7406 = vmatpush1.bf16.msra.mxu1 %v11682_v37  ;;  %v13750_v36 = vrot.slane %v1471_v32, %v12886_v51  ;;  %v11766_v37 = vld [vmem:[%s12806_s15 + $0x1828] ss:$16 sps:$4 sm:$0xff]   ;;  %v11841_v32 = vld [vmem:[%s12806_s15 + $0x19c0] ss:$16 sps:$4 sm:$0xff]  }
 0x364   : > { %6792 = vmatprep.subr.bf16.mxu0 %v11687_v28  ;;  %7407 = vmatprep.subr.bf16.mxu1 %v11690_v38  ;;  %v11771_v28 = vld [vmem:[%s12806_s15 + $0x1844] ss:$16 sps:$4 sm:$0xff]   ;;  %v11774_v38 = vld [vmem:[%s12806_s15 + $0x184c] ss:$16 sps:$4 sm:$0xff]  }
 0x367   : > { %6793 = vmatpush1.bf16.msra.mxu0 %v11685_v39  ;;  %7408 = vmatpush1.bf16.msra.mxu1 %v11688_v30  ;;  %v11769_v39 = vld [vmem:[%s12806_s15 + $0x1840] ss:$16 sps:$4 sm:$0xff]   ;;  %v11772_v30 = vld [vmem:[%s12806_s15 + $0x1848] ss:$16 sps:$4 sm:$0xff]  }
 0x368   : > { %6794 = vmatprep.subr.bf16.mxu0 %v11693_v43  ;;  %7409 = vmatprep.subr.bf16.mxu1 %v11696_v44  ;;  %v11777_v43 = vld [vmem:[%s12806_s15 + $0x1864] ss:$16 sps:$4 sm:$0xff]   ;;  %v11780_v44 = vld [vmem:[%s12806_s15 + $0x186c] ss:$16 sps:$4 sm:$0xff]  }
 0x36b   : > { %6795 = vmatpush1.bf16.msra.mxu0 %v11691_v46  ;;  %7410 = vmatpush1.bf16.msra.mxu1 %v11694_v48  ;;  %v11775_v46 = vld [vmem:[%s12806_s15 + $0x1860] ss:$16 sps:$4 sm:$0xff]   ;;  %v11778_v48 = vld [vmem:[%s12806_s15 + $0x1868] ss:$16 sps:$4 sm:$0xff]  }
 0x36c   : > { %6796 = vmatprep.subr.bf16.mxu0 %v11699_v26  ;;  %7411 = vmatprep.subr.bf16.mxu1 %v11702_v49  ;;  %v11783_v26 = vld [vmem:[%s12806_s15 + $0x1884] ss:$16 sps:$4 sm:$0xff]   ;;  %v11786_v49 = vld [vmem:[%s12806_s15 + $0x188c] ss:$16 sps:$4 sm:$0xff]  }
 0x36f   : > { %6797 = vmatpush1.bf16.msra.mxu0 %v11697_v50  ;;  %7412 = vmatpush1.bf16.msra.mxu1 %v11700_v52  ;;  %v11781_v50 = vld [vmem:[%s12806_s15 + $0x1880] ss:$16 sps:$4 sm:$0xff]   ;;  %v11784_v52 = vld [vmem:[%s12806_s15 + $0x1888] ss:$16 sps:$4 sm:$0xff]  }
 0x370   : > { %6798 = vmatprep.subr.bf16.mxu0 %v11705_v41  ;;  %7413 = vmatprep.subr.bf16.mxu1 %v11708_v53  ;;  %v11789_v41 = vld [vmem:[%s12806_s15 + $0x18a4] ss:$16 sps:$4 sm:$0xff]   ;;  %v11792_v53 = vld [vmem:[%s12806_s15 + $0x18ac] ss:$16 sps:$4 sm:$0xff]  }
 0x373   : > { %6799 = vmatpush1.bf16.msra.mxu0 %v11703_v55  ;;  %7414 = vmatpush1.bf16.msra.mxu1 %v11706_v57  ;;  %v11787_v55 = vld [vmem:[%s12806_s15 + $0x18a0] ss:$16 sps:$4 sm:$0xff]   ;;  %v11790_v57 = vld [vmem:[%s12806_s15 + $0x18a8] ss:$16 sps:$4 sm:$0xff]  }
 0x374   : > { %6800 = vmatprep.subr.bf16.mxu0 %v11711_v42  ;;  %7415 = vmatprep.subr.bf16.mxu1 %v11714_v60  ;;  %v11795_v42 = vld [vmem:[%s12806_s15 + $0x18c4] ss:$16 sps:$4 sm:$0xff]   ;;  %v11798_v60 = vld [vmem:[%s12806_s15 + $0x18cc] ss:$16 sps:$4 sm:$0xff]  }
 0x377   : > { %6801 = vmatpush1.bf16.msra.mxu0 %v11709_v61  ;;  %7416 = vmatpush1.bf16.msra.mxu1 %v11712_v63  ;;  %v11793_v61 = vld [vmem:[%s12806_s15 + $0x18c0] ss:$16 sps:$4 sm:$0xff]   ;;  %v11796_v63 = vld [vmem:[%s12806_s15 + $0x18c8] ss:$16 sps:$4 sm:$0xff]  }
 0x378   : > { %6802 = vmatprep.subr.bf16.mxu0 %v11717_v0  ;;  %7417 = vmatprep.subr.bf16.mxu1 %v11720_v47  ;;  %v11801_v0 = vld [vmem:[%s12806_s15 + $0x18e4] ss:$16 sps:$4 sm:$0xff]   ;;  %v11804_v47 = vld [vmem:[%s12806_s15 + $0x18ec] ss:$16 sps:$4 sm:$0xff]  }
 0x37b   : > { %6803 = vmatpush1.bf16.msra.mxu0 %v11715_v1  ;;  %7418 = vmatpush1.bf16.msra.mxu1 %v11718_v2  ;;  %v11799_v1 = vld [vmem:[%s12806_s15 + $0x18e0] ss:$16 sps:$4 sm:$0xff]   ;;  %v11802_v2 = vld [vmem:[%s12806_s15 + $0x18e8] ss:$16 sps:$4 sm:$0xff]  }
 0x37c   : > { %6804 = vmatprep.subr.bf16.mxu0 %v11723_v3  ;;  %7419 = vmatprep.subr.bf16.mxu1 %v11726_v58  ;;  %v11807_v3 = vld [vmem:[%s12806_s15 + $0x1904] ss:$16 sps:$4 sm:$0xff]   ;;  %v11810_v58 = vld [vmem:[%s12806_s15 + $0x190c] ss:$16 sps:$4 sm:$0xff]  }
 0x37f   : > { %6805 = vmatpush1.bf16.msra.mxu0 %v11721_v4  ;;  %7420 = vmatpush1.bf16.msra.mxu1 %v11724_v5  ;;  %v11805_v4 = vld [vmem:[%s12806_s15 + $0x1900] ss:$16 sps:$4 sm:$0xff]   ;;  %v11808_v5 = vld [vmem:[%s12806_s15 + $0x1908] ss:$16 sps:$4 sm:$0xff]  }
 0x380   : > { %6806 = vmatprep.subr.bf16.mxu0 %v11729_v6  ;;  %7421 = vmatprep.subr.bf16.mxu1 %v11732_v59  ;;  %v11813_v6 = vld [vmem:[%s12806_s15 + $0x1924] ss:$16 sps:$4 sm:$0xff]   ;;  %v11816_v59 = vld [vmem:[%s12806_s15 + $0x192c] ss:$16 sps:$4 sm:$0xff]  }
 0x383   : > { %6807 = vmatpush1.bf16.msra.mxu0 %v11727_v8  ;;  %7422 = vmatpush1.bf16.msra.mxu1 %v11730_v10  ;;  %v11811_v8 = vld [vmem:[%s12806_s15 + $0x1920] ss:$16 sps:$4 sm:$0xff]   ;;  %v11814_v10 = vld [vmem:[%s12806_s15 + $0x1928] ss:$16 sps:$4 sm:$0xff]  }
 0x384   : > { %6808 = vmatprep.subr.bf16.mxu0 %v11735_v11  ;;  %7423 = vmatprep.subr.bf16.mxu1 %v11738_v12  ;;  %v11819_v11 = vld [vmem:[%s12806_s15 + $0x1944] ss:$16 sps:$4 sm:$0xff]   ;;  %v11822_v12 = vld [vmem:[%s12806_s15 + $0x194c] ss:$16 sps:$4 sm:$0xff]  }
 0x387   : > { %6809 = vmatpush1.bf16.msra.mxu0 %v11733_v56  ;;  %7424 = vmatpush1.bf16.msra.mxu1 %v11736_v14  ;;  %v11817_v56 = vld [vmem:[%s12806_s15 + $0x1940] ss:$16 sps:$4 sm:$0xff]   ;;  %v11820_v14 = vld [vmem:[%s12806_s15 + $0x1948] ss:$16 sps:$4 sm:$0xff]  }
 0x388   : > { %6810 = vmatprep.subr.bf16.mxu0 %v11741_v62  ;;  %7425 = vmatprep.subr.bf16.mxu1 %v11744_v16  ;;  %v11825_v62 = vld [vmem:[%s12806_s15 + $0x1964] ss:$16 sps:$4 sm:$0xff]   ;;  %v11828_v16 = vld [vmem:[%s12806_s15 + $0x196c] ss:$16 sps:$4 sm:$0xff]  }
 0x38b   : > { %6811 = vmatpush1.bf16.msra.mxu0 %v11739_v17  ;;  %7426 = vmatpush1.bf16.msra.mxu1 %v11742_v19  ;;  %v11823_v17 = vld [vmem:[%s12806_s15 + $0x1960] ss:$16 sps:$4 sm:$0xff]   ;;  %v11826_v19 = vld [vmem:[%s12806_s15 + $0x1968] ss:$16 sps:$4 sm:$0xff]  }
 0x38c   : > { %6812 = vmatprep.subr.bf16.mxu0 %v11747_v7  ;;  %7427 = vmatprep.subr.bf16.mxu1 %v11750_v54  ;;  %v11831_v7 = vld [vmem:[%s12806_s15 + $0x1984] ss:$16 sps:$4 sm:$0xff]   ;;  %v11834_v54 = vld [vmem:[%s12806_s15 + $0x198c] ss:$16 sps:$4 sm:$0xff]  }
 0x38f   : > { %6813 = vmatpush1.bf16.msra.mxu0 %v11745_v21  ;;  %7428 = vmatpush1.bf16.msra.mxu1 %v11748_v9  ;;  %v11829_v21 = vld [vmem:[%s12806_s15 + $0x1980] ss:$16 sps:$4 sm:$0xff]   ;;  %v11832_v9 = vld [vmem:[%s12806_s15 + $0x1988] ss:$16 sps:$4 sm:$0xff]  }
 0x390   : > { %6814 = vmatprep.subr.bf16.mxu0 %v11753_v24  ;;  %7429 = vmatprep.subr.bf16.mxu1 %v11756_v25  ;;  %v11837_v24 = vld [vmem:[%s12806_s15 + $0x19a4] ss:$16 sps:$4 sm:$0xff]   ;;  %v11840_v25 = vld [vmem:[%s12806_s15 + $0x19ac] ss:$16 sps:$4 sm:$0xff]  }
 0x393   : > { %6815 = vmatpush1.bf16.msra.mxu0 %v11751_v29  ;;  %7430 = vmatpush1.bf16.msra.mxu1 %v11754_v15  ;;  %v11835_v29 = vld [vmem:[%s12806_s15 + $0x19a0] ss:$16 sps:$4 sm:$0xff]   ;;  %v11838_v15 = vld [vmem:[%s12806_s15 + $0x19a8] ss:$16 sps:$4 sm:$0xff]  }
 0x394   : > { %6825 = vmatprep.subr.bf16.mxu0 %v11759_v13  ;;  %7440 = vmatprep.subr.bf16.mxu1 %v11762_v31  ;;  %v11843_v13 = vld [vmem:[%s12806_s15 + $0x19c4] ss:$16 sps:$4 sm:$0xff]   ;;  %v11846_v31 = vld [vmem:[%s12806_s15 + $0x19cc] ss:$16 sps:$4 sm:$0xff]  }
 0x396   : > { %6817 = vmatmul.mubr.bf16.vlgmr.msra.gmra.mrb[0].mxu0 %v1453_v33  ;;  %7432 = vmatmul.mubr.bf16.vlgmr.msra.gmra.mrb[0].mxu1 %v1453_v33  ;;  %v11844_v33 = vld [vmem:[%s12806_s15 + $0x19c8] ss:$16 sps:$4 sm:$0xff]  }
 0x397   : > { %6826 = vmatpush1.bf16.msra.mxu0 %v11757_v22  ;;  %7441 = vmatpush1.bf16.msra.mxu1 %v11760_v34  ;;  %v11849_v22 = vld [vmem:[%s12806_s15 + $0x19e4] ss:$16 sps:$4 sm:$0xff]   ;;  %v11852_v34 = vld [vmem:[%s12806_s15 + $0x19ec] ss:$16 sps:$4 sm:$0xff]  }
 0x398   : > { %6827 = vmatprep.subr.bf16.mxu0 %v11765_v18  ;;  %7442 = vmatprep.subr.bf16.mxu1 %v11768_v35  ;;  %v11847_v18 = vld [vmem:[%s12806_s15 + $0x19e0] ss:$16 sps:$4 sm:$0xff]   ;;  %v11850_v35 = vld [vmem:[%s12806_s15 + $0x19e8] ss:$16 sps:$4 sm:$0xff]  }
 0x399   : > { %6857 = vmatprep.mubr.bf16.mxu0 %v13750_v36  ;;  %7472 = vmatprep.mubr.bf16.mxu1 %v13750_v36 }
 0x39b   : > { %6828 = vmatpush1.bf16.msra.mxu0 %v11763_v23  ;;  %7443 = vmatpush1.bf16.msra.mxu1 %v11766_v37  ;;  %v11855_v23 = vld [vmem:[%s12806_s15 + $0x1a04] ss:$16 sps:$4 sm:$0xff]   ;;  %v11858_v37 = vld [vmem:[%s12806_s15 + $0x1a0c] ss:$16 sps:$4 sm:$0xff]  }
 0x39c   : > { %6829 = vmatprep.subr.bf16.mxu0 %v11771_v28  ;;  %7444 = vmatprep.subr.bf16.mxu1 %v11774_v38  ;;  %v13816_v28 = vrot.slane %v13735_v27, %v12886_v51  ;;  %v11853_v38 = vld [vmem:[%s12806_s15 + $0x1a00] ss:$16 sps:$4 sm:$0xff]  }
 0x39d   : > { %v11859_v27 = vld [vmem:[%s12806_s15 + $0x1a20] ss:$16 sps:$4 sm:$0xff]  }
 0x39f   : > { %6830 = vmatpush1.bf16.msra.mxu0 %v11769_v39  ;;  %7445 = vmatpush1.bf16.msra.mxu1 %v11772_v30  ;;  %v11856_v39 = vld [vmem:[%s12806_s15 + $0x1a08] ss:$16 sps:$4 sm:$0xff]   ;;  %v11861_v30 = vld [vmem:[%s12806_s15 + $0x1a24] ss:$16 sps:$4 sm:$0xff]  }
 0x3a0   : > { %6831 = vmatprep.subr.bf16.mxu0 %v11777_v43  ;;  %7446 = vmatprep.subr.bf16.mxu1 %v11780_v44  ;;  %v11864_v43 = vld [vmem:[%s12806_s15 + $0x1a2c] ss:$16 sps:$4 sm:$0xff]   ;;  %v1502_v44 = vcombine.high %v13750_v36, %v13750_v36  ;;  %v11865_v36 = vld [vmem:[%s12806_s15 + $0x1a40] ss:$16 sps:$4 sm:$0xff]  }
 0x3a3   : > { %6832 = vmatpush1.bf16.msra.mxu0 %v11775_v46  ;;  %7447 = vmatpush1.bf16.msra.mxu1 %v11778_v48  ;;  %v11862_v46 = vld [vmem:[%s12806_s15 + $0x1a28] ss:$16 sps:$4 sm:$0xff]   ;;  %v11867_v48 = vld [vmem:[%s12806_s15 + $0x1a44] ss:$16 sps:$4 sm:$0xff]  }
 0x3a4   : > { %6833 = vmatprep.subr.bf16.mxu0 %v11783_v26  ;;  %7448 = vmatprep.subr.bf16.mxu1 %v11786_v49  ;;  %v11870_v26 = vld [vmem:[%s12806_s15 + $0x1a4c] ss:$16 sps:$4 sm:$0xff]   ;;  %v11868_v49 = vld [vmem:[%s12806_s15 + $0x1a48] ss:$16 sps:$4 sm:$0xff]  }
 0x3a7   : > { %6834 = vmatpush1.bf16.msra.mxu0 %v11781_v50  ;;  %7449 = vmatpush1.bf16.msra.mxu1 %v11784_v52  ;;  %v11873_v50 = vld [vmem:[%s12806_s15 + $0x1a64] ss:$16 sps:$4 sm:$0xff]   ;;  %v11876_v52 = vld [vmem:[%s12806_s15 + $0x1a6c] ss:$16 sps:$4 sm:$0xff]  }
 0x3a8   : > { %6835 = vmatprep.subr.bf16.mxu0 %v11789_v41  ;;  %7450 = vmatprep.subr.bf16.mxu1 %v11792_v53  ;;  %v11871_v41 = vld [vmem:[%s12806_s15 + $0x1a60] ss:$16 sps:$4 sm:$0xff]   ;;  %v11874_v53 = vld [vmem:[%s12806_s15 + $0x1a68] ss:$16 sps:$4 sm:$0xff]  }
 0x3ab   : > { %6836 = vmatpush1.bf16.msra.mxu0 %v11787_v55  ;;  %7451 = vmatpush1.bf16.msra.mxu1 %v11790_v57  ;;  %v11879_v55 = vld [vmem:[%s12806_s15 + $0x1a84] ss:$16 sps:$4 sm:$0xff]   ;;  %v11882_v57 = vld [vmem:[%s12806_s15 + $0x1a8c] ss:$16 sps:$4 sm:$0xff]  }
 0x3ac   : > { %6837 = vmatprep.subr.bf16.mxu0 %v11795_v42  ;;  %7452 = vmatprep.subr.bf16.mxu1 %v11798_v60  ;;  %v11877_v42 = vld [vmem:[%s12806_s15 + $0x1a80] ss:$16 sps:$4 sm:$0xff]   ;;  %v11880_v60 = vld [vmem:[%s12806_s15 + $0x1a88] ss:$16 sps:$4 sm:$0xff]  }
 0x3af   : > { %6838 = vmatpush1.bf16.msra.mxu0 %v11793_v61  ;;  %7453 = vmatpush1.bf16.msra.mxu1 %v11796_v63  ;;  %v11885_v61 = vld [vmem:[%s12806_s15 + $0x1aa4] ss:$16 sps:$4 sm:$0xff]   ;;  %v11888_v63 = vld [vmem:[%s12806_s15 + $0x1aac] ss:$16 sps:$4 sm:$0xff]  }
 0x3b0   : > { %6839 = vmatprep.subr.bf16.mxu0 %v11801_v0  ;;  %7454 = vmatprep.subr.bf16.mxu1 %v11804_v47  ;;  %v11883_v0 = vld [vmem:[%s12806_s15 + $0x1aa0] ss:$16 sps:$4 sm:$0xff]   ;;  %v11886_v47 = vld [vmem:[%s12806_s15 + $0x1aa8] ss:$16 sps:$4 sm:$0xff]  }
 0x3b3   : > { %6840 = vmatpush1.bf16.msra.mxu0 %v11799_v1  ;;  %7455 = vmatpush1.bf16.msra.mxu1 %v11802_v2  ;;  %v11891_v1 = vld [vmem:[%s12806_s15 + $0x1ac4] ss:$16 sps:$4 sm:$0xff]   ;;  %v11894_v2 = vld [vmem:[%s12806_s15 + $0x1acc] ss:$16 sps:$4 sm:$0xff]  }
 0x3b4   : > { %6841 = vmatprep.subr.bf16.mxu0 %v11807_v3  ;;  %7456 = vmatprep.subr.bf16.mxu1 %v11810_v58  ;;  %v11889_v3 = vld [vmem:[%s12806_s15 + $0x1ac0] ss:$16 sps:$4 sm:$0xff]   ;;  %v11892_v58 = vld [vmem:[%s12806_s15 + $0x1ac8] ss:$16 sps:$4 sm:$0xff]  }
 0x3b7   : > { %6842 = vmatpush1.bf16.msra.mxu0 %v11805_v4  ;;  %7457 = vmatpush1.bf16.msra.mxu1 %v11808_v5  ;;  %v11897_v4 = vld [vmem:[%s12806_s15 + $0x1ae4] ss:$16 sps:$4 sm:$0xff]   ;;  %v11900_v5 = vld [vmem:[%s12806_s15 + $0x1aec] ss:$16 sps:$4 sm:$0xff]  }
 0x3b8   : > { %6843 = vmatprep.subr.bf16.mxu0 %v11813_v6  ;;  %7458 = vmatprep.subr.bf16.mxu1 %v11816_v59  ;;  %v11895_v6 = vld [vmem:[%s12806_s15 + $0x1ae0] ss:$16 sps:$4 sm:$0xff]   ;;  %v11898_v59 = vld [vmem:[%s12806_s15 + $0x1ae8] ss:$16 sps:$4 sm:$0xff]  }
 0x3bb   : > { %6844 = vmatpush1.bf16.msra.mxu0 %v11811_v8  ;;  %7459 = vmatpush1.bf16.msra.mxu1 %v11814_v10  ;;  %v11903_v8 = vld [vmem:[%s12806_s15 + $0x1b04] ss:$16 sps:$4 sm:$0xff]   ;;  %v11906_v10 = vld [vmem:[%s12806_s15 + $0x1b0c] ss:$16 sps:$4 sm:$0xff]  }
 0x3bc   : > { %6845 = vmatprep.subr.bf16.mxu0 %v11819_v11  ;;  %7460 = vmatprep.subr.bf16.mxu1 %v11822_v12  ;;  %v11901_v11 = vld [vmem:[%s12806_s15 + $0x1b00] ss:$16 sps:$4 sm:$0xff]   ;;  %v11904_v12 = vld [vmem:[%s12806_s15 + $0x1b08] ss:$16 sps:$4 sm:$0xff]  }
 0x3bf   : > { %6846 = vmatpush1.bf16.msra.mxu0 %v11817_v56  ;;  %7461 = vmatpush1.bf16.msra.mxu1 %v11820_v14  ;;  %v11909_v56 = vld [vmem:[%s12806_s15 + $0x1b24] ss:$16 sps:$4 sm:$0xff]   ;;  %v11912_v14 = vld [vmem:[%s12806_s15 + $0x1b2c] ss:$16 sps:$4 sm:$0xff]  }
 0x3c0   : > { %6847 = vmatprep.subr.bf16.mxu0 %v11825_v62  ;;  %7462 = vmatprep.subr.bf16.mxu1 %v11828_v16  ;;  %v11907_v62 = vld [vmem:[%s12806_s15 + $0x1b20] ss:$16 sps:$4 sm:$0xff]   ;;  %v11910_v16 = vld [vmem:[%s12806_s15 + $0x1b28] ss:$16 sps:$4 sm:$0xff]  }
 0x3c3   : > { %6848 = vmatpush1.bf16.msra.mxu0 %v11823_v17  ;;  %7463 = vmatpush1.bf16.msra.mxu1 %v11826_v19  ;;  %v11915_v17 = vld [vmem:[%s12806_s15 + $0x1b44] ss:$16 sps:$4 sm:$0xff]   ;;  %v11918_v19 = vld [vmem:[%s12806_s15 + $0x1b4c] ss:$16 sps:$4 sm:$0xff]  }
 0x3c4   : > { %6849 = vmatprep.subr.bf16.mxu0 %v11831_v7  ;;  %7464 = vmatprep.subr.bf16.mxu1 %v11834_v54  ;;  %v11913_v7 = vld [vmem:[%s12806_s15 + $0x1b40] ss:$16 sps:$4 sm:$0xff]   ;;  %v11916_v54 = vld [vmem:[%s12806_s15 + $0x1b48] ss:$16 sps:$4 sm:$0xff]  }
 0x3c7   : > { %6850 = vmatpush1.bf16.msra.mxu0 %v11829_v21  ;;  %7465 = vmatpush1.bf16.msra.mxu1 %v11832_v9  ;;  %v11921_v21 = vld [vmem:[%s12806_s15 + $0x1b64] ss:$16 sps:$4 sm:$0xff]   ;;  %v11924_v9 = vld [vmem:[%s12806_s15 + $0x1b6c] ss:$16 sps:$4 sm:$0xff]  }
 0x3c8   : > { %6851 = vmatprep.subr.bf16.mxu0 %v11837_v24  ;;  %7466 = vmatprep.subr.bf16.mxu1 %v11840_v25  ;;  %v11919_v24 = vld [vmem:[%s12806_s15 + $0x1b60] ss:$16 sps:$4 sm:$0xff]   ;;  %v11922_v25 = vld [vmem:[%s12806_s15 + $0x1b68] ss:$16 sps:$4 sm:$0xff]  }
 0x3cb   : > { %6852 = vmatpush1.bf16.msra.mxu0 %v11835_v29  ;;  %7467 = vmatpush1.bf16.msra.mxu1 %v11838_v15  ;;  %v11927_v29 = vld [vmem:[%s12806_s15 + $0x1b84] ss:$16 sps:$4 sm:$0xff]   ;;  %v11930_v15 = vld [vmem:[%s12806_s15 + $0x1b8c] ss:$16 sps:$4 sm:$0xff]  }
 0x3cc   : > { %6853 = vmatprep.subr.bf16.mxu0 %v11843_v13  ;;  %7468 = vmatprep.subr.bf16.mxu1 %v11846_v31  ;;  %v11925_v13 = vld [vmem:[%s12806_s15 + $0x1b80] ss:$16 sps:$4 sm:$0xff]   ;;  %v11928_v31 = vld [vmem:[%s12806_s15 + $0x1b88] ss:$16 sps:$4 sm:$0xff]  }
 0x3cf   : > { %6854 = vmatpush1.bf16.msra.mxu0 %v11841_v32  ;;  %7469 = vmatpush1.bf16.msra.mxu1 %v11844_v33  ;;  %v11933_v32 = vld [vmem:[%s12806_s15 + $0x1ba4] ss:$16 sps:$4 sm:$0xff]   ;;  %v11936_v33 = vld [vmem:[%s12806_s15 + $0x1bac] ss:$16 sps:$4 sm:$0xff]  }
 0x3d0   : > { %6855 = vmatprep.subr.bf16.mxu0 %v11849_v22  ;;  %7470 = vmatprep.subr.bf16.mxu1 %v11852_v34  ;;  %v11931_v22 = vld [vmem:[%s12806_s15 + $0x1ba0] ss:$16 sps:$4 sm:$0xff]   ;;  %v11934_v34 = vld [vmem:[%s12806_s15 + $0x1ba8] ss:$16 sps:$4 sm:$0xff]  }
 0x3d3   : > { %6856 = vmatpush1.bf16.msra.mxu0 %v11847_v18  ;;  %7471 = vmatpush1.bf16.msra.mxu1 %v11850_v35  ;;  %v11939_v18 = vld [vmem:[%s12806_s15 + $0x1bc4] ss:$16 sps:$4 sm:$0xff]   ;;  %v11942_v35 = vld [vmem:[%s12806_s15 + $0x1bcc] ss:$16 sps:$4 sm:$0xff]  }
 0x3d4   : > { %6866 = vmatprep.subr.bf16.mxu0 %v11855_v23  ;;  %7481 = vmatprep.subr.bf16.mxu1 %v11858_v37  ;;  %v1456_v23 = vcombine.high %v13727_v20, %v13727_v20  ;;  %v11937_v37 = vld [vmem:[%s12806_s15 + $0x1bc0] ss:$16 sps:$4 sm:$0xff]  }
 0x3d5   : > { %v11943_v20 = vld [vmem:[%s12806_s15 + $0x1be0] ss:$16 sps:$4 sm:$0xff]  }
 0x3d6   : > { %6858 = vmatmul.mubr.bf16.vlgmr.msra.gmra.mrb[0].mxu0 %v13816_v28  ;;  %7473 = vmatmul.mubr.bf16.vlgmr.msra.gmra.mrb[0].mxu1 %v13816_v28 }
 0x3d7   : > { %6867 = vmatpush1.bf16.msra.mxu0 %v11853_v38  ;;  %7482 = vmatpush1.bf16.msra.mxu1 %v11856_v39  ;;  %v11940_v38 = vld [vmem:[%s12806_s15 + $0x1bc8] ss:$16 sps:$4 sm:$0xff]   ;;  %v11945_v39 = vld [vmem:[%s12806_s15 + $0x1be4] ss:$16 sps:$4 sm:$0xff]  }
 0x3d8   : > { %6868 = vmatprep.subr.bf16.mxu0 %v11861_v30  ;;  %7483 = vmatprep.subr.bf16.mxu1 %v11864_v43  ;;  %v11948_v30 = vld [vmem:[%s12806_s15 + $0x1bec] ss:$16 sps:$4 sm:$0xff]   ;;  %v13885_v43 = vrot.slane %v1456_v23, %v12886_v51  ;;  %v12021_v23 = vld [vmem:[%s12806_s15 + $0x1d80] ss:$16 sps:$4 sm:$0xff]  }
 0x3d9   : > { %6898 = vmatprep.mubr.bf16.mxu0 %v1502_v44  ;;  %7513 = vmatprep.mubr.bf16.mxu1 %v1502_v44  ;;  %v11946_v44 = vld [vmem:[%s12806_s15 + $0x1be8] ss:$16 sps:$4 sm:$0xff]  }
 0x3db   : > { %6869 = vmatpush1.bf16.msra.mxu0 %v11859_v27  ;;  %7484 = vmatpush1.bf16.msra.mxu1 %v11862_v46  ;;  %v11951_v27 = vld [vmem:[%s12806_s15 + $0x1c04] ss:$16 sps:$4 sm:$0xff]   ;;  %v11954_v46 = vld [vmem:[%s12806_s15 + $0x1c0c] ss:$16 sps:$4 sm:$0xff]  }
 0x3dc   : > { %6870 = vmatprep.subr.bf16.mxu0 %v11867_v48  ;;  %7485 = vmatprep.subr.bf16.mxu1 %v11870_v26  ;;  %v1472_v48 = vcombine.high %v13885_v43, %v13885_v43  ;;  %v1501_v26 = vcombine.high %v13816_v28, %v13816_v28  ;;  %v11955_v28 = vld [vmem:[%s12806_s15 + $0x1c20] ss:$16 sps:$4 sm:$0xff]  }
 0x3df   : > { %6871 = vmatpush1.bf16.msra.mxu0 %v11865_v36  ;;  %7486 = vmatpush1.bf16.msra.mxu1 %v11868_v49  ;;  %v11949_v36 = vld [vmem:[%s12806_s15 + $0x1c00] ss:$16 sps:$4 sm:$0xff]   ;;  %v11952_v49 = vld [vmem:[%s12806_s15 + $0x1c08] ss:$16 sps:$4 sm:$0xff]  }
 0x3e0   : > { %6872 = vmatprep.subr.bf16.mxu0 %v11873_v50  ;;  %7487 = vmatprep.subr.bf16.mxu1 %v11876_v52  ;;  %v11957_v50 = vld [vmem:[%s12806_s15 + $0x1c24] ss:$16 sps:$4 sm:$0xff]   ;;  %v11960_v52 = vld [vmem:[%s12806_s15 + $0x1c2c] ss:$16 sps:$4 sm:$0xff]  }
 0x3e3   : > { %6873 = vmatpush1.bf16.msra.mxu0 %v11871_v41  ;;  %7488 = vmatpush1.bf16.msra.mxu1 %v11874_v53  ;;  %v1500_v41 = vrot.slane %v1472_v48, %v12886_v51  ;;  %v11958_v53 = vld [vmem:[%s12806_s15 + $0x1c28] ss:$16 sps:$4 sm:$0xff]  }
 0x3e4   : > { %6874 = vmatprep.subr.bf16.mxu0 %v11879_v55  ;;  %7489 = vmatprep.subr.bf16.mxu1 %v11882_v57  ;;  %v11963_v55 = vld [vmem:[%s12806_s15 + $0x1c44] ss:$16 sps:$4 sm:$0xff]   ;;  %v11966_v57 = vld [vmem:[%s12806_s15 + $0x1c4c] ss:$16 sps:$4 sm:$0xff]   ;;  %v12036_v48 = vld [vmem:[%s12806_s15 + $0x1dc8] ss:$16 sps:$4 sm:$0xff]  }
 0x3e7   : > { %6875 = vmatpush1.bf16.msra.mxu0 %v11877_v42  ;;  %7490 = vmatpush1.bf16.msra.mxu1 %v11880_v60  ;;  %v11961_v42 = vld [vmem:[%s12806_s15 + $0x1c40] ss:$16 sps:$4 sm:$0xff]   ;;  %v11964_v60 = vld [vmem:[%s12806_s15 + $0x1c48] ss:$16 sps:$4 sm:$0xff]  }
 0x3e8   : > { %6876 = vmatprep.subr.bf16.mxu0 %v11885_v61  ;;  %7491 = vmatprep.subr.bf16.mxu1 %v11888_v63  ;;  %v11969_v61 = vld [vmem:[%s12806_s15 + $0x1c64] ss:$16 sps:$4 sm:$0xff]   ;;  %v11972_v63 = vld [vmem:[%s12806_s15 + $0x1c6c] ss:$16 sps:$4 sm:$0xff]  }
 0x3eb   : > { %6877 = vmatpush1.bf16.msra.mxu0 %v11883_v0  ;;  %7492 = vmatpush1.bf16.msra.mxu1 %v11886_v47  ;;  %v11967_v0 = vld [vmem:[%s12806_s15 + $0x1c60] ss:$16 sps:$4 sm:$0xff]   ;;  %v11970_v47 = vld [vmem:[%s12806_s15 + $0x1c68] ss:$16 sps:$4 sm:$0xff]  }
 0x3ec   : > { %6878 = vmatprep.subr.bf16.mxu0 %v11891_v1  ;;  %7493 = vmatprep.subr.bf16.mxu1 %v11894_v2  ;;  %v11975_v1 = vld [vmem:[%s12806_s15 + $0x1c84] ss:$16 sps:$4 sm:$0xff]   ;;  %v11978_v2 = vld [vmem:[%s12806_s15 + $0x1c8c] ss:$16 sps:$4 sm:$0xff]  }
 0x3ef   : > { %6879 = vmatpush1.bf16.msra.mxu0 %v11889_v3  ;;  %7494 = vmatpush1.bf16.msra.mxu1 %v11892_v58  ;;  %v11973_v3 = vld [vmem:[%s12806_s15 + $0x1c80] ss:$16 sps:$4 sm:$0xff]   ;;  %v11976_v58 = vld [vmem:[%s12806_s15 + $0x1c88] ss:$16 sps:$4 sm:$0xff]  }
 0x3f0   : > { %6880 = vmatprep.subr.bf16.mxu0 %v11897_v4  ;;  %7495 = vmatprep.subr.bf16.mxu1 %v11900_v5  ;;  %v11981_v4 = vld [vmem:[%s12806_s15 + $0x1ca4] ss:$16 sps:$4 sm:$0xff]   ;;  %v11984_v5 = vld [vmem:[%s12806_s15 + $0x1cac] ss:$16 sps:$4 sm:$0xff]  }
 0x3f3   : > { %6881 = vmatpush1.bf16.msra.mxu0 %v11895_v6  ;;  %7496 = vmatpush1.bf16.msra.mxu1 %v11898_v59  ;;  %v11979_v6 = vld [vmem:[%s12806_s15 + $0x1ca0] ss:$16 sps:$4 sm:$0xff]   ;;  %v11982_v59 = vld [vmem:[%s12806_s15 + $0x1ca8] ss:$16 sps:$4 sm:$0xff]  }
 0x3f4   : > { %6882 = vmatprep.subr.bf16.mxu0 %v11903_v8  ;;  %7497 = vmatprep.subr.bf16.mxu1 %v11906_v10  ;;  %v11987_v8 = vld [vmem:[%s12806_s15 + $0x1cc4] ss:$16 sps:$4 sm:$0xff]   ;;  %v11990_v10 = vld [vmem:[%s12806_s15 + $0x1ccc] ss:$16 sps:$4 sm:$0xff]  }
 0x3f7   : > { %6883 = vmatpush1.bf16.msra.mxu0 %v11901_v11  ;;  %7498 = vmatpush1.bf16.msra.mxu1 %v11904_v12  ;;  %v11985_v11 = vld [vmem:[%s12806_s15 + $0x1cc0] ss:$16 sps:$4 sm:$0xff]   ;;  %v11988_v12 = vld [vmem:[%s12806_s15 + $0x1cc8] ss:$16 sps:$4 sm:$0xff]  }
 0x3f8   : > { %6884 = vmatprep.subr.bf16.mxu0 %v11909_v56  ;;  %7499 = vmatprep.subr.bf16.mxu1 %v11912_v14  ;;  %v11993_v56 = vld [vmem:[%s12806_s15 + $0x1ce4] ss:$16 sps:$4 sm:$0xff]   ;;  %v11996_v14 = vld [vmem:[%s12806_s15 + $0x1cec] ss:$16 sps:$4 sm:$0xff]  }
 0x3fb   : > { %6885 = vmatpush1.bf16.msra.mxu0 %v11907_v62  ;;  %7500 = vmatpush1.bf16.msra.mxu1 %v11910_v16  ;;  %v11991_v62 = vld [vmem:[%s12806_s15 + $0x1ce0] ss:$16 sps:$4 sm:$0xff]   ;;  %v11994_v16 = vld [vmem:[%s12806_s15 + $0x1ce8] ss:$16 sps:$4 sm:$0xff]  }
 0x3fc   : > { %6886 = vmatprep.subr.bf16.mxu0 %v11915_v17  ;;  %7501 = vmatprep.subr.bf16.mxu1 %v11918_v19  ;;  %v11999_v17 = vld [vmem:[%s12806_s15 + $0x1d04] ss:$16 sps:$4 sm:$0xff]   ;;  %v12002_v19 = vld [vmem:[%s12806_s15 + $0x1d0c] ss:$16 sps:$4 sm:$0xff]  }
 0x3ff   : > { %6887 = vmatpush1.bf16.msra.mxu0 %v11913_v7  ;;  %7502 = vmatpush1.bf16.msra.mxu1 %v11916_v54  ;;  %v11997_v7 = vld [vmem:[%s12806_s15 + $0x1d00] ss:$16 sps:$4 sm:$0xff]   ;;  %v12000_v54 = vld [vmem:[%s12806_s15 + $0x1d08] ss:$16 sps:$4 sm:$0xff]  }
 0x400   : > { %6888 = vmatprep.subr.bf16.mxu0 %v11921_v21  ;;  %7503 = vmatprep.subr.bf16.mxu1 %v11924_v9  ;;  %v12005_v21 = vld [vmem:[%s12806_s15 + $0x1d24] ss:$16 sps:$4 sm:$0xff]   ;;  %v12008_v9 = vld [vmem:[%s12806_s15 + $0x1d2c] ss:$16 sps:$4 sm:$0xff]  }
 0x403   : > { %6889 = vmatpush1.bf16.msra.mxu0 %v11919_v24  ;;  %7504 = vmatpush1.bf16.msra.mxu1 %v11922_v25  ;;  %v12003_v24 = vld [vmem:[%s12806_s15 + $0x1d20] ss:$16 sps:$4 sm:$0xff]   ;;  %v12006_v25 = vld [vmem:[%s12806_s15 + $0x1d28] ss:$16 sps:$4 sm:$0xff]  }
 0x404   : > { %6890 = vmatprep.subr.bf16.mxu0 %v11927_v29  ;;  %7505 = vmatprep.subr.bf16.mxu1 %v11930_v15  ;;  %v12011_v29 = vld [vmem:[%s12806_s15 + $0x1d44] ss:$16 sps:$4 sm:$0xff]   ;;  %v12014_v15 = vld [vmem:[%s12806_s15 + $0x1d4c] ss:$16 sps:$4 sm:$0xff]  }
 0x407   : > { %6891 = vmatpush1.bf16.msra.mxu0 %v11925_v13  ;;  %7506 = vmatpush1.bf16.msra.mxu1 %v11928_v31  ;;  %v12009_v13 = vld [vmem:[%s12806_s15 + $0x1d40] ss:$16 sps:$4 sm:$0xff]   ;;  %v12012_v31 = vld [vmem:[%s12806_s15 + $0x1d48] ss:$16 sps:$4 sm:$0xff]  }
 0x408   : > { %6892 = vmatprep.subr.bf16.mxu0 %v11933_v32  ;;  %7507 = vmatprep.subr.bf16.mxu1 %v11936_v33  ;;  %v12017_v32 = vld [vmem:[%s12806_s15 + $0x1d64] ss:$16 sps:$4 sm:$0xff]   ;;  %v12020_v33 = vld [vmem:[%s12806_s15 + $0x1d6c] ss:$16 sps:$4 sm:$0xff]  }
 0x40b   : > { %6893 = vmatpush1.bf16.msra.mxu0 %v11931_v22  ;;  %7508 = vmatpush1.bf16.msra.mxu1 %v11934_v34  ;;  %v12015_v22 = vld [vmem:[%s12806_s15 + $0x1d60] ss:$16 sps:$4 sm:$0xff]   ;;  %v12018_v34 = vld [vmem:[%s12806_s15 + $0x1d68] ss:$16 sps:$4 sm:$0xff]  }
 0x40c   : > { %6894 = vmatprep.subr.bf16.mxu0 %v11939_v18  ;;  %7509 = vmatprep.subr.bf16.mxu1 %v11942_v35  ;;  %v12023_v18 = vld [vmem:[%s12806_s15 + $0x1d84] ss:$16 sps:$4 sm:$0xff]   ;;  %v12026_v35 = vld [vmem:[%s12806_s15 + $0x1d8c] ss:$16 sps:$4 sm:$0xff]  }
 0x40f   : > { %6895 = vmatpush1.bf16.msra.mxu0 %v11937_v37  ;;  %7510 = vmatpush1.bf16.msra.mxu1 %v11940_v38  ;;  %v12024_v37 = vld [vmem:[%s12806_s15 + $0x1d88] ss:$16 sps:$4 sm:$0xff]   ;;  %v12029_v38 = vld [vmem:[%s12806_s15 + $0x1da4] ss:$16 sps:$4 sm:$0xff]  }
 0x410   : > { %6896 = vmatprep.subr.bf16.mxu0 %v11945_v39  ;;  %7511 = vmatprep.subr.bf16.mxu1 %v11948_v30  ;;  %v12032_v39 = vld [vmem:[%s12806_s15 + $0x1dac] ss:$16 sps:$4 sm:$0xff]   ;;  %v12027_v30 = vld [vmem:[%s12806_s15 + $0x1da0] ss:$16 sps:$4 sm:$0xff]  }
 0x413   : > { %6897 = vmatpush1.bf16.msra.mxu0 %v11943_v20  ;;  %7512 = vmatpush1.bf16.msra.mxu1 %v11946_v44  ;;  %v12030_v20 = vld [vmem:[%s12806_s15 + $0x1da8] ss:$16 sps:$4 sm:$0xff]   ;;  %v12035_v44 = vld [vmem:[%s12806_s15 + $0x1dc4] ss:$16 sps:$4 sm:$0xff]  }
 0x414   : > { %6907 = vmatprep.subr.bf16.mxu0 %v11951_v27  ;;  %7522 = vmatprep.subr.bf16.mxu1 %v11954_v46  ;;  %v12038_v27 = vld [vmem:[%s12806_s15 + $0x1dcc] ss:$16 sps:$4 sm:$0xff]   ;;  %v12033_v46 = vld [vmem:[%s12806_s15 + $0x1dc0] ss:$16 sps:$4 sm:$0xff]  }
 0x416   : > { %6899 = vmatmul.mubr.bf16.vlgmr.msra.gmra.mrb[0].mxu0 %v1501_v26  ;;  %7514 = vmatmul.mubr.bf16.vlgmr.msra.gmra.mrb[0].mxu1 %v1501_v26  ;;  %v12041_v26 = vld [vmem:[%s12806_s15 + $0x1de4] ss:$16 sps:$4 sm:$0xff]  }
 0x417   : > { %6908 = vmatpush1.bf16.msra.mxu0 %v11949_v36  ;;  %7523 = vmatpush1.bf16.msra.mxu1 %v11952_v49  ;;  %v12044_v36 = vld [vmem:[%s12806_s15 + $0x1dec] ss:$16 sps:$4 sm:$0xff]   ;;  %v12039_v49 = vld [vmem:[%s12806_s15 + $0x1de0] ss:$16 sps:$4 sm:$0xff]  }
 0x418   : > { %6909 = vmatprep.subr.bf16.mxu0 %v11957_v50  ;;  %7524 = vmatprep.subr.bf16.mxu1 %v11960_v52  ;;  %v12042_v50 = vld [vmem:[%s12806_s15 + $0x1de8] ss:$16 sps:$4 sm:$0xff]   ;;  %v1486_v52 = vrot.slane %v13885_v43, %v12886_v51  ;;  %v340_v43 = vld [vmem:[#allocation2] sm:$0xf] }
 0x419   : > { %6939 = vmatprep.mubr.bf16.mxu0 %v1500_v41  ;;  %7554 = vmatprep.mubr.bf16.mxu1 %v1500_v41 }
 0x41b   : > { %6910 = vmatpush1.bf16.msra.mxu0 %v11955_v28  ;;  %7525 = vmatpush1.bf16.msra.mxu1 %v11958_v53 }
 0x41c   : > { %6911 = vmatprep.subr.bf16.mxu0 %v11963_v55  ;;  %7526 = vmatprep.subr.bf16.mxu1 %v11966_v57 }
 0x41f   : > { %6912 = vmatpush1.bf16.msra.mxu0 %v11961_v42  ;;  %7527 = vmatpush1.bf16.msra.mxu1 %v11964_v60 }
 0x420   : > { %6913 = vmatprep.subr.bf16.mxu0 %v11969_v61  ;;  %7528 = vmatprep.subr.bf16.mxu1 %v11972_v63 }
 0x423   : > { %6914 = vmatpush1.bf16.msra.mxu0 %v11967_v0  ;;  %7529 = vmatpush1.bf16.msra.mxu1 %v11970_v47 }
 0x424   : > { %6915 = vmatprep.subr.bf16.mxu0 %v11975_v1  ;;  %7530 = vmatprep.subr.bf16.mxu1 %v11978_v2 }
 0x427   : > { %6916 = vmatpush1.bf16.msra.mxu0 %v11973_v3  ;;  %7531 = vmatpush1.bf16.msra.mxu1 %v11976_v58 }
 0x428   : > { %6917 = vmatprep.subr.bf16.mxu0 %v11981_v4  ;;  %7532 = vmatprep.subr.bf16.mxu1 %v11984_v5  ;;  %v12047_v4 = vld [vmem:[%s12835_s2 + $0x4] ss:$24 sps:$4 sm:$0xff] (!%p9785_p8)  }
 0x429   : > { %v12049_v5 = vld [vmem:[%s12835_s2 + $0x304] ss:$24 sps:$4 sm:$0xff] (!%p9785_p8)  }
 0x42b   : > { %6918 = vmatpush1.bf16.msra.mxu0 %v11979_v6  ;;  %7533 = vmatpush1.bf16.msra.mxu1 %v11982_v59  ;;  %v12051_v6 = vld [vmem:[%s12835_s2] ss:$24 sps:$4 sm:$0xff] (!%p9785_p8)  }
 0x42c   : > { %6919 = vmatprep.subr.bf16.mxu0 %v11987_v8  ;;  %7534 = vmatprep.subr.bf16.mxu1 %v11990_v10  ;;  %v12052_v59 = vld [vmem:[%s12835_s2 + $0x300] ss:$24 sps:$4 sm:$0xff] (!%p9785_p8)   ;;  %v12053_v8 = vld [vmem:[%s12835_s2 + $0x34] ss:$24 sps:$4 sm:$0xff] (!%p9785_p8)  }
 0x42d   : > { %v12055_v10 = vld [vmem:[%s12835_s2 + $0x334] ss:$24 sps:$4 sm:$0xff] (!%p9785_p8)  }
 0x42f   : > { %6920 = vmatpush1.bf16.msra.mxu0 %v11985_v11  ;;  %7535 = vmatpush1.bf16.msra.mxu1 %v11988_v12  ;;  %v12057_v11 = vld [vmem:[%s12835_s2 + $0x30] ss:$24 sps:$4 sm:$0xff] (!%p9785_p8)  }
 0x430   : > { %6921 = vmatprep.subr.bf16.mxu0 %v11993_v56  ;;  %7536 = vmatprep.subr.bf16.mxu1 %v11996_v14  ;;  %v12058_v12 = vld [vmem:[%s12835_s2 + $0x330] ss:$24 sps:$4 sm:$0xff] (!%p9785_p8)   ;;  %v12059_v56 = vld [vmem:[%s12835_s2 + $0x64] ss:$24 sps:$4 sm:$0xff] (!%p9785_p8)  }
 0x431   : > { %v12061_v14 = vld [vmem:[%s12835_s2 + $0x364] ss:$24 sps:$4 sm:$0xff] (!%p9785_p8)  }
 0x433   : > { %6922 = vmatpush1.bf16.msra.mxu0 %v11991_v62  ;;  %7537 = vmatpush1.bf16.msra.mxu1 %v11994_v16  ;;  %v12063_v62 = vld [vmem:[%s12835_s2 + $0x60] ss:$24 sps:$4 sm:$0xff] (!%p9785_p8)  }
 0x434   : > { %6923 = vmatprep.subr.bf16.mxu0 %v11999_v17  ;;  %7538 = vmatprep.subr.bf16.mxu1 %v12002_v19  ;;  %v12064_v16 = vld [vmem:[%s12835_s2 + $0x360] ss:$24 sps:$4 sm:$0xff] (!%p9785_p8)   ;;  %v12065_v17 = vld [vmem:[%s12835_s2 + $0x94] ss:$24 sps:$4 sm:$0xff] (!%p9785_p8)  }
 0x435   : > { %v12067_v19 = vld [vmem:[%s12835_s2 + $0x394] ss:$24 sps:$4 sm:$0xff] (!%p9785_p8)  }
 0x437   : > { %6924 = vmatpush1.bf16.msra.mxu0 %v11997_v7  ;;  %7539 = vmatpush1.bf16.msra.mxu1 %v12000_v54  ;;  %v12069_v7 = vld [vmem:[%s12835_s2 + $0x90] ss:$24 sps:$4 sm:$0xff] (!%p9785_p8)  }
 0x438   : > { %6925 = vmatprep.subr.bf16.mxu0 %v12005_v21  ;;  %7540 = vmatprep.subr.bf16.mxu1 %v12008_v9  ;;  %v12070_v54 = vld [vmem:[%s12835_s2 + $0x390] ss:$24 sps:$4 sm:$0xff] (!%p9785_p8)   ;;  %v12071_v21 = vld [vmem:[%s12835_s2 + $0xc4] ss:$24 sps:$4 sm:$0xff] (!%p9785_p8)  }
 0x439   : > { %v12073_v9 = vld [vmem:[%s12835_s2 + $0x3c4] ss:$24 sps:$4 sm:$0xff] (!%p9785_p8)  }
 0x43b   : > { %6926 = vmatpush1.bf16.msra.mxu0 %v12003_v24  ;;  %7541 = vmatpush1.bf16.msra.mxu1 %v12006_v25  ;;  %v12075_v24 = vld [vmem:[%s12835_s2 + $0xc0] ss:$24 sps:$4 sm:$0xff] (!%p9785_p8)  }
 0x43c   : > { %6927 = vmatprep.subr.bf16.mxu0 %v12011_v29  ;;  %7542 = vmatprep.subr.bf16.mxu1 %v12014_v15  ;;  %v12076_v25 = vld [vmem:[%s12835_s2 + $0x3c0] ss:$24 sps:$4 sm:$0xff] (!%p9785_p8)   ;;  %v12077_v29 = vld [vmem:[%s12835_s2 + $0xf4] ss:$24 sps:$4 sm:$0xff] (!%p9785_p8)  }
 0x43d   : > { %v12079_v15 = vld [vmem:[%s12835_s2 + $0x3f4] ss:$24 sps:$4 sm:$0xff] (!%p9785_p8)  }
 0x43f   : > { %6928 = vmatpush1.bf16.msra.mxu0 %v12009_v13  ;;  %7543 = vmatpush1.bf16.msra.mxu1 %v12012_v31  ;;  %v12081_v13 = vld [vmem:[%s12835_s2 + $0xf0] ss:$24 sps:$4 sm:$0xff] (!%p9785_p8)  }
 0x440   : > { %6929 = vmatprep.subr.bf16.mxu0 %v12017_v32  ;;  %7544 = vmatprep.subr.bf16.mxu1 %v12020_v33  ;;  %v12082_v31 = vld [vmem:[%s12835_s2 + $0x3f0] ss:$24 sps:$4 sm:$0xff] (!%p9785_p8)   ;;  %v12083_v32 = vld [vmem:[%s12835_s2 + $0x124] ss:$24 sps:$4 sm:$0xff] (!%p9785_p8)  }
 0x441   : > { %v12085_v33 = vld [vmem:[%s12835_s2 + $0x424] ss:$24 sps:$4 sm:$0xff] (!%p9785_p8)  }
 0x443   : > { %6930 = vmatpush1.bf16.msra.mxu0 %v12015_v22  ;;  %7545 = vmatpush1.bf16.msra.mxu1 %v12018_v34  ;;  %v12087_v22 = vld [vmem:[%s12835_s2 + $0x120] ss:$24 sps:$4 sm:$0xff] (!%p9785_p8)  }
 0x444   : > { %6931 = vmatprep.subr.bf16.mxu0 %v12023_v18  ;;  %7546 = vmatprep.subr.bf16.mxu1 %v12026_v35  ;;  %v12088_v34 = vld [vmem:[%s12835_s2 + $0x420] ss:$24 sps:$4 sm:$0xff] (!%p9785_p8)   ;;  %v12089_v18 = vld [vmem:[%s12835_s2 + $0x154] ss:$24 sps:$4 sm:$0xff] (!%p9785_p8)  }
 0x445   : > { %v12091_v35 = vld [vmem:[%s12835_s2 + $0x454] ss:$24 sps:$4 sm:$0xff] (!%p9785_p8)  }
 0x447   : > { %6932 = vmatpush1.bf16.msra.mxu0 %v12021_v23  ;;  %7547 = vmatpush1.bf16.msra.mxu1 %v12024_v37  ;;  %v12093_v23 = vld [vmem:[%s12835_s2 + $0x150] ss:$24 sps:$4 sm:$0xff] (!%p9785_p8)  }
 0x448   : > { %6933 = vmatprep.subr.bf16.mxu0 %v12029_v38  ;;  %7548 = vmatprep.subr.bf16.mxu1 %v12032_v39  ;;  %v12094_v37 = vld [vmem:[%s12835_s2 + $0x450] ss:$24 sps:$4 sm:$0xff] (!%p9785_p8)   ;;  %v12095_v38 = vld [vmem:[%s12835_s2 + $0x184] ss:$24 sps:$4 sm:$0xff] (!%p9785_p8)  }
 0x449   : > { %v12097_v39 = vld [vmem:[%s12835_s2 + $0x484] ss:$24 sps:$4 sm:$0xff] (!%p9785_p8)  }
 0x44b   : > { %6934 = vmatpush1.bf16.msra.mxu0 %v12027_v30  ;;  %7549 = vmatpush1.bf16.msra.mxu1 %v12030_v20  ;;  %v12099_v30 = vld [vmem:[%s12835_s2 + $0x180] ss:$24 sps:$4 sm:$0xff] (!%p9785_p8)  }
 0x44c   : > { %6935 = vmatprep.subr.bf16.mxu0 %v12035_v44  ;;  %7550 = vmatprep.subr.bf16.mxu1 %v12038_v27  ;;  %v12100_v20 = vld [vmem:[%s12835_s2 + $0x480] ss:$24 sps:$4 sm:$0xff] (!%p9785_p8)   ;;  %v12101_v44 = vld [vmem:[%s12835_s2 + $0x1b4] ss:$24 sps:$4 sm:$0xff] (!%p9785_p8)  }
 0x44d   : > { %v12103_v27 = vld [vmem:[%s12835_s2 + $0x4b4] ss:$24 sps:$4 sm:$0xff] (!%p9785_p8)  }
 0x44f   : > { %6936 = vmatpush1.bf16.msra.mxu0 %v12033_v46  ;;  %7551 = vmatpush1.bf16.msra.mxu1 %v12036_v48  ;;  %v12105_v46 = vld [vmem:[%s12835_s2 + $0x1b0] ss:$24 sps:$4 sm:$0xff] (!%p9785_p8)  }
 0x450   : > { %6937 = vmatprep.subr.bf16.mxu0 %v12041_v26  ;;  %7552 = vmatprep.subr.bf16.mxu1 %v12044_v36  ;;  %v12106_v48 = vld [vmem:[%s12835_s2 + $0x4b0] ss:$24 sps:$4 sm:$0xff] (!%p9785_p8)   ;;  %v12107_v26 = vld [vmem:[%s12835_s2 + $0x1e4] ss:$24 sps:$4 sm:$0xff] (!%p9785_p8)  }
 0x451   : > { %v12109_v36 = vld [vmem:[%s12835_s2 + $0x4e4] ss:$24 sps:$4 sm:$0xff] (!%p9785_p8)  }
 0x453   : > { %6938 = vmatpush1.bf16.msra.mxu0 %v12039_v49  ;;  %7553 = vmatpush1.bf16.msra.mxu1 %v12042_v50  ;;  %v12111_v49 = vld [vmem:[%s12835_s2 + $0x1e0] ss:$24 sps:$4 sm:$0xff] (!%p9785_p8)  }
 0x454   : > { %9791 = vmatprep.subr.bf16.mxu1 (!%p9785_p8), %v12047_v4  ;;  %9855 = vmatprep.subr.bf16.mxu0 (!%p9785_p8), %v12049_v5  ;;  %v12112_v50 = vld [vmem:[%s12835_s2 + $0x4e0] ss:$24 sps:$4 sm:$0xff] (!%p9785_p8)   ;;  %v12127_v4 = vld [vmem:[%s12835_s2 + $0x574] ss:$24 sps:$4 sm:$0xff] (!%p9785_p8)   ;;  %v12129_v5 = vld [vmem:[%s12835_s2 + $0x270] ss:$24 sps:$4 sm:$0xff] (!%p9785_p8)  }
 0x456   : > { %6940 = vmatmul.mubr.bf16.vlgmr.msra.gmra.mrb[0].mxu0 %v1486_v52  ;;  %7555 = vmatmul.mubr.bf16.vlgmr.msra.gmra.mrb[0].mxu1 %v1486_v52  ;;  %v12113_v52 = vld [vmem:[%s12835_s2 + $0x214] ss:$24 sps:$4 sm:$0xff] (!%p9785_p8)  }
 0x457   : > { %9793 = vmatpush1.bf16.msra.mxu1 (!%p9785_p8), %v12051_v6  ;;  %9857 = vmatpush1.bf16.msra.mxu0 (!%p9785_p8), %v12052_v59  ;;  %v12130_v6 = vld [vmem:[%s12835_s2 + $0x570] ss:$24 sps:$4 sm:$0xff] (!%p9785_p8)   ;;  %v12131_v59 = vld [vmem:[%s12835_s2 + $0x2a4] ss:$24 sps:$4 sm:$0xff] (!%p9785_p8)  }
 0x458   : > { %9795 = vmatprep.subr.bf16.mxu1 (!%p9785_p8), %v12053_v8  ;;  %9859 = vmatprep.subr.bf16.mxu0 (!%p9785_p8), %v12055_v10  ;;  %v12133_v8 = vld [vmem:[%s12835_s2 + $0x5a4] ss:$24 sps:$4 sm:$0xff] (!%p9785_p8)   ;;  %v12135_v10 = vld [vmem:[%s12835_s2 + $0x2a0] ss:$24 sps:$4 sm:$0xff] (!%p9785_p8)  }
 0x45b   : > { %9797 = vmatpush1.bf16.msra.mxu1 (!%p9785_p8), %v12057_v11  ;;  %9861 = vmatpush1.bf16.msra.mxu0 (!%p9785_p8), %v12058_v12  ;;  %v12136_v11 = vld [vmem:[%s12835_s2 + $0x5a0] ss:$24 sps:$4 sm:$0xff] (!%p9785_p8)   ;;  %v12137_v12 = vld [vmem:[%s12835_s2 + $0x2d4] ss:$24 sps:$4 sm:$0xff] (!%p9785_p8)  }
 0x45c   : > { %9799 = vmatprep.subr.bf16.mxu1 (!%p9785_p8), %v12059_v56  ;;  %9863 = vmatprep.subr.bf16.mxu0 (!%p9785_p8), %v12061_v14  ;;  %v12139_v56 = vld [vmem:[%s12835_s2 + $0x5d4] ss:$24 sps:$4 sm:$0xff] (!%p9785_p8)   ;;  %v8185_v14 = vsub.s32 (!%p9785_p8), 0, %v12878_v45 }
 0x45f   : > { %9801 = vmatpush1.bf16.msra.mxu1 (!%p9785_p8), %v12063_v62  ;;  %9865 = vmatpush1.bf16.msra.mxu0 (!%p9785_p8), %v12064_v16  ;;  %v8193_v62 = vsub.s32 (!%p9785_p8), 2, %v12878_v45  ;;  %v12141_v16 = vld [vmem:[%s12835_s2 + $0x2d0] ss:$24 sps:$4 sm:$0xff] (!%p9785_p8)  }
 0x460   : > { %9803 = vmatprep.subr.bf16.mxu1 (!%p9785_p8), %v12065_v17  ;;  %9867 = vmatprep.subr.bf16.mxu0 (!%p9785_p8), %v12067_v19  ;;  %v12142_v17 = vld [vmem:[%s12835_s2 + $0x5d0] ss:$24 sps:$4 sm:$0xff] (!%p9785_p8)   ;;  %v12143_v19 = vld [vmem:[%s12835_s2 + $0xc] ss:$24 sps:$4 sm:$0xff] (!%p9785_p8)  }
 0x463   : > { %9805 = vmatpush1.bf16.msra.mxu1 (!%p9785_p8), %v12069_v7  ;;  %9869 = vmatpush1.bf16.msra.mxu0 (!%p9785_p8), %v12070_v54  ;;  %v12146_v7 = vld [vmem:[%s12835_s2 + $0x14] ss:$24 sps:$4 sm:$0xff] (!%p9785_p8)  }
 0x464   : > { %9807 = vmatprep.subr.bf16.mxu1 (!%p9785_p8), %v12071_v21  ;;  %9871 = vmatprep.subr.bf16.mxu0 (!%p9785_p8), %v12073_v9  ;;  %v12148_v9 = vld [vmem:[%s12835_s2 + $0x10] ss:$24 sps:$4 sm:$0xff] (!%p9785_p8)  }
 0x467   : > { %9809 = vmatpush1.bf16.msra.mxu1 (!%p9785_p8), %v12075_v24  ;;  %9873 = vmatpush1.bf16.msra.mxu0 (!%p9785_p8), %v12076_v25  ;;  %v12149_v24 = vld [vmem:[%s12835_s2 + $0x3c] ss:$24 sps:$4 sm:$0xff] (!%p9785_p8)  }
 0x468   : > { %9811 = vmatprep.subr.bf16.mxu1 (!%p9785_p8), %v12077_v29  ;;  %9875 = vmatprep.subr.bf16.mxu0 (!%p9785_p8), %v12079_v15  ;;  %v12152_v25 = vld [vmem:[%s12835_s2 + $0x44] ss:$24 sps:$4 sm:$0xff] (!%p9785_p8)   ;;  %v12151_v29 = vld [vmem:[%s12835_s2 + $0x38] ss:$24 sps:$4 sm:$0xff] (!%p9785_p8)  }
 0x469   : > { %v12154_v15 = vld [vmem:[%s12835_s2 + $0x40] ss:$24 sps:$4 sm:$0xff] (!%p9785_p8)  }
 0x46b   : > { %9813 = vmatpush1.bf16.msra.mxu1 (!%p9785_p8), %v12081_v13  ;;  %9877 = vmatpush1.bf16.msra.mxu0 (!%p9785_p8), %v12082_v31  ;;  %v12155_v13 = vld [vmem:[%s12835_s2 + $0x6c] ss:$24 sps:$4 sm:$0xff] (!%p9785_p8)  }
 0x46c   : > { %9815 = vmatprep.subr.bf16.mxu1 (!%p9785_p8), %v12083_v32  ;;  %9879 = vmatprep.subr.bf16.mxu0 (!%p9785_p8), %v12085_v33  ;;  %v12158_v31 = vld [vmem:[%s12835_s2 + $0x74] ss:$24 sps:$4 sm:$0xff] (!%p9785_p8)   ;;  %v12157_v32 = vld [vmem:[%s12835_s2 + $0x68] ss:$24 sps:$4 sm:$0xff] (!%p9785_p8)  }
 0x46d   : > { %v12160_v33 = vld [vmem:[%s12835_s2 + $0x70] ss:$24 sps:$4 sm:$0xff] (!%p9785_p8)  }
 0x46f   : > { %9817 = vmatpush1.bf16.msra.mxu1 (!%p9785_p8), %v12087_v22  ;;  %9881 = vmatpush1.bf16.msra.mxu0 (!%p9785_p8), %v12088_v34  ;;  %v12161_v22 = vld [vmem:[%s12835_s2 + $0x9c] ss:$24 sps:$4 sm:$0xff] (!%p9785_p8)  }
 0x470   : > { %9819 = vmatprep.subr.bf16.mxu1 (!%p9785_p8), %v12089_v18  ;;  %9883 = vmatprep.subr.bf16.mxu0 (!%p9785_p8), %v12091_v35  ;;  %v12164_v34 = vld [vmem:[%s12835_s2 + $0xa4] ss:$24 sps:$4 sm:$0xff] (!%p9785_p8)   ;;  %v12163_v18 = vld [vmem:[%s12835_s2 + $0x98] ss:$24 sps:$4 sm:$0xff] (!%p9785_p8)  }
 0x471   : > { %v12166_v35 = vld [vmem:[%s12835_s2 + $0xa0] ss:$24 sps:$4 sm:$0xff] (!%p9785_p8)  }
 0x473   : > { %9821 = vmatpush1.bf16.msra.mxu1 (!%p9785_p8), %v12093_v23  ;;  %9885 = vmatpush1.bf16.msra.mxu0 (!%p9785_p8), %v12094_v37  ;;  %v12167_v23 = vld [vmem:[%s12835_s2 + $0xcc] ss:$24 sps:$4 sm:$0xff] (!%p9785_p8)  }
 0x474   : > { %9823 = vmatprep.subr.bf16.mxu1 (!%p9785_p8), %v12095_v38  ;;  %9887 = vmatprep.subr.bf16.mxu0 (!%p9785_p8), %v12097_v39  ;;  %v12170_v37 = vld [vmem:[%s12835_s2 + $0xd4] ss:$24 sps:$4 sm:$0xff] (!%p9785_p8)   ;;  %v12169_v38 = vld [vmem:[%s12835_s2 + $0xc8] ss:$24 sps:$4 sm:$0xff] (!%p9785_p8)  }
 0x475   : > { %v12172_v39 = vld [vmem:[%s12835_s2 + $0xd0] ss:$24 sps:$4 sm:$0xff] (!%p9785_p8)  }
 0x477   : > { %9825 = vmatpush1.bf16.msra.mxu1 (!%p9785_p8), %v12099_v30  ;;  %9889 = vmatpush1.bf16.msra.mxu0 (!%p9785_p8), %v12100_v20  ;;  %v12173_v30 = vld [vmem:[%s12835_s2 + $0xfc] ss:$24 sps:$4 sm:$0xff] (!%p9785_p8)  }
 0x478   : > { %9827 = vmatprep.subr.bf16.mxu1 (!%p9785_p8), %v12101_v44  ;;  %9891 = vmatprep.subr.bf16.mxu0 (!%p9785_p8), %v12103_v27  ;;  %v12176_v20 = vld [vmem:[%s12835_s2 + $0x104] ss:$24 sps:$4 sm:$0xff] (!%p9785_p8)   ;;  %v12175_v44 = vld [vmem:[%s12835_s2 + $0xf8] ss:$24 sps:$4 sm:$0xff] (!%p9785_p8)  }
 0x479   : > { %v12178_v27 = vld [vmem:[%s12835_s2 + $0x100] ss:$24 sps:$4 sm:$0xff] (!%p9785_p8)  }
 0x47b   : > { %9829 = vmatpush1.bf16.msra.mxu1 (!%p9785_p8), %v12105_v46  ;;  %9893 = vmatpush1.bf16.msra.mxu0 (!%p9785_p8), %v12106_v48  ;;  %v12179_v46 = vld [vmem:[%s12835_s2 + $0x12c] ss:$24 sps:$4 sm:$0xff] (!%p9785_p8)  }
 0x47c   : > { %9831 = vmatprep.subr.bf16.mxu1 (!%p9785_p8), %v12107_v26  ;;  %9895 = vmatprep.subr.bf16.mxu0 (!%p9785_p8), %v12109_v36  ;;  %v12182_v48 = vld [vmem:[%s12835_s2 + $0x134] ss:$24 sps:$4 sm:$0xff] (!%p9785_p8)   ;;  %v12181_v26 = vld [vmem:[%s12835_s2 + $0x128] ss:$24 sps:$4 sm:$0xff] (!%p9785_p8)  }
 0x47d   : > { %v12184_v36 = vld [vmem:[%s12835_s2 + $0x130] ss:$24 sps:$4 sm:$0xff] (!%p9785_p8)  }
 0x47f   : > { %9833 = vmatpush1.bf16.msra.mxu1 (!%p9785_p8), %v12111_v49  ;;  %9897 = vmatpush1.bf16.msra.mxu0 (!%p9785_p8), %v12112_v50  ;;  %v12185_v49 = vld [vmem:[%s12835_s2 + $0x15c] ss:$24 sps:$4 sm:$0xff] (!%p9785_p8)  }
 0x480   : > { %9835 = vmatprep.subr.bf16.mxu1 (!%p9785_p8), %v12113_v52  ;;  %v12188_v50 = vld [vmem:[%s12835_s2 + $0x164] ss:$24 sps:$4 sm:$0xff] (!%p9785_p8)   ;;  %v12187_v52 = vld [vmem:[%s12835_s2 + $0x158] ss:$24 sps:$4 sm:$0xff] (!%p9785_p8)  }
 0x529   : > { %v6941_v41 = vpop.f32.mrb[0].mxu0  ;;  %v7556_v28 = vpop.f32.mrb[0].mxu1 }
 0x52a   : > { %v6943_v53 = vpop.f32.mrb[1].mxu0  ;;  %v7558_v55 = vpop.f32.mrb[1].mxu1 }
 0x52b   : > { %v7567_v57 = vcombine.low %v6941_v41, %v6943_v53  ;;  %v7568_v42 = vcombine.low %v7556_v28, %v7558_v55  ;;  %v6945_v60 = vpop.f32.mrb[2].mxu0  ;;  %v7560_v61 = vpop.f32.mrb[2].mxu1  ;;  %v12115_v41 = vld [vmem:[%s12835_s2 + $0x514] ss:$24 sps:$4 sm:$0xff] (!%p9785_p8)   ;;  %v7603_v53 = vld [vmem:[%s272_s9] sm:$0xf] (!%p9785_p8) }
 0x52c   : > { %v6946_v63 = vpop.f32.mrb[3].mxu0  ;;  %v7561_v0 = vpop.f32.mrb[3].mxu1  ;;  %v8189_v55 = vsub.s32 (!%p9785_p8), 1, %v12878_v45  ;;  %v8197_v61 = vsub.s32 (!%p9785_p8), 3, %v12878_v45  ;;  %9899 = vmatprep.subr.bf16.mxu0 (!%p9785_p8), %v12115_v41  ;;  %v12145_v45 = vld [vmem:[%s12835_s2 + $0x8] ss:$24 sps:$4 sm:$0xff] (!%p9785_p8)  }
 0x52d   : > { %v7575_v47 = vrot.slane %v7567_v57, %v12886_v51  ;;  %v7582_v1 = vrot.slane %v7568_v42, %v12886_v51  ;;  %v12117_v57 = vld [vmem:[%s12835_s2 + $0x210] ss:$24 sps:$4 sm:$0xff] (!%p9785_p8)   ;;  %v12119_v63 = vld [vmem:[%s12835_s2 + $0x244] ss:$24 sps:$4 sm:$0xff] (!%p9785_p8)   ;;  %v12190_v41 = vld [vmem:[%s12835_s2 + $0x160] ss:$24 sps:$4 sm:$0xff] (!%p9785_p8)  }
 0x52e   : > { %v12118_v42 = vld [vmem:[%s12835_s2 + $0x510] ss:$24 sps:$4 sm:$0xff] (!%p9785_p8)   ;;  %v12121_v0 = vld [vmem:[%s12835_s2 + $0x544] ss:$24 sps:$4 sm:$0xff] (!%p9785_p8)   ;;  %9837 = vmatpush1.bf16.msra.mxu1 (!%p9785_p8), %v12117_v57 }
 0x52f   : > { %v7583_v2 = vcombine.low %v7575_v47, %v7582_v1  ;;  %7601 = sbr.rel (%p9785_p8) target bundleno = 1700 (0x6a4), region = 56  ;;  %9901 = vmatpush1.bf16.msra.mxu0 (!%p9785_p8), %v12118_v42  ;;  %v12123_v1 = vld [vmem:[%s12835_s2 + $0x240] ss:$24 sps:$4 sm:$0xff] (!%p9785_p8)   ;;  %9839 = vmatprep.subr.bf16.mxu1 (!%p9785_p8), %v12119_v63  ;;  %v12196_v57 = vld [vmem:[%s12835_s2 + $0x190] ss:$24 sps:$4 sm:$0xff] (!%p9785_p8)  }
 0x530   : > { %9903 = vmatprep.subr.bf16.mxu0 (!%p9785_p8), %v12121_v0  ;;  %v12197_v42 = vld [vmem:[%s12835_s2 + $0x1bc] ss:$24 sps:$4 sm:$0xff] (!%p9785_p8)   ;;  %v12202_v63 = vld [vmem:[%s12835_s2 + $0x1c0] ss:$24 sps:$4 sm:$0xff] (!%p9785_p8)   ;;  %v12203_v0 = vld [vmem:[%s12835_s2 + $0x1ec] ss:$24 sps:$4 sm:$0xff] (!%p9785_p8)  }
 0x531   : > { %v7590_v3 = vrot.slane %v7583_v2, %v12886_v51  ;;  %v12124_v2 = vld [vmem:[%s12835_s2 + $0x540] ss:$24 sps:$4 sm:$0xff] (!%p9785_p8)  }
 0x532   : > { %9841 = vmatpush1.bf16.msra.mxu1 (!%p9785_p8), %v12123_v1  ;;  %v12205_v1 = vld [vmem:[%s12835_s2 + $0x1e8] ss:$24 sps:$4 sm:$0xff] (!%p9785_p8)  }
 0x533   : > { %v7592_v58 = vadd.f32 %v7590_v3, %v340_v43  ;;  %9905 = vmatpush1.bf16.msra.mxu0 (!%p9785_p8), %v12124_v2  ;;  %v12208_v2 = vld [vmem:[%s12835_s2 + $0x1f0] ss:$24 sps:$4 sm:$0xff] (!%p9785_p8)  }
 0x534   : > { %9907 = vmatprep.subr.bf16.mxu0 (!%p9785_p8), %v12127_v4  ;;  %v12211_v4 = vld [vmem:[%s12835_s2 + $0x218] ss:$24 sps:$4 sm:$0xff] (!%p9785_p8)  }
 0x535   : > { %7597 = vst.msk [vmem:[#allocation2] sm:$0xf] %vm7595_vm1, %v7592_v58  ;;  %v12125_v58 = vld [vmem:[%s12835_s2 + $0x274] ss:$24 sps:$4 sm:$0xff] (!%p9785_p8)  }
 0x536   : > { %9843 = vmatprep.subr.bf16.mxu1 %v12125_v58  ;;  %v12212_v58 = vld [vmem:[%s12835_s2 + $0x224] ss:$24 sps:$4 sm:$0xff]  }
 0x537   : > { %9845 = vmatpush1.bf16.msra.mxu1 %v12129_v5  ;;  %9909 = vmatpush1.bf16.msra.mxu0 %v12130_v6  ;;  %v12214_v5 = vld [vmem:[%s12835_s2 + $0x220] ss:$24 sps:$4 sm:$0xff]   ;;  %v12215_v6 = vld [vmem:[%s12835_s2 + $0x24c] ss:$24 sps:$4 sm:$0xff]  }
 0x538   : > { %9847 = vmatprep.subr.bf16.mxu1 %v12131_v59  ;;  %9911 = vmatprep.subr.bf16.mxu0 %v12133_v8  ;;  %v12218_v59 = vld [vmem:[%s12835_s2 + $0x254] ss:$24 sps:$4 sm:$0xff]   ;;  %v12217_v8 = vld [vmem:[%s12835_s2 + $0x248] ss:$24 sps:$4 sm:$0xff]  }
 0x53b   : > { %9849 = vmatpush1.bf16.msra.mxu1 %v12135_v10  ;;  %9913 = vmatpush1.bf16.msra.mxu0 %v12136_v11  ;;  %v12220_v10 = vld [vmem:[%s12835_s2 + $0x250] ss:$24 sps:$4 sm:$0xff]   ;;  %v12221_v11 = vld [vmem:[%s12835_s2 + $0x27c] ss:$24 sps:$4 sm:$0xff]  }
 0x53c   : > { %v7602_v28 = vld [vmem:[#allocation2] sm:$0xf]  ;;  %9851 = vmatprep.subr.bf16.mxu1 %v12137_v12  ;;  %9915 = vmatprep.subr.bf16.mxu0 %v12139_v56  ;;  %v12224_v12 = vld [vmem:[%s12835_s2 + $0x284] ss:$24 sps:$4 sm:$0xff]   ;;  %v12223_v56 = vld [vmem:[%s12835_s2 + $0x278] ss:$24 sps:$4 sm:$0xff]  }
 0x53d   : > { %v7604_v60 = vadd.f32 %v7603_v53, %v7602_v28  ;;  %v12191_v28 = vld [vmem:[%s12835_s2 + $0x18c] ss:$24 sps:$4 sm:$0xff]  }
 0x53e   : > { %v12194_v53 = vld [vmem:[%s12835_s2 + $0x194] ss:$24 sps:$4 sm:$0xff]  }
 0x53f   : > { %v7605_v47 = vmax.f32 %v7604_v60, 0.0  ;;  %9853 = vmatpush1.bf16.msra.mxu1 %v12141_v16  ;;  %9917 = vmatpush1.bf16.msra.mxu0 %v12142_v17  ;;  %v12200_v60 = vld [vmem:[%s12835_s2 + $0x1c4] ss:$24 sps:$4 sm:$0xff]   ;;  %v12230_v16 = vld [vmem:[%s12835_s2 + $0x2b4] ss:$24 sps:$4 sm:$0xff]  }
 0x540   : > { %9919 = vmatprep.subr.bf16.mxu1 %v12143_v19  ;;  %10047 = vmatprep.subr.bf16.mxu0 %v12146_v7  ;;  %v12229_v17 = vld [vmem:[%s12835_s2 + $0x2a8] ss:$24 sps:$4 sm:$0xff]   ;;  %v12233_v7 = vld [vmem:[%s12835_s2 + $0x2dc] ss:$24 sps:$4 sm:$0xff]  }
 0x541   : > { %v8190_v43 = vrot.slane %v7605_v47, %v8189_v55  ;;  %v14021_v3 = vrot.slane %v7605_v47, %v8197_v61  ;;  %v14040_v54 = vrot.slane %v7605_v47, %v8185_v14  ;;  %v14042_v21 = vrot.slane %v7605_v47, %v8193_v62  ;;  %v12193_v55 = vld [vmem:[%s12835_s2 + $0x188] ss:$24 sps:$4 sm:$0xff]   ;;  %v12199_v61 = vld [vmem:[%s12835_s2 + $0x1b8] ss:$24 sps:$4 sm:$0xff]   ;;  %v12206_v47 = vld [vmem:[%s12835_s2 + $0x1f4] ss:$24 sps:$4 sm:$0xff]  }
 0x542   : > { %v12226_v14 = vld [vmem:[%s12835_s2 + $0x280] ss:$24 sps:$4 sm:$0xff]   ;;  %v12227_v62 = vld [vmem:[%s12835_s2 + $0x2ac] ss:$24 sps:$4 sm:$0xff]   ;;  %v12232_v19 = vld [vmem:[%s12835_s2 + $0x2b0] ss:$24 sps:$4 sm:$0xff]  }
 0x543   : > { %8267 = vmatprep.mubr.f32.mxu1 %v8190_v43  ;;  %8338 = vmatprep.mubr.f32.mxu0 %v14021_v3 }
 0x544   : > { %8268 = vmatmul.mubr.f32.vlgmr.msra.gmra.mrb[0].mxu1 %v14040_v54  ;;  %8339 = vmatmul.mubr.f32.vlgmr.msra.gmra.mrb[0].mxu0 %v14042_v21 }
 0x545   : > { %9921 = vmatpush1.bf16.msra.mxu1 %v12145_v45  ;;  %10049 = vmatpush1.bf16.msra.mxu0 %v12148_v9  ;;  %v12236_v45 = vld [vmem:[%s12835_s2 + $0x2e4] ss:$24 sps:$4 sm:$0xff]   ;;  %v12235_v9 = vld [vmem:[%s12835_s2 + $0x2d8] ss:$24 sps:$4 sm:$0xff]  }
 0x546   : > { %9923 = vmatprep.subr.bf16.mxu1 %v12149_v24  ;;  %10051 = vmatprep.subr.bf16.mxu0 %v12152_v25  ;;  %v12238_v24 = vld [vmem:[%s12835_s2 + $0x2e0] ss:$24 sps:$4 sm:$0xff]   ;;  %v12239_v25 = vld [vmem:[%s12835_s2 + $0x30c] ss:$24 sps:$4 sm:$0xff]  }
 0x547   : > { %8409 = vmatprep.mubr.f32.mxu1 %v8190_v43  ;;  %8551 = vmatprep.mubr.f32.mxu0 %v8190_v43  ;;  %v12209_v43 = vld [vmem:[%s12835_s2 + $0x21c] ss:$24 sps:$4 sm:$0xff]  }
 0x549   : > { %9925 = vmatpush1.bf16.msra.mxu1 %v12151_v29  ;;  %10053 = vmatpush1.bf16.msra.mxu0 %v12154_v15  ;;  %v12242_v29 = vld [vmem:[%s12835_s2 + $0x314] ss:$24 sps:$4 sm:$0xff]   ;;  %v12241_v15 = vld [vmem:[%s12835_s2 + $0x308] ss:$24 sps:$4 sm:$0xff]  }
 0x54a   : > { %9927 = vmatprep.subr.bf16.mxu1 %v12155_v13  ;;  %10055 = vmatprep.subr.bf16.mxu0 %v12158_v31  ;;  %v12244_v13 = vld [vmem:[%s12835_s2 + $0x310] ss:$24 sps:$4 sm:$0xff]   ;;  %v12245_v31 = vld [vmem:[%s12835_s2 + $0x33c] ss:$24 sps:$4 sm:$0xff]  }
 0x54d   : > { %9929 = vmatpush1.bf16.msra.mxu1 %v12157_v32  ;;  %10057 = vmatpush1.bf16.msra.mxu0 %v12160_v33  ;;  %v12248_v32 = vld [vmem:[%s12835_s2 + $0x344] ss:$24 sps:$4 sm:$0xff]   ;;  %v12247_v33 = vld [vmem:[%s12835_s2 + $0x338] ss:$24 sps:$4 sm:$0xff]  }
 0x54e   : > { %9931 = vmatprep.subr.bf16.mxu1 %v12161_v22  ;;  %10059 = vmatprep.subr.bf16.mxu0 %v12164_v34  ;;  %v12250_v22 = vld [vmem:[%s12835_s2 + $0x340] ss:$24 sps:$4 sm:$0xff]   ;;  %v12251_v34 = vld [vmem:[%s12835_s2 + $0x36c] ss:$24 sps:$4 sm:$0xff]  }
 0x551   : > { %9933 = vmatpush1.bf16.msra.mxu1 %v12163_v18  ;;  %10061 = vmatpush1.bf16.msra.mxu0 %v12166_v35  ;;  %v12254_v18 = vld [vmem:[%s12835_s2 + $0x374] ss:$24 sps:$4 sm:$0xff]   ;;  %v12256_v35 = vld [vmem:[%s12835_s2 + $0x370] ss:$24 sps:$4 sm:$0xff]  }
 0x552   : > { %9935 = vmatprep.subr.bf16.mxu1 %v12167_v23  ;;  %10063 = vmatprep.subr.bf16.mxu0 %v12170_v37  ;;  %v12257_v23 = vld [vmem:[%s12835_s2 + $0x39c] ss:$24 sps:$4 sm:$0xff]  }
 0x553   : > { %v12260_v37 = vld [vmem:[%s12835_s2 + $0x3a4] ss:$24 sps:$4 sm:$0xff]  }
 0x555   : > { %9937 = vmatpush1.bf16.msra.mxu1 %v12169_v38  ;;  %10065 = vmatpush1.bf16.msra.mxu0 %v12172_v39  ;;  %v12259_v38 = vld [vmem:[%s12835_s2 + $0x398] ss:$24 sps:$4 sm:$0xff]  }
 0x556   : > { %9939 = vmatprep.subr.bf16.mxu1 %v12173_v30  ;;  %10067 = vmatprep.subr.bf16.mxu0 %v12176_v20  ;;  %v12262_v39 = vld [vmem:[%s12835_s2 + $0x3a0] ss:$24 sps:$4 sm:$0xff]   ;;  %v12266_v30 = vld [vmem:[%s12835_s2 + $0x3d4] ss:$24 sps:$4 sm:$0xff]  }
 0x557   : > { %v12265_v20 = vld [vmem:[%s12835_s2 + $0x3c8] ss:$24 sps:$4 sm:$0xff]  }
 0x559   : > { %9941 = vmatpush1.bf16.msra.mxu1 %v12175_v44  ;;  %10069 = vmatpush1.bf16.msra.mxu0 %v12178_v27  ;;  %v12268_v44 = vld [vmem:[%s12835_s2 + $0x3d0] ss:$24 sps:$4 sm:$0xff]   ;;  %v12269_v27 = vld [vmem:[%s12835_s2 + $0x3fc] ss:$24 sps:$4 sm:$0xff]  }
 0x55a   : > { %9943 = vmatprep.subr.bf16.mxu1 %v12179_v46  ;;  %10071 = vmatprep.subr.bf16.mxu0 %v12182_v48  ;;  %v12272_v46 = vld [vmem:[%s12835_s2 + $0x404] ss:$24 sps:$4 sm:$0xff]   ;;  %v12271_v48 = vld [vmem:[%s12835_s2 + $0x3f8] ss:$24 sps:$4 sm:$0xff]  }
 0x55d   : > { %9945 = vmatpush1.bf16.msra.mxu1 %v12181_v26  ;;  %10073 = vmatpush1.bf16.msra.mxu0 %v12184_v36  ;;  %v12274_v26 = vld [vmem:[%s12835_s2 + $0x400] ss:$24 sps:$4 sm:$0xff]   ;;  %v12275_v36 = vld [vmem:[%s12835_s2 + $0x42c] ss:$24 sps:$4 sm:$0xff]  }
 0x55e   : > { %9947 = vmatprep.subr.bf16.mxu1 %v12185_v49  ;;  %10075 = vmatprep.subr.bf16.mxu0 %v12188_v50  ;;  %v12278_v49 = vld [vmem:[%s12835_s2 + $0x434] ss:$24 sps:$4 sm:$0xff]   ;;  %v12277_v50 = vld [vmem:[%s12835_s2 + $0x428] ss:$24 sps:$4 sm:$0xff]  }
 0x561   : > { %9949 = vmatpush1.bf16.msra.mxu1 %v12187_v52  ;;  %10077 = vmatpush1.bf16.msra.mxu0 %v12190_v41  ;;  %v12280_v52 = vld [vmem:[%s12835_s2 + $0x430] ss:$24 sps:$4 sm:$0xff]   ;;  %v12281_v41 = vld [vmem:[%s12835_s2 + $0x45c] ss:$24 sps:$4 sm:$0xff]  }
 0x562   : > { %9951 = vmatprep.subr.bf16.mxu1 %v12191_v28  ;;  %10079 = vmatprep.subr.bf16.mxu0 %v12194_v53  ;;  %v12284_v28 = vld [vmem:[%s12835_s2 + $0x464] ss:$24 sps:$4 sm:$0xff]   ;;  %v12283_v53 = vld [vmem:[%s12835_s2 + $0x458] ss:$24 sps:$4 sm:$0xff]  }
 0x565   : > { %9953 = vmatpush1.bf16.msra.mxu1 %v12193_v55  ;;  %10081 = vmatpush1.bf16.msra.mxu0 %v12196_v57  ;;  %v12286_v55 = vld [vmem:[%s12835_s2 + $0x460] ss:$24 sps:$4 sm:$0xff]   ;;  %v12287_v57 = vld [vmem:[%s12835_s2 + $0x48c] ss:$24 sps:$4 sm:$0xff]  }
 0x566   : > { %9955 = vmatprep.subr.bf16.mxu1 %v12197_v42  ;;  %10083 = vmatprep.subr.bf16.mxu0 %v12200_v60  ;;  %v12290_v42 = vld [vmem:[%s12835_s2 + $0x494] ss:$24 sps:$4 sm:$0xff]   ;;  %v12289_v60 = vld [vmem:[%s12835_s2 + $0x488] ss:$24 sps:$4 sm:$0xff]  }
 0x569   : > { %9957 = vmatpush1.bf16.msra.mxu1 %v12199_v61  ;;  %10085 = vmatpush1.bf16.msra.mxu0 %v12202_v63  ;;  %v12292_v61 = vld [vmem:[%s12835_s2 + $0x490] ss:$24 sps:$4 sm:$0xff]   ;;  %v12293_v63 = vld [vmem:[%s12835_s2 + $0x4bc] ss:$24 sps:$4 sm:$0xff]  }
 0x56a   : > { %9959 = vmatprep.subr.bf16.mxu1 %v12203_v0  ;;  %10087 = vmatprep.subr.bf16.mxu0 %v12206_v47  ;;  %v12296_v0 = vld [vmem:[%s12835_s2 + $0x4c4] ss:$24 sps:$4 sm:$0xff]   ;;  %v12295_v47 = vld [vmem:[%s12835_s2 + $0x4b8] ss:$24 sps:$4 sm:$0xff]  }
 0x56d   : > { %9961 = vmatpush1.bf16.msra.mxu1 %v12205_v1  ;;  %10089 = vmatpush1.bf16.msra.mxu0 %v12208_v2  ;;  %v12298_v1 = vld [vmem:[%s12835_s2 + $0x4c0] ss:$24 sps:$4 sm:$0xff]   ;;  %v12299_v2 = vld [vmem:[%s12835_s2 + $0x4ec] ss:$24 sps:$4 sm:$0xff]  }
 0x56e   : > { %9963 = vmatprep.subr.bf16.mxu1 %v12209_v43  ;;  %10091 = vmatprep.subr.bf16.mxu0 %v12212_v58  ;;  %v12302_v43 = vld [vmem:[%s12835_s2 + $0x4f4] ss:$24 sps:$4 sm:$0xff]   ;;  %v12301_v58 = vld [vmem:[%s12835_s2 + $0x4e8] ss:$24 sps:$4 sm:$0xff]  }
 0x571   : > { %9965 = vmatpush1.bf16.msra.mxu1 %v12211_v4  ;;  %10093 = vmatpush1.bf16.msra.mxu0 %v12214_v5  ;;  %v12304_v4 = vld [vmem:[%s12835_s2 + $0x4f0] ss:$24 sps:$4 sm:$0xff]   ;;  %v12305_v5 = vld [vmem:[%s12835_s2 + $0x51c] ss:$24 sps:$4 sm:$0xff]  }
 0x572   : > { %9967 = vmatprep.subr.bf16.mxu1 %v12215_v6  ;;  %10095 = vmatprep.subr.bf16.mxu0 %v12218_v59  ;;  %v12308_v6 = vld [vmem:[%s12835_s2 + $0x524] ss:$24 sps:$4 sm:$0xff]   ;;  %v12307_v59 = vld [vmem:[%s12835_s2 + $0x518] ss:$24 sps:$4 sm:$0xff]  }
 0x575   : > { %9969 = vmatpush1.bf16.msra.mxu1 %v12217_v8  ;;  %10097 = vmatpush1.bf16.msra.mxu0 %v12220_v10  ;;  %v12310_v8 = vld [vmem:[%s12835_s2 + $0x520] ss:$24 sps:$4 sm:$0xff]   ;;  %v12311_v10 = vld [vmem:[%s12835_s2 + $0x54c] ss:$24 sps:$4 sm:$0xff]  }
 0x576   : > { %9971 = vmatprep.subr.bf16.mxu1 %v12221_v11  ;;  %10099 = vmatprep.subr.bf16.mxu0 %v12224_v12  ;;  %v12314_v11 = vld [vmem:[%s12835_s2 + $0x554] ss:$24 sps:$4 sm:$0xff]   ;;  %v12313_v12 = vld [vmem:[%s12835_s2 + $0x548] ss:$24 sps:$4 sm:$0xff]  }
 0x579   : > { %9973 = vmatpush1.bf16.msra.mxu1 %v12223_v56  ;;  %10101 = vmatpush1.bf16.msra.mxu0 %v12226_v14  ;;  %v12316_v56 = vld [vmem:[%s12835_s2 + $0x550] ss:$24 sps:$4 sm:$0xff]   ;;  %v12317_v14 = vld [vmem:[%s12835_s2 + $0x57c] ss:$24 sps:$4 sm:$0xff]  }
 0x57a   : > { %9975 = vmatprep.subr.bf16.mxu1 %v12227_v62  ;;  %10103 = vmatprep.subr.bf16.mxu0 %v12230_v16  ;;  %v12320_v62 = vld [vmem:[%s12835_s2 + $0x584] ss:$24 sps:$4 sm:$0xff]   ;;  %v12319_v16 = vld [vmem:[%s12835_s2 + $0x578] ss:$24 sps:$4 sm:$0xff]  }
 0x57d   : > { %9977 = vmatpush1.bf16.msra.mxu1 %v12229_v17  ;;  %10105 = vmatpush1.bf16.msra.mxu0 %v12232_v19  ;;  %v12322_v17 = vld [vmem:[%s12835_s2 + $0x580] ss:$24 sps:$4 sm:$0xff]   ;;  %v12323_v19 = vld [vmem:[%s12835_s2 + $0x5ac] ss:$24 sps:$4 sm:$0xff]  }
 0x57e   : > { %9979 = vmatprep.subr.bf16.mxu1 %v12233_v7  ;;  %10107 = vmatprep.subr.bf16.mxu0 %v12236_v45  ;;  %v12326_v7 = vld [vmem:[%s12835_s2 + $0x5b4] ss:$24 sps:$4 sm:$0xff]   ;;  %v12325_v45 = vld [vmem:[%s12835_s2 + $0x5a8] ss:$24 sps:$4 sm:$0xff]  }
 0x581   : > { %9981 = vmatpush1.bf16.msra.mxu1 %v12235_v9  ;;  %10109 = vmatpush1.bf16.msra.mxu0 %v12238_v24  ;;  %v12328_v9 = vld [vmem:[%s12835_s2 + $0x5b0] ss:$24 sps:$4 sm:$0xff]   ;;  %v12329_v24 = vld [vmem:[%s12835_s2 + $0x5dc] ss:$24 sps:$4 sm:$0xff]  }
 0x582   : > { %9983 = vmatprep.subr.bf16.mxu1 %v12239_v25  ;;  %10111 = vmatprep.subr.bf16.mxu0 %v12242_v29  ;;  %v12332_v25 = vld [vmem:[%s12835_s2 + $0x5e4] ss:$24 sps:$4 sm:$0xff]   ;;  %v12331_v29 = vld [vmem:[%s12835_s2 + $0x5d8] ss:$24 sps:$4 sm:$0xff]  }
 0x584   : > { %8410 = vmatmul.mubr.f32.vlgmr.msra.gmra.mrb[2].mxu1 %v14040_v54  ;;  %8552 = vmatmul.mubr.f32.vlgmr.msra.gmra.mrb[2].mxu0 %v14040_v54  ;;  %v12253_v54 = vld [vmem:[%s12835_s2 + $0x368] ss:$24 sps:$4 sm:$0xff]  }
 0x585   : > { %9985 = vmatpush1.bf16.msra.mxu1 %v12241_v15  ;;  %10113 = vmatpush1.bf16.msra.mxu0 %v12244_v13  ;;  %v12334_v15 = vld [vmem:[%s12835_s2 + $0x5e0] ss:$24 sps:$4 sm:$0xff]  }
 0x586   : > { %9987 = vmatprep.subr.bf16.mxu1 %v12245_v31  ;;  %10115 = vmatprep.subr.bf16.mxu0 %v12248_v32 }
 0x587   : > { %8480 = vmatprep.mubr.f32.mxu1 %v14021_v3  ;;  %8622 = vmatprep.mubr.f32.mxu0 %v14021_v3  ;;  %v12263_v3 = vld [vmem:[%s12835_s2 + $0x3cc] ss:$24 sps:$4 sm:$0xff]  }
 0x589   : > { %9989 = vmatpush1.bf16.msra.mxu1 %v12247_v33  ;;  %10117 = vmatpush1.bf16.msra.mxu0 %v12250_v22 }
 0x58a   : > { %9991 = vmatprep.subr.bf16.mxu1 %v12251_v34  ;;  %10119 = vmatprep.subr.bf16.mxu0 %v12254_v18 }
 0x58d   : > { %9993 = vmatpush1.bf16.msra.mxu1 %v12253_v54  ;;  %10121 = vmatpush1.bf16.msra.mxu0 %v12256_v35 }
 0x58e   : > { %9995 = vmatprep.subr.bf16.mxu1 %v12257_v23  ;;  %10123 = vmatprep.subr.bf16.mxu0 %v12260_v37 }
 0x591   : > { %9997 = vmatpush1.bf16.msra.mxu1 %v12259_v38  ;;  %10125 = vmatpush1.bf16.msra.mxu0 %v12262_v39 }
 0x592   : > { %9999 = vmatprep.subr.bf16.mxu1 %v12263_v3  ;;  %10127 = vmatprep.subr.bf16.mxu0 %v12266_v30 }
 0x595   : > { %10001 = vmatpush1.bf16.msra.mxu1 %v12265_v20  ;;  %10129 = vmatpush1.bf16.msra.mxu0 %v12268_v44 }
 0x596   : > { %10003 = vmatprep.subr.bf16.mxu1 %v12269_v27  ;;  %10131 = vmatprep.subr.bf16.mxu0 %v12272_v46 }
 0x599   : > { %10005 = vmatpush1.bf16.msra.mxu1 %v12271_v48  ;;  %10133 = vmatpush1.bf16.msra.mxu0 %v12274_v26 }
 0x59a   : > { %10007 = vmatprep.subr.bf16.mxu1 %v12275_v36  ;;  %10135 = vmatprep.subr.bf16.mxu0 %v12278_v49 }
 0x59d   : > { %10009 = vmatpush1.bf16.msra.mxu1 %v12277_v50  ;;  %10137 = vmatpush1.bf16.msra.mxu0 %v12280_v52 }
 0x59e   : > { %10011 = vmatprep.subr.bf16.mxu1 %v12281_v41  ;;  %10139 = vmatprep.subr.bf16.mxu0 %v12284_v28 }
 0x5a1   : > { %10013 = vmatpush1.bf16.msra.mxu1 %v12283_v53  ;;  %10141 = vmatpush1.bf16.msra.mxu0 %v12286_v55 }
 0x5a2   : > { %10015 = vmatprep.subr.bf16.mxu1 %v12287_v57  ;;  %10143 = vmatprep.subr.bf16.mxu0 %v12290_v42 }
 0x5a5   : > { %10017 = vmatpush1.bf16.msra.mxu1 %v12289_v60  ;;  %10145 = vmatpush1.bf16.msra.mxu0 %v12292_v61 }
 0x5a6   : > { %10019 = vmatprep.subr.bf16.mxu1 %v12293_v63  ;;  %10147 = vmatprep.subr.bf16.mxu0 %v12296_v0 }
 0x5a9   : > { %10021 = vmatpush1.bf16.msra.mxu1 %v12295_v47  ;;  %10149 = vmatpush1.bf16.msra.mxu0 %v12298_v1 }
 0x5aa   : > { %10023 = vmatprep.subr.bf16.mxu1 %v12299_v2  ;;  %10151 = vmatprep.subr.bf16.mxu0 %v12302_v43 }
 0x5ad   : > { %10025 = vmatpush1.bf16.msra.mxu1 %v12301_v58  ;;  %10153 = vmatpush1.bf16.msra.mxu0 %v12304_v4 }
 0x5ae   : > { %10027 = vmatprep.subr.bf16.mxu1 %v12305_v5  ;;  %10155 = vmatprep.subr.bf16.mxu0 %v12308_v6 }
 0x5b1   : > { %10029 = vmatpush1.bf16.msra.mxu1 %v12307_v59  ;;  %10157 = vmatpush1.bf16.msra.mxu0 %v12310_v8 }
 0x5b2   : > { %10031 = vmatprep.subr.bf16.mxu1 %v12311_v10  ;;  %10159 = vmatprep.subr.bf16.mxu0 %v12314_v11 }
 0x5b5   : > { %10033 = vmatpush1.bf16.msra.mxu1 %v12313_v12  ;;  %10161 = vmatpush1.bf16.msra.mxu0 %v12316_v56 }
 0x5b6   : > { %10035 = vmatprep.subr.bf16.mxu1 %v12317_v14  ;;  %10163 = vmatprep.subr.bf16.mxu0 %v12320_v62 }
 0x5b9   : > { %10037 = vmatpush1.bf16.msra.mxu1 %v12319_v16  ;;  %10165 = vmatpush1.bf16.msra.mxu0 %v12322_v17 }
 0x5ba   : > { %10039 = vmatprep.subr.bf16.mxu1 %v12323_v19  ;;  %10167 = vmatprep.subr.bf16.mxu0 %v12326_v7 }
 0x5bd   : > { %10041 = vmatpush1.bf16.msra.mxu1 %v12325_v45  ;;  %10169 = vmatpush1.bf16.msra.mxu0 %v12328_v9 }
 0x5be   : > { %10043 = vmatprep.subr.bf16.mxu1 %v12329_v24  ;;  %10171 = vmatprep.subr.bf16.mxu0 %v12332_v25 }
 0x5c1   : > { %10045 = vmatpush1.bf16.msra.mxu1 %v12331_v29  ;;  %10173 = vmatpush1.bf16.msra.mxu0 %v12334_v15 }
 0x5c4   : > { %8481 = vmatmul.mubr.f32.vlgmr.msra.gmra.mrb[2].mxu1 %v14042_v21  ;;  %8623 = vmatmul.mubr.f32.vlgmr.msra.gmra.mrb[2].mxu0 %v14042_v21 }
 0x617   : > { %v8269_v13 = vpop.f32.mrb[0].mxu1  ;;  %v8340_v31 = vpop.f32.mrb[0].mxu0 }
 0x618   : > { %v8341_v32 = vadd.f32 %v8340_v31, %v8269_v13  ;;  %v8271_v33 = vpop.f32.mrb[1].mxu1  ;;  %v8342_v22 = vpop.f32.mrb[1].mxu0 }
 0x619   : > { %v8343_v34 = vadd.f32 %v8342_v22, %v8271_v33 }
 0x61b   : > { %v8635_v18 = vcombine.low %v8341_v32, %v8343_v34 }
 0x61d   : > { %v8644_v3 = vrot.slane %v8635_v18, %v12886_v51 }
 0x697   : > { %v8482_v54 = vpop.f32.mrb[2].mxu1  ;;  %v8624_v35 = vpop.f32.mrb[2].mxu0 }
 0x698   : > { %v8484_v23 = vpop.f32.mrb[3].mxu1  ;;  %v8626_v37 = vpop.f32.mrb[3].mxu0 }
 0x699   : > { %v8636_v38 = vcombine.low %v8482_v54, %v8484_v23  ;;  %v8637_v39 = vcombine.low %v8624_v35, %v8626_v37 }
 0x69b   : > { %v8651_v30 = vrot.slane %v8636_v38, %v12886_v51  ;;  %v8658_v21 = vrot.slane %v8637_v39, %v12886_v51 }
 0x69d   : > { %v8659_v20 = vcombine.low %v8644_v3, %v8651_v30  ;;  %v8673_v27 = vrot.slane %v8658_v21, %v12886_v51 }
 0x69f   : > { %v8666_v44 = vrot.slane %v8659_v20, %v12886_v51 }
 0x6a1   : > { %v8674_v46 = vcombine.low %v8666_v44, %v8673_v27 }
 0x6a3   : > { %8678 = vst.msk [vmem:[%s12833_s18] sm:$0x3f] %vm8676_vm2, %v8674_v46 }
 0x6a4 PF: > { %s20_s25 = sadd.s32 1, %s12520_s25   ;;  %s14257_s21 = sld [smem:[#allocation10_spill]] }
 0x6a5   : > { %p17_p10 = scmp.ge.s32.totalorder %s20_s25, 10   ;;  %s14258_s17 = sld [smem:[#allocation14_spill]] }
 0x6a6   : > { %s14259_s22 = sld [smem:[#allocation15_spill]]  ;;  %s14260_s14 = sld [smem:[#allocation11_spill]] }
 0x6a7   : > { %s14261_s23 = sld [smem:[#allocation12_spill]]  ;;  %s14262_s11 = sld [smem:[#allocation13_spill]] }
 0x6a8   : > { %s14263_s15 = smov %s12484_s16  ;;  %s14265_s18 = smov %s12496_s19 }
 0x6a9   : > { %s14266_s19 = smov %s12500_s20  ;;  %19 = sbr.rel (!%p17_p10) target bundleno = 12 (0xc), region = 111 }
 0x6aa   : > { %s14264_s16 = smov %s14257_s21 }
 0x6ac   : > { %s14267_s20 = smov %s14259_s22  ;;  %s14268_s21 = smov %s14260_s14 }
 0x6ad   : > { %s14269_s22 = smov %s12516_s24  ;;  %s14270_s24 = smov %s14262_s11 }
 0x6b0   :  { %8698 = vsyncpa [#allocation4], 1 }
 0x6b1   :  { %8700 = vsyncpa [#allocation4 + $0x1], 1 }
 0x6b2   :  { %8701 = vsyncpa [#allocation6], 1 }
 0x6b3   :  { %8703 = vsyncpa [#allocation6 + $0x1], 1 }

</bundles_post_ra>
